<compile_context>
chip_gen: v7x
topology: tpu7x:2x2x1
jax: 0.10.0
libtpu: 0.0.40
codegen_flags: <defaults>
</compile_context>

<pallas_src>
import numpy as np
import jax
import jax.numpy as jnp
from jax.experimental import pallas as pl
from jax.experimental.pallas import tpu as pltpu

ALPHA = 0.2  # LeakyReLU negative slope


def _leaky(x, alpha=ALPHA):
    return jnp.where(x >= 0, x, alpha * x)


# ----------------------------------------------------------------------------
# Static network plan
# ----------------------------------------------------------------------------
def _network_plan(h_in, cm):
    """Per dw+pw block: (input spatial, in channels, out channels)."""
    blocks = []
    h, c = h_in, cm
    for mult in (2, 4, 8, 8, 8):
        blocks.append((h, c, cm * mult))
        h = (h - 1) // 2 + 1
        c = cm * mult
    return blocks, h, c  # blocks, final spatial, final channels


def _make_selection(h_in, stride):
    """9 x (h_out^2, h_in^2) 0/1 tap-selection matrices for a 3x3 pad-1 conv.

    Row p of T_k selects the flat input pixel feeding tap k of output pixel p
    (all-zero row when the tap falls in the zero padding).
    """
    h_out = (h_in + 2 - 3) // stride + 1
    T = np.zeros((9, h_out * h_out, h_in * h_in), np.float32)
    for dy in range(3):
        for dx in range(3):
            k = 3 * dy + dx
            for r in range(h_out):
                for c in range(h_out):
                    sr = stride * r + dy - 1
                    sc = stride * c + dx - 1
                    if 0 <= sr < h_in and 0 <= sc < h_in:
                        T[k, r * h_out + c, sr * h_in + sc] = 1.0
    return T


# ----------------------------------------------------------------------------
# Fused Pallas kernel (whole forward, one image per grid step)
# ----------------------------------------------------------------------------
def _build_kernel(blocks, hf, cf):
    nb = len(blocks)

    def kernel(*refs):
        # inputs: x_taps, w1, b1, [T_i, dw_i, pw_i]*nb, Tf, wf, bf ; then out
        xt_ref, w1_ref, b1_ref = refs[0], refs[1], refs[2]
        t_refs = [refs[3 + 3 * i] for i in range(nb)]
        dw_refs = [refs[4 + 3 * i] for i in range(nb)]
        pw_refs = [refs[5 + 3 * i] for i in range(nb)]
        tf_ref = refs[3 + 3 * nb]
        wf_ref = refs[4 + 3 * nb]
        bf_ref = refs[5 + 3 * nb]
        out_ref = refs[6 + 3 * nb]

        # ---- conv1: 3x3 s1 p1, 1 -> cm, bias + LeakyReLU -------------------
        # One MXU matmul over all H*W output pixels (im2col done in wrapper).
        a = jnp.dot(xt_ref[0], w1_ref[...],
                    preferred_element_type=jnp.float32)      # (H*W, cm)
        a = _leaky(a + b1_ref[...])

        # ---- 5x (depthwise 3x3 s2 + LeakyReLU, pointwise 1x1 + LeakyReLU) --
        for i, (hb, ci, co) in enumerate(blocks):
            ho = (hb - 1) // 2 + 1
            wdw = dw_refs[i][...]                             # (9, ci)
            if ho == 1:
                # Single output pixel (hb <= 2): direct VPU tap accumulation.
                acc = jnp.zeros((1, ci), jnp.float32)
                for dy in range(3):
                    for dx in range(3):
                        sr, sc = dy - 1, dx - 1
                        if 0 <= sr < hb and 0 <= sc < hb:
                            q = sr * hb + sc
                            k = 3 * dy + dx
                            acc = acc + a[q:q + 1, :] * wdw[k:k + 1, :]
            else:
                # 9 whole-plane taps: gather-as-matmul (T_k @ a) then a single
                # broadcast MAC against the per-channel depthwise weight row.
                acc = jnp.zeros((ho * ho, ci), jnp.float32)
                for k in range(9):
                    tap = jnp.dot(t_refs[i][k], a,
                                  preferred_element_type=jnp.float32)
                    acc = acc + tap * wdw[k:k + 1, :]
            d = _leaky(acc)                                   # (ho*ho, ci)
            # pointwise 1x1: one MXU matmul over all spatial positions
            a = _leaky(jnp.dot(d, pw_refs[i][...],
                               preferred_element_type=jnp.float32))  # (ho*ho, co)

        # ---- final conv: 3x3 s1 p1, cf -> 1, bias, no activation -----------
        wf = wf_ref[...]                                      # (9, cf)
        if hf == 1:
            # Only the center tap hits the interior: VPU mult + lane reduce.
            res = jnp.sum(a * wf[4:5, :], axis=1, keepdims=True)      # (1, 1)
        else:
            acc = jnp.zeros((hf * hf, cf), jnp.float32)
            for k in range(9):
                tap = jnp.dot(tf_ref[k], a,
                              preferred_element_type=jnp.float32)
                acc = acc + tap * wf[k:k + 1, :]
            res = jnp.sum(acc, axis=1, keepdims=True)                 # (hf*hf, 1)
        out_ref[0] = res + bf_ref[...]

    return kernel


# ----------------------------------------------------------------------------
# Wrapper: weight layout prep + pallas_call
# ----------------------------------------------------------------------------
def _prep_weights(p, cm, n_blocks):
    w1 = jnp.transpose(jnp.reshape(p["conv1_w"], (cm, 9)), (1, 0))     # (9, cm)
    b1 = jnp.reshape(p["conv1_b"], (1, cm))
    dw, pw = [], []
    for i in range(n_blocks):
        d = p[f"dw{i}_w"]                                              # (ci,1,3,3)
        ci = d.shape[0]
        dw.append(jnp.transpose(jnp.reshape(d, (ci, 9)), (1, 0)))      # (9, ci)
        w = p[f"pw{i}_w"]                                              # (co,ci,1,1)
        pw.append(jnp.transpose(w[:, :, 0, 0], (1, 0)))                # (ci, co)
    cf = p["convf_w"].shape[1]
    wf = jnp.transpose(jnp.reshape(p["convf_w"], (cf, 9)), (1, 0))     # (9, cf)
    bf = jnp.reshape(p["convf_b"], (1, 1))
    return w1, b1, dw, pw, wf, bf


def patch_discriminator_forward(x_nchw, p, cm=32):
    N, cin, H, W = x_nchw.shape
    assert cin == 1 and H == W, "this fused kernel assumes 1-channel square input"

    blocks, hf, cf = _network_plan(H, cm)
    nb = len(blocks)
    w1, b1, dw, pw, wf, bf = _prep_weights(p, cm, nb)

    # Wrapper-side im2col for conv1 only (the input is external, so this is
    # pure layout plumbing): (N, H*W, 9) lane-ordered tap tensor.
    xp = jnp.pad(x_nchw[:, 0].astype(jnp.float32), ((0, 0), (1, 1), (1, 1)))
    x_taps = jnp.stack(
        [xp[:, dy:dy + H, dx:dx + W] for dy in range(3) for dx in range(3)],
        axis=-1).reshape(N, H * W, 9)

    # Constant 0/1 tap-selection matrices (numpy -> baked constants).
    t_mats = [jnp.asarray(_make_selection(hb, 2)) for (hb, _, _) in blocks]
    tf_mat = jnp.asarray(_make_selection(hf, 1))

    kernel = _build_kernel(blocks, hf, cf)

    in_specs = [
        pl.BlockSpec((1, H * W, 9), lambda n: (n, 0, 0)),
        pl.BlockSpec((9, cm), lambda n: (0, 0)),
        pl.BlockSpec((1, cm), lambda n: (0, 0)),
    ]
    inputs = [x_taps, w1, b1]
    for i, (hb, ci, co) in enumerate(blocks):
        ho = (hb - 1) // 2 + 1
        in_specs.append(pl.BlockSpec((9, ho * ho, hb * hb), lambda n: (0, 0, 0)))
        in_specs.append(pl.BlockSpec((9, ci), lambda n: (0, 0)))
        in_specs.append(pl.BlockSpec((ci, co), lambda n: (0, 0)))
        inputs += [t_mats[i], dw[i], pw[i]]
    in_specs.append(pl.BlockSpec((9, hf * hf, hf * hf), lambda n: (0, 0, 0)))
    in_specs.append(pl.BlockSpec((9, cf), lambda n: (0, 0)))
    in_specs.append(pl.BlockSpec((1, 1), lambda n: (0, 0)))
    inputs += [tf_mat, wf, bf]

    out = pl.pallas_call(
        kernel,
        out_shape=jax.ShapeDtypeStruct((N, hf * hf, 1), jnp.float32),
        grid_spec=pltpu.PrefetchScalarGridSpec(
            num_scalar_prefetch=0,
            grid=(N,),
            in_specs=in_specs,
            out_specs=pl.BlockSpec((1, hf * hf, 1), lambda n: (n, 0, 0)),
        ),
        compiler_params=pltpu.CompilerParams(
            dimension_semantics=("parallel",),
            vmem_limit_bytes=32 * 1024 * 1024),
    )(*inputs)

    # (N, hf*hf, 1) row-major -> (N, 1, hf, hf) NCHW patch map.
    return jnp.reshape(out, (N, 1, hf, hf))


# ----------------------------------------------------------------------------
# Parameters (deterministic, synthetic) + spectral normalization
# ----------------------------------------------------------------------------
def _spectral_normalize(w, key, n_iter=1, eps=1e-12):
    out_c = w.shape[0]
    wm = w.reshape(out_c, -1)
    u = jax.random.normal(key, (out_c,), jnp.float32)
    u = u / (jnp.linalg.norm(u) + eps)
    v = wm.T @ u
    for _ in range(n_iter):
        v = wm.T @ u
        v = v / (jnp.linalg.norm(v) + eps)
        u = wm @ v
        u = u / (jnp.linalg.norm(u) + eps)
    sigma = u @ (wm @ v)
    return w / sigma


def init_params(key, in_ch=1, cm=32):
    block_io = [(cm, cm * 2), (cm * 2, cm * 4), (cm * 4, cm * 8),
                (cm * 8, cm * 8), (cm * 8, cm * 8)]
    keys = jax.random.split(key, 64)
    ctr = iter(range(64))

    def nrm(shape):
        return 0.05 * jax.random.normal(keys[next(ctr)], shape, jnp.float32)

    p = {}
    p["conv1_w"] = _spectral_normalize(nrm((cm, in_ch, 3, 3)), keys[next(ctr)])
    p["conv1_b"] = nrm((cm,))
    for i, (ci, co) in enumerate(block_io):
        p[f"dw{i}_w"] = _spectral_normalize(nrm((ci, 1, 3, 3)), keys[next(ctr)])
        p[f"pw{i}_w"] = _spectral_normalize(nrm((co, ci, 1, 1)), keys[next(ctr)])
    p["convf_w"] = _spectral_normalize(nrm((1, cm * 8, 3, 3)), keys[next(ctr)])
    p["convf_b"] = nrm((1,))
    return p


# ----------------------------------------------------------------------------
# Pure-JAX reference (lax convs) for validation
# ----------------------------------------------------------------------------
def reference_forward(x_nchw, p):
    dn = ("NCHW", "OIHW", "NCHW")

    def conv(x, w, stride, pad, groups=1):
        return jax.lax.conv_general_dilated(
            x, w, (stride, stride), ((pad, pad), (pad, pad)),
            feature_group_count=groups, dimension_numbers=dn,
            precision=jax.lax.Precision.HIGHEST)

    y = conv(x_nchw, p["conv1_w"], 1, 1) + p["conv1_b"][None, :, None, None]
    y = _leaky(y)
    for i in range(5):
        y = _leaky(conv(y, p[f"dw{i}_w"], 2, 1, groups=y.shape[1]))
        y = _leaky(conv(y, p[f"pw{i}_w"], 1, 0))
    y = conv(y, p["convf_w"], 1, 1) + p["convf_b"][None, :, None, None]
    return y


if __name__ == "__main__":
    key = jax.random.PRNGKey(0)
    pkey, xkey = jax.random.split(key)
    params = init_params(pkey, in_ch=1, cm=32)

    # NCHW input matching the PyTorch module (in_ch=1); 16x16 -> 1x1 patch map.
    x = jax.random.normal(xkey, (2, 1, 16, 16), jnp.float32)

    fwd = jax.jit(patch_discriminator_forward)
    out = jax.block_until_ready(fwd(x, params))
    ref = jax.block_until_ready(reference_forward(x, params))

    assert out.shape == (2, 1, 1, 1), out.shape
    err = float(jnp.max(jnp.abs(out - ref)))
    scale = float(jnp.max(jnp.abs(ref)))
    assert err <= 5e-2 * scale + 1e-5, f"mismatch vs reference: err={err}, scale={scale}"

    print("KERNEL_OK")
</pallas_src>

<mosaic_0001>
module attributes {stable_mosaic.version = 11 : i64} {
  func.func @kernel(%arg0: i32, %arg1: memref<1x256x9xf32, #tpu.memory_space<vmem>>, %arg2: memref<9x32xf32, #tpu.memory_space<vmem>>, %arg3: memref<1x32xf32, #tpu.memory_space<vmem>>, %arg4: memref<9x64x256xf32, #tpu.memory_space<vmem>>, %arg5: memref<9x32xf32, #tpu.memory_space<vmem>>, %arg6: memref<32x64xf32, #tpu.memory_space<vmem>>, %arg7: memref<9x16x64xf32, #tpu.memory_space<vmem>>, %arg8: memref<9x64xf32, #tpu.memory_space<vmem>>, %arg9: memref<64x128xf32, #tpu.memory_space<vmem>>, %arg10: memref<9x4x16xf32, #tpu.memory_space<vmem>>, %arg11: memref<9x128xf32, #tpu.memory_space<vmem>>, %arg12: memref<128x256xf32, #tpu.memory_space<vmem>>, %arg13: memref<9x1x4xf32, #tpu.memory_space<vmem>>, %arg14: memref<9x256xf32, #tpu.memory_space<vmem>>, %arg15: memref<256x256xf32, #tpu.memory_space<vmem>>, %arg16: memref<9x1x1xf32, #tpu.memory_space<vmem>>, %arg17: memref<9x256xf32, #tpu.memory_space<vmem>>, %arg18: memref<256x256xf32, #tpu.memory_space<vmem>>, %arg19: memref<9x1x1xf32, #tpu.memory_space<vmem>>, %arg20: memref<9x256xf32, #tpu.memory_space<vmem>>, %arg21: memref<1x1xf32, #tpu.memory_space<vmem>>, %arg22: memref<1x1x1xf32, #tpu.memory_space<vmem>>) attributes {dimension_semantics = [#tpu.dimension_semantics<parallel>], iteration_bounds = array<i64: 2>, scalar_prefetch = 0 : i64, scratch_operands = 0 : i64, tpu.core_type = #tpu.core_type<tc>, window_params = [{transform_indices = @transform_0, window_bounds = array<i64: 1, 256, 9>}, {pipeline_mode = #tpu.pipeline_mode<synchronous>, transform_indices = @transform_1, window_bounds = array<i64: 9, 32>}, {pipeline_mode = #tpu.pipeline_mode<synchronous>, transform_indices = @transform_2, window_bounds = array<i64: 1, 32>}, {pipeline_mode = #tpu.pipeline_mode<synchronous>, transform_indices = @transform_3, window_bounds = array<i64: 9, 64, 256>}, {pipeline_mode = #tpu.pipeline_mode<synchronous>, transform_indices = @transform_4, window_bounds = array<i64: 9, 32>}, {pipeline_mode = #tpu.pipeline_mode<synchronous>, transform_indices = @transform_5, window_bounds = array<i64: 32, 64>}, {pipeline_mode = #tpu.pipeline_mode<synchronous>, transform_indices = @transform_6, window_bounds = array<i64: 9, 16, 64>}, {pipeline_mode = #tpu.pipeline_mode<synchronous>, transform_indices = @transform_7, window_bounds = array<i64: 9, 64>}, {pipeline_mode = #tpu.pipeline_mode<synchronous>, transform_indices = @transform_8, window_bounds = array<i64: 64, 128>}, {pipeline_mode = #tpu.pipeline_mode<synchronous>, transform_indices = @transform_9, window_bounds = array<i64: 9, 4, 16>}, {pipeline_mode = #tpu.pipeline_mode<synchronous>, transform_indices = @transform_10, window_bounds = array<i64: 9, 128>}, {pipeline_mode = #tpu.pipeline_mode<synchronous>, transform_indices = @transform_11, window_bounds = array<i64: 128, 256>}, {pipeline_mode = #tpu.pipeline_mode<synchronous>, transform_indices = @transform_12, window_bounds = array<i64: 9, 1, 4>}, {pipeline_mode = #tpu.pipeline_mode<synchronous>, transform_indices = @transform_13, window_bounds = array<i64: 9, 256>}, {pipeline_mode = #tpu.pipeline_mode<synchronous>, transform_indices = @transform_14, window_bounds = array<i64: 256, 256>}, {pipeline_mode = #tpu.pipeline_mode<synchronous>, transform_indices = @transform_15, window_bounds = array<i64: 9, 1, 1>}, {pipeline_mode = #tpu.pipeline_mode<synchronous>, transform_indices = @transform_16, window_bounds = array<i64: 9, 256>}, {pipeline_mode = #tpu.pipeline_mode<synchronous>, transform_indices = @transform_17, window_bounds = array<i64: 256, 256>}, {pipeline_mode = #tpu.pipeline_mode<synchronous>, transform_indices = @transform_18, window_bounds = array<i64: 9, 1, 1>}, {pipeline_mode = #tpu.pipeline_mode<synchronous>, transform_indices = @transform_19, window_bounds = array<i64: 9, 256>}, {pipeline_mode = #tpu.pipeline_mode<synchronous>, transform_indices = @transform_20, window_bounds = array<i64: 1, 1>}, {transform_indices = @transform_21, window_bounds = array<i64: 1, 1, 1>}]} {
    %c0 = arith.constant 0 : index
    %c0_0 = arith.constant 0 : index
    %c0_1 = arith.constant 0 : index
    %0 = vector.load %arg1[%c0, %c0_0, %c0_1] : memref<1x256x9xf32, #tpu.memory_space<vmem>>, vector<1x256x9xf32>
    %1 = vector.shape_cast %0 : vector<1x256x9xf32> to vector<256x9xf32>
    %c0_2 = arith.constant 0 : index
    %c0_3 = arith.constant 0 : index
    %2 = vector.load %arg2[%c0_2, %c0_3] : memref<9x32xf32, #tpu.memory_space<vmem>>, vector<9x32xf32>
    %cst = arith.constant dense<0.000000e+00> : vector<256x32xf32>
    %3 = tpu.matmul %1, %2, %cst {dimension_numbers = #tpu.dot_dimension_numbers<[1], [0], [0], [1], [0, 0, 1, 1], [], []>} : vector<256x9xf32>, vector<9x32xf32>, vector<256x32xf32> -> vector<256x32xf32>
    %c0_4 = arith.constant 0 : index
    %c0_5 = arith.constant 0 : index
    %4 = vector.load %arg3[%c0_4, %c0_5] : memref<1x32xf32, #tpu.memory_space<vmem>>, vector<1x32xf32>
    %5 = vector.broadcast %4 : vector<1x32xf32> to vector<256x32xf32>
    %6 = arith.addf %3, %5 : vector<256x32xf32>
    %cst_6 = arith.constant 0.000000e+00 : f32
    %7 = vector.broadcast %cst_6 : f32 to vector<256x32xf32>
    %8 = arith.cmpf oge, %6, %7 : vector<256x32xf32>
    %cst_7 = arith.constant 2.000000e-01 : f32
    %9 = vector.broadcast %cst_7 : f32 to vector<256x32xf32>
    %10 = arith.mulf %9, %6 : vector<256x32xf32>
    %11 = arith.select %8, %6, %10 : vector<256x32xi1>, vector<256x32xf32>
    %c0_8 = arith.constant 0 : index
    %c0_9 = arith.constant 0 : index
    %12 = vector.load %arg5[%c0_8, %c0_9] : memref<9x32xf32, #tpu.memory_space<vmem>>, vector<9x32xf32>
    %cst_10 = arith.constant 0.000000e+00 : f32
    %13 = vector.broadcast %cst_10 : f32 to vector<64x32xf32>
    %c0_11 = arith.constant 0 : index
    %c0_12 = arith.constant 0 : index
    %c0_13 = arith.constant 0 : index
    %14 = vector.load %arg4[%c0_11, %c0_12, %c0_13] : memref<9x64x256xf32, #tpu.memory_space<vmem>>, vector<1x64x256xf32>
    %15 = vector.shape_cast %14 : vector<1x64x256xf32> to vector<64x256xf32>
    %cst_14 = arith.constant dense<0.000000e+00> : vector<64x32xf32>
    %16 = tpu.matmul %15, %11, %cst_14 {dimension_numbers = #tpu.dot_dimension_numbers<[1], [0], [0], [1], [0, 0, 1, 1], [], []>} : vector<64x256xf32>, vector<256x32xf32>, vector<64x32xf32> -> vector<64x32xf32>
    %17 = vector.extract_strided_slice %12 {offsets = [0, 0], sizes = [1, 32], strides = [1, 1]} : vector<9x32xf32> to vector<1x32xf32>
    %18 = vector.broadcast %17 : vector<1x32xf32> to vector<64x32xf32>
    %19 = arith.mulf %16, %18 : vector<64x32xf32>
    %20 = arith.addf %13, %19 : vector<64x32xf32>
    %c1 = arith.constant 1 : index
    %c0_15 = arith.constant 0 : index
    %c0_16 = arith.constant 0 : index
    %21 = vector.load %arg4[%c1, %c0_15, %c0_16] : memref<9x64x256xf32, #tpu.memory_space<vmem>>, vector<1x64x256xf32>
    %22 = vector.shape_cast %21 : vector<1x64x256xf32> to vector<64x256xf32>
    %cst_17 = arith.constant dense<0.000000e+00> : vector<64x32xf32>
    %23 = tpu.matmul %22, %11, %cst_17 {dimension_numbers = #tpu.dot_dimension_numbers<[1], [0], [0], [1], [0, 0, 1, 1], [], []>} : vector<64x256xf32>, vector<256x32xf32>, vector<64x32xf32> -> vector<64x32xf32>
    %24 = vector.extract_strided_slice %12 {offsets = [1, 0], sizes = [1, 32], strides = [1, 1]} : vector<9x32xf32> to vector<1x32xf32>
    %25 = vector.broadcast %24 : vector<1x32xf32> to vector<64x32xf32>
    %26 = arith.mulf %23, %25 : vector<64x32xf32>
    %27 = arith.addf %20, %26 : vector<64x32xf32>
    %c2 = arith.constant 2 : index
    %c0_18 = arith.constant 0 : index
    %c0_19 = arith.constant 0 : index
    %28 = vector.load %arg4[%c2, %c0_18, %c0_19] : memref<9x64x256xf32, #tpu.memory_space<vmem>>, vector<1x64x256xf32>
    %29 = vector.shape_cast %28 : vector<1x64x256xf32> to vector<64x256xf32>
    %cst_20 = arith.constant dense<0.000000e+00> : vector<64x32xf32>
    %30 = tpu.matmul %29, %11, %cst_20 {dimension_numbers = #tpu.dot_dimension_numbers<[1], [0], [0], [1], [0, 0, 1, 1], [], []>} : vector<64x256xf32>, vector<256x32xf32>, vector<64x32xf32> -> vector<64x32xf32>
    %31 = vector.extract_strided_slice %12 {offsets = [2, 0], sizes = [1, 32], strides = [1, 1]} : vector<9x32xf32> to vector<1x32xf32>
    %32 = vector.broadcast %31 : vector<1x32xf32> to vector<64x32xf32>
    %33 = arith.mulf %30, %32 : vector<64x32xf32>
    %34 = arith.addf %27, %33 : vector<64x32xf32>
    %c3 = arith.constant 3 : index
    %c0_21 = arith.constant 0 : index
    %c0_22 = arith.constant 0 : index
    %35 = vector.load %arg4[%c3, %c0_21, %c0_22] : memref<9x64x256xf32, #tpu.memory_space<vmem>>, vector<1x64x256xf32>
    %36 = vector.shape_cast %35 : vector<1x64x256xf32> to vector<64x256xf32>
    %cst_23 = arith.constant dense<0.000000e+00> : vector<64x32xf32>
    %37 = tpu.matmul %36, %11, %cst_23 {dimension_numbers = #tpu.dot_dimension_numbers<[1], [0], [0], [1], [0, 0, 1, 1], [], []>} : vector<64x256xf32>, vector<256x32xf32>, vector<64x32xf32> -> vector<64x32xf32>
    %38 = vector.extract_strided_slice %12 {offsets = [3, 0], sizes = [1, 32], strides = [1, 1]} : vector<9x32xf32> to vector<1x32xf32>
    %39 = vector.broadcast %38 : vector<1x32xf32> to vector<64x32xf32>
    %40 = arith.mulf %37, %39 : vector<64x32xf32>
    %41 = arith.addf %34, %40 : vector<64x32xf32>
    %c4 = arith.constant 4 : index
    %c0_24 = arith.constant 0 : index
    %c0_25 = arith.constant 0 : index
    %42 = vector.load %arg4[%c4, %c0_24, %c0_25] : memref<9x64x256xf32, #tpu.memory_space<vmem>>, vector<1x64x256xf32>
    %43 = vector.shape_cast %42 : vector<1x64x256xf32> to vector<64x256xf32>
    %cst_26 = arith.constant dense<0.000000e+00> : vector<64x32xf32>
    %44 = tpu.matmul %43, %11, %cst_26 {dimension_numbers = #tpu.dot_dimension_numbers<[1], [0], [0], [1], [0, 0, 1, 1], [], []>} : vector<64x256xf32>, vector<256x32xf32>, vector<64x32xf32> -> vector<64x32xf32>
    %45 = vector.extract_strided_slice %12 {offsets = [4, 0], sizes = [1, 32], strides = [1, 1]} : vector<9x32xf32> to vector<1x32xf32>
    %46 = vector.broadcast %45 : vector<1x32xf32> to vector<64x32xf32>
    %47 = arith.mulf %44, %46 : vector<64x32xf32>
    %48 = arith.addf %41, %47 : vector<64x32xf32>
    %c5 = arith.constant 5 : index
    %c0_27 = arith.constant 0 : index
    %c0_28 = arith.constant 0 : index
    %49 = vector.load %arg4[%c5, %c0_27, %c0_28] : memref<9x64x256xf32, #tpu.memory_space<vmem>>, vector<1x64x256xf32>
    %50 = vector.shape_cast %49 : vector<1x64x256xf32> to vector<64x256xf32>
    %cst_29 = arith.constant dense<0.000000e+00> : vector<64x32xf32>
    %51 = tpu.matmul %50, %11, %cst_29 {dimension_numbers = #tpu.dot_dimension_numbers<[1], [0], [0], [1], [0, 0, 1, 1], [], []>} : vector<64x256xf32>, vector<256x32xf32>, vector<64x32xf32> -> vector<64x32xf32>
    %52 = vector.extract_strided_slice %12 {offsets = [5, 0], sizes = [1, 32], strides = [1, 1]} : vector<9x32xf32> to vector<1x32xf32>
    %53 = vector.broadcast %52 : vector<1x32xf32> to vector<64x32xf32>
    %54 = arith.mulf %51, %53 : vector<64x32xf32>
    %55 = arith.addf %48, %54 : vector<64x32xf32>
    %c6 = arith.constant 6 : index
    %c0_30 = arith.constant 0 : index
    %c0_31 = arith.constant 0 : index
    %56 = vector.load %arg4[%c6, %c0_30, %c0_31] : memref<9x64x256xf32, #tpu.memory_space<vmem>>, vector<1x64x256xf32>
    %57 = vector.shape_cast %56 : vector<1x64x256xf32> to vector<64x256xf32>
    %cst_32 = arith.constant dense<0.000000e+00> : vector<64x32xf32>
    %58 = tpu.matmul %57, %11, %cst_32 {dimension_numbers = #tpu.dot_dimension_numbers<[1], [0], [0], [1], [0, 0, 1, 1], [], []>} : vector<64x256xf32>, vector<256x32xf32>, vector<64x32xf32> -> vector<64x32xf32>
    %59 = vector.extract_strided_slice %12 {offsets = [6, 0], sizes = [1, 32], strides = [1, 1]} : vector<9x32xf32> to vector<1x32xf32>
    %60 = vector.broadcast %59 : vector<1x32xf32> to vector<64x32xf32>
    %61 = arith.mulf %58, %60 : vector<64x32xf32>
    %62 = arith.addf %55, %61 : vector<64x32xf32>
    %c7 = arith.constant 7 : index
    %c0_33 = arith.constant 0 : index
    %c0_34 = arith.constant 0 : index
    %63 = vector.load %arg4[%c7, %c0_33, %c0_34] : memref<9x64x256xf32, #tpu.memory_space<vmem>>, vector<1x64x256xf32>
    %64 = vector.shape_cast %63 : vector<1x64x256xf32> to vector<64x256xf32>
    %cst_35 = arith.constant dense<0.000000e+00> : vector<64x32xf32>
    %65 = tpu.matmul %64, %11, %cst_35 {dimension_numbers = #tpu.dot_dimension_numbers<[1], [0], [0], [1], [0, 0, 1, 1], [], []>} : vector<64x256xf32>, vector<256x32xf32>, vector<64x32xf32> -> vector<64x32xf32>
    %66 = vector.extract_strided_slice %12 {offsets = [7, 0], sizes = [1, 32], strides = [1, 1]} : vector<9x32xf32> to vector<1x32xf32>
    %67 = vector.broadcast %66 : vector<1x32xf32> to vector<64x32xf32>
    %68 = arith.mulf %65, %67 : vector<64x32xf32>
    %69 = arith.addf %62, %68 : vector<64x32xf32>
    %c8 = arith.constant 8 : index
    %c0_36 = arith.constant 0 : index
    %c0_37 = arith.constant 0 : index
    %70 = vector.load %arg4[%c8, %c0_36, %c0_37] : memref<9x64x256xf32, #tpu.memory_space<vmem>>, vector<1x64x256xf32>
    %71 = vector.shape_cast %70 : vector<1x64x256xf32> to vector<64x256xf32>
    %cst_38 = arith.constant dense<0.000000e+00> : vector<64x32xf32>
    %72 = tpu.matmul %71, %11, %cst_38 {dimension_numbers = #tpu.dot_dimension_numbers<[1], [0], [0], [1], [0, 0, 1, 1], [], []>} : vector<64x256xf32>, vector<256x32xf32>, vector<64x32xf32> -> vector<64x32xf32>
    %73 = vector.extract_strided_slice %12 {offsets = [8, 0], sizes = [1, 32], strides = [1, 1]} : vector<9x32xf32> to vector<1x32xf32>
    %74 = vector.broadcast %73 : vector<1x32xf32> to vector<64x32xf32>
    %75 = arith.mulf %72, %74 : vector<64x32xf32>
    %76 = arith.addf %69, %75 : vector<64x32xf32>
    %cst_39 = arith.constant 0.000000e+00 : f32
    %77 = vector.broadcast %cst_39 : f32 to vector<64x32xf32>
    %78 = arith.cmpf oge, %76, %77 : vector<64x32xf32>
    %cst_40 = arith.constant 2.000000e-01 : f32
    %79 = vector.broadcast %cst_40 : f32 to vector<64x32xf32>
    %80 = arith.mulf %79, %76 : vector<64x32xf32>
    %81 = arith.select %78, %76, %80 : vector<64x32xi1>, vector<64x32xf32>
    %c0_41 = arith.constant 0 : index
    %c0_42 = arith.constant 0 : index
    %82 = vector.load %arg6[%c0_41, %c0_42] : memref<32x64xf32, #tpu.memory_space<vmem>>, vector<32x64xf32>
    %cst_43 = arith.constant dense<0.000000e+00> : vector<64x64xf32>
    %83 = tpu.matmul %81, %82, %cst_43 {dimension_numbers = #tpu.dot_dimension_numbers<[1], [0], [0], [1], [0, 0, 1, 1], [], []>} : vector<64x32xf32>, vector<32x64xf32>, vector<64x64xf32> -> vector<64x64xf32>
    %cst_44 = arith.constant 0.000000e+00 : f32
    %84 = vector.broadcast %cst_44 : f32 to vector<64x64xf32>
    %85 = arith.cmpf oge, %83, %84 : vector<64x64xf32>
    %cst_45 = arith.constant 2.000000e-01 : f32
    %86 = vector.broadcast %cst_45 : f32 to vector<64x64xf32>
    %87 = arith.mulf %86, %83 : vector<64x64xf32>
    %88 = arith.select %85, %83, %87 : vector<64x64xi1>, vector<64x64xf32>
    %c0_46 = arith.constant 0 : index
    %c0_47 = arith.constant 0 : index
    %89 = vector.load %arg8[%c0_46, %c0_47] : memref<9x64xf32, #tpu.memory_space<vmem>>, vector<9x64xf32>
    %cst_48 = arith.constant 0.000000e+00 : f32
    %90 = vector.broadcast %cst_48 : f32 to vector<16x64xf32>
    %c0_49 = arith.constant 0 : index
    %c0_50 = arith.constant 0 : index
    %c0_51 = arith.constant 0 : index
    %91 = vector.load %arg7[%c0_49, %c0_50, %c0_51] : memref<9x16x64xf32, #tpu.memory_space<vmem>>, vector<1x16x64xf32>
    %92 = vector.shape_cast %91 : vector<1x16x64xf32> to vector<16x64xf32>
    %cst_52 = arith.constant dense<0.000000e+00> : vector<16x64xf32>
    %93 = tpu.matmul %92, %88, %cst_52 {dimension_numbers = #tpu.dot_dimension_numbers<[1], [0], [0], [1], [0, 0, 1, 1], [], []>} : vector<16x64xf32>, vector<64x64xf32>, vector<16x64xf32> -> vector<16x64xf32>
    %94 = vector.extract_strided_slice %89 {offsets = [0, 0], sizes = [1, 64], strides = [1, 1]} : vector<9x64xf32> to vector<1x64xf32>
    %95 = vector.broadcast %94 : vector<1x64xf32> to vector<16x64xf32>
    %96 = arith.mulf %93, %95 : vector<16x64xf32>
    %97 = arith.addf %90, %96 : vector<16x64xf32>
    %c1_53 = arith.constant 1 : index
    %c0_54 = arith.constant 0 : index
    %c0_55 = arith.constant 0 : index
    %98 = vector.load %arg7[%c1_53, %c0_54, %c0_55] : memref<9x16x64xf32, #tpu.memory_space<vmem>>, vector<1x16x64xf32>
    %99 = vector.shape_cast %98 : vector<1x16x64xf32> to vector<16x64xf32>
    %cst_56 = arith.constant dense<0.000000e+00> : vector<16x64xf32>
    %100 = tpu.matmul %99, %88, %cst_56 {dimension_numbers = #tpu.dot_dimension_numbers<[1], [0], [0], [1], [0, 0, 1, 1], [], []>} : vector<16x64xf32>, vector<64x64xf32>, vector<16x64xf32> -> vector<16x64xf32>
    %101 = vector.extract_strided_slice %89 {offsets = [1, 0], sizes = [1, 64], strides = [1, 1]} : vector<9x64xf32> to vector<1x64xf32>
    %102 = vector.broadcast %101 : vector<1x64xf32> to vector<16x64xf32>
    %103 = arith.mulf %100, %102 : vector<16x64xf32>
    %104 = arith.addf %97, %103 : vector<16x64xf32>
    %c2_57 = arith.constant 2 : index
    %c0_58 = arith.constant 0 : index
    %c0_59 = arith.constant 0 : index
    %105 = vector.load %arg7[%c2_57, %c0_58, %c0_59] : memref<9x16x64xf32, #tpu.memory_space<vmem>>, vector<1x16x64xf32>
    %106 = vector.shape_cast %105 : vector<1x16x64xf32> to vector<16x64xf32>
    %cst_60 = arith.constant dense<0.000000e+00> : vector<16x64xf32>
    %107 = tpu.matmul %106, %88, %cst_60 {dimension_numbers = #tpu.dot_dimension_numbers<[1], [0], [0], [1], [0, 0, 1, 1], [], []>} : vector<16x64xf32>, vector<64x64xf32>, vector<16x64xf32> -> vector<16x64xf32>
    %108 = vector.extract_strided_slice %89 {offsets = [2, 0], sizes = [1, 64], strides = [1, 1]} : vector<9x64xf32> to vector<1x64xf32>
    %109 = vector.broadcast %108 : vector<1x64xf32> to vector<16x64xf32>
    %110 = arith.mulf %107, %109 : vector<16x64xf32>
    %111 = arith.addf %104, %110 : vector<16x64xf32>
    %c3_61 = arith.constant 3 : index
    %c0_62 = arith.constant 0 : index
    %c0_63 = arith.constant 0 : index
    %112 = vector.load %arg7[%c3_61, %c0_62, %c0_63] : memref<9x16x64xf32, #tpu.memory_space<vmem>>, vector<1x16x64xf32>
    %113 = vector.shape_cast %112 : vector<1x16x64xf32> to vector<16x64xf32>
    %cst_64 = arith.constant dense<0.000000e+00> : vector<16x64xf32>
    %114 = tpu.matmul %113, %88, %cst_64 {dimension_numbers = #tpu.dot_dimension_numbers<[1], [0], [0], [1], [0, 0, 1, 1], [], []>} : vector<16x64xf32>, vector<64x64xf32>, vector<16x64xf32> -> vector<16x64xf32>
    %115 = vector.extract_strided_slice %89 {offsets = [3, 0], sizes = [1, 64], strides = [1, 1]} : vector<9x64xf32> to vector<1x64xf32>
    %116 = vector.broadcast %115 : vector<1x64xf32> to vector<16x64xf32>
    %117 = arith.mulf %114, %116 : vector<16x64xf32>
    %118 = arith.addf %111, %117 : vector<16x64xf32>
    %c4_65 = arith.constant 4 : index
    %c0_66 = arith.constant 0 : index
    %c0_67 = arith.constant 0 : index
    %119 = vector.load %arg7[%c4_65, %c0_66, %c0_67] : memref<9x16x64xf32, #tpu.memory_space<vmem>>, vector<1x16x64xf32>
    %120 = vector.shape_cast %119 : vector<1x16x64xf32> to vector<16x64xf32>
    %cst_68 = arith.constant dense<0.000000e+00> : vector<16x64xf32>
    %121 = tpu.matmul %120, %88, %cst_68 {dimension_numbers = #tpu.dot_dimension_numbers<[1], [0], [0], [1], [0, 0, 1, 1], [], []>} : vector<16x64xf32>, vector<64x64xf32>, vector<16x64xf32> -> vector<16x64xf32>
    %122 = vector.extract_strided_slice %89 {offsets = [4, 0], sizes = [1, 64], strides = [1, 1]} : vector<9x64xf32> to vector<1x64xf32>
    %123 = vector.broadcast %122 : vector<1x64xf32> to vector<16x64xf32>
    %124 = arith.mulf %121, %123 : vector<16x64xf32>
    %125 = arith.addf %118, %124 : vector<16x64xf32>
    %c5_69 = arith.constant 5 : index
    %c0_70 = arith.constant 0 : index
    %c0_71 = arith.constant 0 : index
    %126 = vector.load %arg7[%c5_69, %c0_70, %c0_71] : memref<9x16x64xf32, #tpu.memory_space<vmem>>, vector<1x16x64xf32>
    %127 = vector.shape_cast %126 : vector<1x16x64xf32> to vector<16x64xf32>
    %cst_72 = arith.constant dense<0.000000e+00> : vector<16x64xf32>
    %128 = tpu.matmul %127, %88, %cst_72 {dimension_numbers = #tpu.dot_dimension_numbers<[1], [0], [0], [1], [0, 0, 1, 1], [], []>} : vector<16x64xf32>, vector<64x64xf32>, vector<16x64xf32> -> vector<16x64xf32>
    %129 = vector.extract_strided_slice %89 {offsets = [5, 0], sizes = [1, 64], strides = [1, 1]} : vector<9x64xf32> to vector<1x64xf32>
    %130 = vector.broadcast %129 : vector<1x64xf32> to vector<16x64xf32>
    %131 = arith.mulf %128, %130 : vector<16x64xf32>
    %132 = arith.addf %125, %131 : vector<16x64xf32>
    %c6_73 = arith.constant 6 : index
    %c0_74 = arith.constant 0 : index
    %c0_75 = arith.constant 0 : index
    %133 = vector.load %arg7[%c6_73, %c0_74, %c0_75] : memref<9x16x64xf32, #tpu.memory_space<vmem>>, vector<1x16x64xf32>
    %134 = vector.shape_cast %133 : vector<1x16x64xf32> to vector<16x64xf32>
    %cst_76 = arith.constant dense<0.000000e+00> : vector<16x64xf32>
    %135 = tpu.matmul %134, %88, %cst_76 {dimension_numbers = #tpu.dot_dimension_numbers<[1], [0], [0], [1], [0, 0, 1, 1], [], []>} : vector<16x64xf32>, vector<64x64xf32>, vector<16x64xf32> -> vector<16x64xf32>
    %136 = vector.extract_strided_slice %89 {offsets = [6, 0], sizes = [1, 64], strides = [1, 1]} : vector<9x64xf32> to vector<1x64xf32>
    %137 = vector.broadcast %136 : vector<1x64xf32> to vector<16x64xf32>
    %138 = arith.mulf %135, %137 : vector<16x64xf32>
    %139 = arith.addf %132, %138 : vector<16x64xf32>
    %c7_77 = arith.constant 7 : index
    %c0_78 = arith.constant 0 : index
    %c0_79 = arith.constant 0 : index
    %140 = vector.load %arg7[%c7_77, %c0_78, %c0_79] : memref<9x16x64xf32, #tpu.memory_space<vmem>>, vector<1x16x64xf32>
    %141 = vector.shape_cast %140 : vector<1x16x64xf32> to vector<16x64xf32>
    %cst_80 = arith.constant dense<0.000000e+00> : vector<16x64xf32>
    %142 = tpu.matmul %141, %88, %cst_80 {dimension_numbers = #tpu.dot_dimension_numbers<[1], [0], [0], [1], [0, 0, 1, 1], [], []>} : vector<16x64xf32>, vector<64x64xf32>, vector<16x64xf32> -> vector<16x64xf32>
    %143 = vector.extract_strided_slice %89 {offsets = [7, 0], sizes = [1, 64], strides = [1, 1]} : vector<9x64xf32> to vector<1x64xf32>
    %144 = vector.broadcast %143 : vector<1x64xf32> to vector<16x64xf32>
    %145 = arith.mulf %142, %144 : vector<16x64xf32>
    %146 = arith.addf %139, %145 : vector<16x64xf32>
    %c8_81 = arith.constant 8 : index
    %c0_82 = arith.constant 0 : index
    %c0_83 = arith.constant 0 : index
    %147 = vector.load %arg7[%c8_81, %c0_82, %c0_83] : memref<9x16x64xf32, #tpu.memory_space<vmem>>, vector<1x16x64xf32>
    %148 = vector.shape_cast %147 : vector<1x16x64xf32> to vector<16x64xf32>
    %cst_84 = arith.constant dense<0.000000e+00> : vector<16x64xf32>
    %149 = tpu.matmul %148, %88, %cst_84 {dimension_numbers = #tpu.dot_dimension_numbers<[1], [0], [0], [1], [0, 0, 1, 1], [], []>} : vector<16x64xf32>, vector<64x64xf32>, vector<16x64xf32> -> vector<16x64xf32>
    %150 = vector.extract_strided_slice %89 {offsets = [8, 0], sizes = [1, 64], strides = [1, 1]} : vector<9x64xf32> to vector<1x64xf32>
    %151 = vector.broadcast %150 : vector<1x64xf32> to vector<16x64xf32>
    %152 = arith.mulf %149, %151 : vector<16x64xf32>
    %153 = arith.addf %146, %152 : vector<16x64xf32>
    %cst_85 = arith.constant 0.000000e+00 : f32
    %154 = vector.broadcast %cst_85 : f32 to vector<16x64xf32>
    %155 = arith.cmpf oge, %153, %154 : vector<16x64xf32>
    %cst_86 = arith.constant 2.000000e-01 : f32
    %156 = vector.broadcast %cst_86 : f32 to vector<16x64xf32>
    %157 = arith.mulf %156, %153 : vector<16x64xf32>
    %158 = arith.select %155, %153, %157 : vector<16x64xi1>, vector<16x64xf32>
    %c0_87 = arith.constant 0 : index
    %c0_88 = arith.constant 0 : index
    %159 = vector.load %arg9[%c0_87, %c0_88] : memref<64x128xf32, #tpu.memory_space<vmem>>, vector<64x128xf32>
    %cst_89 = arith.constant dense<0.000000e+00> : vector<16x128xf32>
    %160 = tpu.matmul %158, %159, %cst_89 {dimension_numbers = #tpu.dot_dimension_numbers<[1], [0], [0], [1], [0, 0, 1, 1], [], []>} : vector<16x64xf32>, vector<64x128xf32>, vector<16x128xf32> -> vector<16x128xf32>
    %cst_90 = arith.constant 0.000000e+00 : f32
    %161 = vector.broadcast %cst_90 : f32 to vector<16x128xf32>
    %162 = arith.cmpf oge, %160, %161 : vector<16x128xf32>
    %cst_91 = arith.constant 2.000000e-01 : f32
    %163 = vector.broadcast %cst_91 : f32 to vector<16x128xf32>
    %164 = arith.mulf %163, %160 : vector<16x128xf32>
    %165 = arith.select %162, %160, %164 : vector<16x128xi1>, vector<16x128xf32>
    %c0_92 = arith.constant 0 : index
    %c0_93 = arith.constant 0 : index
    %166 = vector.load %arg11[%c0_92, %c0_93] : memref<9x128xf32, #tpu.memory_space<vmem>>, vector<9x128xf32>
    %cst_94 = arith.constant 0.000000e+00 : f32
    %167 = vector.broadcast %cst_94 : f32 to vector<4x128xf32>
    %c0_95 = arith.constant 0 : index
    %c0_96 = arith.constant 0 : index
    %c0_97 = arith.constant 0 : index
    %168 = vector.load %arg10[%c0_95, %c0_96, %c0_97] : memref<9x4x16xf32, #tpu.memory_space<vmem>>, vector<1x4x16xf32>
    %169 = vector.shape_cast %168 : vector<1x4x16xf32> to vector<4x16xf32>
    %cst_98 = arith.constant dense<0.000000e+00> : vector<4x128xf32>
    %170 = tpu.matmul %169, %165, %cst_98 {dimension_numbers = #tpu.dot_dimension_numbers<[1], [0], [0], [1], [0, 0, 1, 1], [], []>} : vector<4x16xf32>, vector<16x128xf32>, vector<4x128xf32> -> vector<4x128xf32>
    %171 = vector.extract_strided_slice %166 {offsets = [0, 0], sizes = [1, 128], strides = [1, 1]} : vector<9x128xf32> to vector<1x128xf32>
    %172 = vector.broadcast %171 : vector<1x128xf32> to vector<4x128xf32>
    %173 = arith.mulf %170, %172 : vector<4x128xf32>
    %174 = arith.addf %167, %173 : vector<4x128xf32>
    %c1_99 = arith.constant 1 : index
    %c0_100 = arith.constant 0 : index
    %c0_101 = arith.constant 0 : index
    %175 = vector.load %arg10[%c1_99, %c0_100, %c0_101] : memref<9x4x16xf32, #tpu.memory_space<vmem>>, vector<1x4x16xf32>
    %176 = vector.shape_cast %175 : vector<1x4x16xf32> to vector<4x16xf32>
    %cst_102 = arith.constant dense<0.000000e+00> : vector<4x128xf32>
    %177 = tpu.matmul %176, %165, %cst_102 {dimension_numbers = #tpu.dot_dimension_numbers<[1], [0], [0], [1], [0, 0, 1, 1], [], []>} : vector<4x16xf32>, vector<16x128xf32>, vector<4x128xf32> -> vector<4x128xf32>
    %178 = vector.extract_strided_slice %166 {offsets = [1, 0], sizes = [1, 128], strides = [1, 1]} : vector<9x128xf32> to vector<1x128xf32>
    %179 = vector.broadcast %178 : vector<1x128xf32> to vector<4x128xf32>
    %180 = arith.mulf %177, %179 : vector<4x128xf32>
    %181 = arith.addf %174, %180 : vector<4x128xf32>
    %c2_103 = arith.constant 2 : index
    %c0_104 = arith.constant 0 : index
    %c0_105 = arith.constant 0 : index
    %182 = vector.load %arg10[%c2_103, %c0_104, %c0_105] : memref<9x4x16xf32, #tpu.memory_space<vmem>>, vector<1x4x16xf32>
    %183 = vector.shape_cast %182 : vector<1x4x16xf32> to vector<4x16xf32>
    %cst_106 = arith.constant dense<0.000000e+00> : vector<4x128xf32>
    %184 = tpu.matmul %183, %165, %cst_106 {dimension_numbers = #tpu.dot_dimension_numbers<[1], [0], [0], [1], [0, 0, 1, 1], [], []>} : vector<4x16xf32>, vector<16x128xf32>, vector<4x128xf32> -> vector<4x128xf32>
    %185 = vector.extract_strided_slice %166 {offsets = [2, 0], sizes = [1, 128], strides = [1, 1]} : vector<9x128xf32> to vector<1x128xf32>
    %186 = vector.broadcast %185 : vector<1x128xf32> to vector<4x128xf32>
    %187 = arith.mulf %184, %186 : vector<4x128xf32>
    %188 = arith.addf %181, %187 : vector<4x128xf32>
    %c3_107 = arith.constant 3 : index
    %c0_108 = arith.constant 0 : index
    %c0_109 = arith.constant 0 : index
    %189 = vector.load %arg10[%c3_107, %c0_108, %c0_109] : memref<9x4x16xf32, #tpu.memory_space<vmem>>, vector<1x4x16xf32>
    %190 = vector.shape_cast %189 : vector<1x4x16xf32> to vector<4x16xf32>
    %cst_110 = arith.constant dense<0.000000e+00> : vector<4x128xf32>
    %191 = tpu.matmul %190, %165, %cst_110 {dimension_numbers = #tpu.dot_dimension_numbers<[1], [0], [0], [1], [0, 0, 1, 1], [], []>} : vector<4x16xf32>, vector<16x128xf32>, vector<4x128xf32> -> vector<4x128xf32>
    %192 = vector.extract_strided_slice %166 {offsets = [3, 0], sizes = [1, 128], strides = [1, 1]} : vector<9x128xf32> to vector<1x128xf32>
    %193 = vector.broadcast %192 : vector<1x128xf32> to vector<4x128xf32>
    %194 = arith.mulf %191, %193 : vector<4x128xf32>
    %195 = arith.addf %188, %194 : vector<4x128xf32>
    %c4_111 = arith.constant 4 : index
    %c0_112 = arith.constant 0 : index
    %c0_113 = arith.constant 0 : index
    %196 = vector.load %arg10[%c4_111, %c0_112, %c0_113] : memref<9x4x16xf32, #tpu.memory_space<vmem>>, vector<1x4x16xf32>
    %197 = vector.shape_cast %196 : vector<1x4x16xf32> to vector<4x16xf32>
    %cst_114 = arith.constant dense<0.000000e+00> : vector<4x128xf32>
    %198 = tpu.matmul %197, %165, %cst_114 {dimension_numbers = #tpu.dot_dimension_numbers<[1], [0], [0], [1], [0, 0, 1, 1], [], []>} : vector<4x16xf32>, vector<16x128xf32>, vector<4x128xf32> -> vector<4x128xf32>
    %199 = vector.extract_strided_slice %166 {offsets = [4, 0], sizes = [1, 128], strides = [1, 1]} : vector<9x128xf32> to vector<1x128xf32>
    %200 = vector.broadcast %199 : vector<1x128xf32> to vector<4x128xf32>
    %201 = arith.mulf %198, %200 : vector<4x128xf32>
    %202 = arith.addf %195, %201 : vector<4x128xf32>
    %c5_115 = arith.constant 5 : index
    %c0_116 = arith.constant 0 : index
    %c0_117 = arith.constant 0 : index
    %203 = vector.load %arg10[%c5_115, %c0_116, %c0_117] : memref<9x4x16xf32, #tpu.memory_space<vmem>>, vector<1x4x16xf32>
    %204 = vector.shape_cast %203 : vector<1x4x16xf32> to vector<4x16xf32>
    %cst_118 = arith.constant dense<0.000000e+00> : vector<4x128xf32>
    %205 = tpu.matmul %204, %165, %cst_118 {dimension_numbers = #tpu.dot_dimension_numbers<[1], [0], [0], [1], [0, 0, 1, 1], [], []>} : vector<4x16xf32>, vector<16x128xf32>, vector<4x128xf32> -> vector<4x128xf32>
    %206 = vector.extract_strided_slice %166 {offsets = [5, 0], sizes = [1, 128], strides = [1, 1]} : vector<9x128xf32> to vector<1x128xf32>
    %207 = vector.broadcast %206 : vector<1x128xf32> to vector<4x128xf32>
    %208 = arith.mulf %205, %207 : vector<4x128xf32>
    %209 = arith.addf %202, %208 : vector<4x128xf32>
    %c6_119 = arith.constant 6 : index
    %c0_120 = arith.constant 0 : index
    %c0_121 = arith.constant 0 : index
    %210 = vector.load %arg10[%c6_119, %c0_120, %c0_121] : memref<9x4x16xf32, #tpu.memory_space<vmem>>, vector<1x4x16xf32>
    %211 = vector.shape_cast %210 : vector<1x4x16xf32> to vector<4x16xf32>
    %cst_122 = arith.constant dense<0.000000e+00> : vector<4x128xf32>
    %212 = tpu.matmul %211, %165, %cst_122 {dimension_numbers = #tpu.dot_dimension_numbers<[1], [0], [0], [1], [0, 0, 1, 1], [], []>} : vector<4x16xf32>, vector<16x128xf32>, vector<4x128xf32> -> vector<4x128xf32>
    %213 = vector.extract_strided_slice %166 {offsets = [6, 0], sizes = [1, 128], strides = [1, 1]} : vector<9x128xf32> to vector<1x128xf32>
    %214 = vector.broadcast %213 : vector<1x128xf32> to vector<4x128xf32>
    %215 = arith.mulf %212, %214 : vector<4x128xf32>
    %216 = arith.addf %209, %215 : vector<4x128xf32>
    %c7_123 = arith.constant 7 : index
    %c0_124 = arith.constant 0 : index
    %c0_125 = arith.constant 0 : index
    %217 = vector.load %arg10[%c7_123, %c0_124, %c0_125] : memref<9x4x16xf32, #tpu.memory_space<vmem>>, vector<1x4x16xf32>
    %218 = vector.shape_cast %217 : vector<1x4x16xf32> to vector<4x16xf32>
    %cst_126 = arith.constant dense<0.000000e+00> : vector<4x128xf32>
    %219 = tpu.matmul %218, %165, %cst_126 {dimension_numbers = #tpu.dot_dimension_numbers<[1], [0], [0], [1], [0, 0, 1, 1], [], []>} : vector<4x16xf32>, vector<16x128xf32>, vector<4x128xf32> -> vector<4x128xf32>
    %220 = vector.extract_strided_slice %166 {offsets = [7, 0], sizes = [1, 128], strides = [1, 1]} : vector<9x128xf32> to vector<1x128xf32>
    %221 = vector.broadcast %220 : vector<1x128xf32> to vector<4x128xf32>
    %222 = arith.mulf %219, %221 : vector<4x128xf32>
    %223 = arith.addf %216, %222 : vector<4x128xf32>
    %c8_127 = arith.constant 8 : index
    %c0_128 = arith.constant 0 : index
    %c0_129 = arith.constant 0 : index
    %224 = vector.load %arg10[%c8_127, %c0_128, %c0_129] : memref<9x4x16xf32, #tpu.memory_space<vmem>>, vector<1x4x16xf32>
    %225 = vector.shape_cast %224 : vector<1x4x16xf32> to vector<4x16xf32>
    %cst_130 = arith.constant dense<0.000000e+00> : vector<4x128xf32>
    %226 = tpu.matmul %225, %165, %cst_130 {dimension_numbers = #tpu.dot_dimension_numbers<[1], [0], [0], [1], [0, 0, 1, 1], [], []>} : vector<4x16xf32>, vector<16x128xf32>, vector<4x128xf32> -> vector<4x128xf32>
    %227 = vector.extract_strided_slice %166 {offsets = [8, 0], sizes = [1, 128], strides = [1, 1]} : vector<9x128xf32> to vector<1x128xf32>
    %228 = vector.broadcast %227 : vector<1x128xf32> to vector<4x128xf32>
    %229 = arith.mulf %226, %228 : vector<4x128xf32>
    %230 = arith.addf %223, %229 : vector<4x128xf32>
    %cst_131 = arith.constant 0.000000e+00 : f32
    %231 = vector.broadcast %cst_131 : f32 to vector<4x128xf32>
    %232 = arith.cmpf oge, %230, %231 : vector<4x128xf32>
    %cst_132 = arith.constant 2.000000e-01 : f32
    %233 = vector.broadcast %cst_132 : f32 to vector<4x128xf32>
    %234 = arith.mulf %233, %230 : vector<4x128xf32>
    %235 = arith.select %232, %230, %234 : vector<4x128xi1>, vector<4x128xf32>
    %c0_133 = arith.constant 0 : index
    %c0_134 = arith.constant 0 : index
    %236 = vector.load %arg12[%c0_133, %c0_134] : memref<128x256xf32, #tpu.memory_space<vmem>>, vector<128x256xf32>
    %cst_135 = arith.constant dense<0.000000e+00> : vector<4x256xf32>
    %237 = tpu.matmul %235, %236, %cst_135 {dimension_numbers = #tpu.dot_dimension_numbers<[1], [0], [0], [1], [0, 0, 1, 1], [], []>} : vector<4x128xf32>, vector<128x256xf32>, vector<4x256xf32> -> vector<4x256xf32>
    %cst_136 = arith.constant 0.000000e+00 : f32
    %238 = vector.broadcast %cst_136 : f32 to vector<4x256xf32>
    %239 = arith.cmpf oge, %237, %238 : vector<4x256xf32>
    %cst_137 = arith.constant 2.000000e-01 : f32
    %240 = vector.broadcast %cst_137 : f32 to vector<4x256xf32>
    %241 = arith.mulf %240, %237 : vector<4x256xf32>
    %242 = arith.select %239, %237, %241 : vector<4x256xi1>, vector<4x256xf32>
    %c0_138 = arith.constant 0 : index
    %c0_139 = arith.constant 0 : index
    %243 = vector.load %arg14[%c0_138, %c0_139] : memref<9x256xf32, #tpu.memory_space<vmem>>, vector<9x256xf32>
    %cst_140 = arith.constant 0.000000e+00 : f32
    %244 = vector.broadcast %cst_140 : f32 to vector<1x256xf32>
    %245 = vector.extract_strided_slice %242 {offsets = [0, 0], sizes = [1, 256], strides = [1, 1]} : vector<4x256xf32> to vector<1x256xf32>
    %246 = vector.extract_strided_slice %243 {offsets = [4, 0], sizes = [1, 256], strides = [1, 1]} : vector<9x256xf32> to vector<1x256xf32>
    %247 = arith.mulf %245, %246 : vector<1x256xf32>
    %248 = arith.addf %244, %247 : vector<1x256xf32>
    %249 = vector.extract_strided_slice %242 {offsets = [1, 0], sizes = [1, 256], strides = [1, 1]} : vector<4x256xf32> to vector<1x256xf32>
    %250 = vector.extract_strided_slice %243 {offsets = [5, 0], sizes = [1, 256], strides = [1, 1]} : vector<9x256xf32> to vector<1x256xf32>
    %251 = arith.mulf %249, %250 : vector<1x256xf32>
    %252 = arith.addf %248, %251 : vector<1x256xf32>
    %253 = vector.extract_strided_slice %242 {offsets = [2, 0], sizes = [1, 256], strides = [1, 1]} : vector<4x256xf32> to vector<1x256xf32>
    %254 = vector.extract_strided_slice %243 {offsets = [7, 0], sizes = [1, 256], strides = [1, 1]} : vector<9x256xf32> to vector<1x256xf32>
    %255 = arith.mulf %253, %254 : vector<1x256xf32>
    %256 = arith.addf %252, %255 : vector<1x256xf32>
    %257 = vector.extract_strided_slice %242 {offsets = [3, 0], sizes = [1, 256], strides = [1, 1]} : vector<4x256xf32> to vector<1x256xf32>
    %258 = vector.extract_strided_slice %243 {offsets = [8, 0], sizes = [1, 256], strides = [1, 1]} : vector<9x256xf32> to vector<1x256xf32>
    %259 = arith.mulf %257, %258 : vector<1x256xf32>
    %260 = arith.addf %256, %259 : vector<1x256xf32>
    %cst_141 = arith.constant 0.000000e+00 : f32
    %261 = vector.broadcast %cst_141 : f32 to vector<1x256xf32>
    %262 = arith.cmpf oge, %260, %261 : vector<1x256xf32>
    %cst_142 = arith.constant 2.000000e-01 : f32
    %263 = vector.broadcast %cst_142 : f32 to vector<1x256xf32>
    %264 = arith.mulf %263, %260 : vector<1x256xf32>
    %265 = arith.select %262, %260, %264 : vector<1x256xi1>, vector<1x256xf32>
    %c0_143 = arith.constant 0 : index
    %c0_144 = arith.constant 0 : index
    %266 = vector.load %arg15[%c0_143, %c0_144] : memref<256x256xf32, #tpu.memory_space<vmem>>, vector<256x256xf32>
    %cst_145 = arith.constant dense<0.000000e+00> : vector<1x256xf32>
    %267 = tpu.matmul %265, %266, %cst_145 {dimension_numbers = #tpu.dot_dimension_numbers<[1], [0], [0], [1], [0, 0, 1, 1], [], []>} : vector<1x256xf32>, vector<256x256xf32>, vector<1x256xf32> -> vector<1x256xf32>
    %cst_146 = arith.constant 0.000000e+00 : f32
    %268 = vector.broadcast %cst_146 : f32 to vector<1x256xf32>
    %269 = arith.cmpf oge, %267, %268 : vector<1x256xf32>
    %cst_147 = arith.constant 2.000000e-01 : f32
    %270 = vector.broadcast %cst_147 : f32 to vector<1x256xf32>
    %271 = arith.mulf %270, %267 : vector<1x256xf32>
    %272 = arith.select %269, %267, %271 : vector<1x256xi1>, vector<1x256xf32>
    %c0_148 = arith.constant 0 : index
    %c0_149 = arith.constant 0 : index
    %273 = vector.load %arg17[%c0_148, %c0_149] : memref<9x256xf32, #tpu.memory_space<vmem>>, vector<9x256xf32>
    %cst_150 = arith.constant 0.000000e+00 : f32
    %274 = vector.broadcast %cst_150 : f32 to vector<1x256xf32>
    %275 = vector.extract_strided_slice %273 {offsets = [4, 0], sizes = [1, 256], strides = [1, 1]} : vector<9x256xf32> to vector<1x256xf32>
    %276 = arith.mulf %272, %275 : vector<1x256xf32>
    %277 = arith.addf %274, %276 : vector<1x256xf32>
    %cst_151 = arith.constant 0.000000e+00 : f32
    %278 = vector.broadcast %cst_151 : f32 to vector<1x256xf32>
    %279 = arith.cmpf oge, %277, %278 : vector<1x256xf32>
    %cst_152 = arith.constant 2.000000e-01 : f32
    %280 = vector.broadcast %cst_152 : f32 to vector<1x256xf32>
    %281 = arith.mulf %280, %277 : vector<1x256xf32>
    %282 = arith.select %279, %277, %281 : vector<1x256xi1>, vector<1x256xf32>
    %c0_153 = arith.constant 0 : index
    %c0_154 = arith.constant 0 : index
    %283 = vector.load %arg18[%c0_153, %c0_154] : memref<256x256xf32, #tpu.memory_space<vmem>>, vector<256x256xf32>
    %cst_155 = arith.constant dense<0.000000e+00> : vector<1x256xf32>
    %284 = tpu.matmul %282, %283, %cst_155 {dimension_numbers = #tpu.dot_dimension_numbers<[1], [0], [0], [1], [0, 0, 1, 1], [], []>} : vector<1x256xf32>, vector<256x256xf32>, vector<1x256xf32> -> vector<1x256xf32>
    %cst_156 = arith.constant 0.000000e+00 : f32
    %285 = vector.broadcast %cst_156 : f32 to vector<1x256xf32>
    %286 = arith.cmpf oge, %284, %285 : vector<1x256xf32>
    %cst_157 = arith.constant 2.000000e-01 : f32
    %287 = vector.broadcast %cst_157 : f32 to vector<1x256xf32>
    %288 = arith.mulf %287, %284 : vector<1x256xf32>
    %289 = arith.select %286, %284, %288 : vector<1x256xi1>, vector<1x256xf32>
    %c0_158 = arith.constant 0 : index
    %c0_159 = arith.constant 0 : index
    %290 = vector.load %arg20[%c0_158, %c0_159] : memref<9x256xf32, #tpu.memory_space<vmem>>, vector<9x256xf32>
    %291 = vector.extract_strided_slice %290 {offsets = [4, 0], sizes = [1, 256], strides = [1, 1]} : vector<9x256xf32> to vector<1x256xf32>
    %292 = arith.mulf %289, %291 : vector<1x256xf32>
    %cst_160 = arith.constant dense<0.000000e+00> : vector<1xf32>
    %293 = vector.multi_reduction <add>, %292, %cst_160 [1] : vector<1x256xf32> to vector<1xf32>
    %294 = vector.shape_cast %293 : vector<1xf32> to vector<1x1xf32>
    %c0_161 = arith.constant 0 : index
    %c0_162 = arith.constant 0 : index
    %295 = vector.load %arg21[%c0_161, %c0_162] : memref<1x1xf32, #tpu.memory_space<vmem>>, vector<1x1xf32>
    %296 = arith.addf %294, %295 : vector<1x1xf32>
    %c0_163 = arith.constant 0 : index
    %c0_164 = arith.constant 0 : index
    %c0_165 = arith.constant 0 : index
    %297 = vector.load %arg22[%c0_163, %c0_164, %c0_165] : memref<1x1x1xf32, #tpu.memory_space<vmem>>, vector<1x1x1xf32>
    %298 = vector.shape_cast %297 : vector<1x1x1xf32> to vector<1x1xf32>
    %299 = vector.shape_cast %296 : vector<1x1xf32> to vector<1x1x1xf32>
    tpu.vector_store %arg22[%c0_163, %c0_164, %c0_165], %299 {strides = array<i32>} : memref<1x1x1xf32, #tpu.memory_space<vmem>>, vector<1x1x1xf32>,
    return
  }
  func.func @transform_0(%arg0: i32) -> (i32, i32, i32) {
    %c0_i32 = arith.constant 0 : i32
    %c0_i32_0 = arith.constant 0 : i32
    %c0_i32_1 = arith.constant 0 : i32
    return %arg0, %c0_i32, %c0_i32_0 : i32, i32, i32
  }
  func.func @transform_1(%arg0: i32) -> (i32, i32) {
    %c0_i32 = arith.constant 0 : i32
    %c0_i32_0 = arith.constant 0 : i32
    %c0_i32_1 = arith.constant 0 : i32
    return %c0_i32, %c0_i32_0 : i32, i32
  }
  func.func @transform_2(%arg0: i32) -> (i32, i32) {
    %c0_i32 = arith.constant 0 : i32
    %c0_i32_0 = arith.constant 0 : i32
    %c0_i32_1 = arith.constant 0 : i32
    return %c0_i32, %c0_i32_0 : i32, i32
  }
  func.func @transform_3(%arg0: i32) -> (i32, i32, i32) {
    %c0_i32 = arith.constant 0 : i32
    %c0_i32_0 = arith.constant 0 : i32
    %c0_i32_1 = arith.constant 0 : i32
    %c0_i32_2 = arith.constant 0 : i32
    return %c0_i32, %c0_i32_0, %c0_i32_1 : i32, i32, i32
  }
  func.func @transform_4(%arg0: i32) -> (i32, i32) {
    %c0_i32 = arith.constant 0 : i32
    %c0_i32_0 = arith.constant 0 : i32
    %c0_i32_1 = arith.constant 0 : i32
    return %c0_i32, %c0_i32_0 : i32, i32
  }
  func.func @transform_5(%arg0: i32) -> (i32, i32) {
    %c0_i32 = arith.constant 0 : i32
    %c0_i32_0 = arith.constant 0 : i32
    %c0_i32_1 = arith.constant 0 : i32
    return %c0_i32, %c0_i32_0 : i32, i32
  }
  func.func @transform_6(%arg0: i32) -> (i32, i32, i32) {
    %c0_i32 = arith.constant 0 : i32
    %c0_i32_0 = arith.constant 0 : i32
    %c0_i32_1 = arith.constant 0 : i32
    %c0_i32_2 = arith.constant 0 : i32
    return %c0_i32, %c0_i32_0, %c0_i32_1 : i32, i32, i32
  }
  func.func @transform_7(%arg0: i32) -> (i32, i32) {
    %c0_i32 = arith.constant 0 : i32
    %c0_i32_0 = arith.constant 0 : i32
    %c0_i32_1 = arith.constant 0 : i32
    return %c0_i32, %c0_i32_0 : i32, i32
  }
  func.func @transform_8(%arg0: i32) -> (i32, i32) {
    %c0_i32 = arith.constant 0 : i32
    %c0_i32_0 = arith.constant 0 : i32
    %c0_i32_1 = arith.constant 0 : i32
    return %c0_i32, %c0_i32_0 : i32, i32
  }
  func.func @transform_9(%arg0: i32) -> (i32, i32, i32) {
    %c0_i32 = arith.constant 0 : i32
    %c0_i32_0 = arith.constant 0 : i32
    %c0_i32_1 = arith.constant 0 : i32
    %c0_i32_2 = arith.constant 0 : i32
    return %c0_i32, %c0_i32_0, %c0_i32_1 : i32, i32, i32
  }
  func.func @transform_10(%arg0: i32) -> (i32, i32) {
    %c0_i32 = arith.constant 0 : i32
    %c0_i32_0 = arith.constant 0 : i32
    %c0_i32_1 = arith.constant 0 : i32
    return %c0_i32, %c0_i32_0 : i32, i32
  }
  func.func @transform_11(%arg0: i32) -> (i32, i32) {
    %c0_i32 = arith.constant 0 : i32
    %c0_i32_0 = arith.constant 0 : i32
    %c0_i32_1 = arith.constant 0 : i32
    return %c0_i32, %c0_i32_0 : i32, i32
  }
  func.func @transform_12(%arg0: i32) -> (i32, i32, i32) {
    %c0_i32 = arith.constant 0 : i32
    %c0_i32_0 = arith.constant 0 : i32
    %c0_i32_1 = arith.constant 0 : i32
    %c0_i32_2 = arith.constant 0 : i32
    return %c0_i32, %c0_i32_0, %c0_i32_1 : i32, i32, i32
  }
  func.func @transform_13(%arg0: i32) -> (i32, i32) {
    %c0_i32 = arith.constant 0 : i32
    %c0_i32_0 = arith.constant 0 : i32
    %c0_i32_1 = arith.constant 0 : i32
    return %c0_i32, %c0_i32_0 : i32, i32
  }
  func.func @transform_14(%arg0: i32) -> (i32, i32) {
    %c0_i32 = arith.constant 0 : i32
    %c0_i32_0 = arith.constant 0 : i32
    %c0_i32_1 = arith.constant 0 : i32
    return %c0_i32, %c0_i32_0 : i32, i32
  }
  func.func @transform_15(%arg0: i32) -> (i32, i32, i32) {
    %c0_i32 = arith.constant 0 : i32
    %c0_i32_0 = arith.constant 0 : i32
    %c0_i32_1 = arith.constant 0 : i32
    %c0_i32_2 = arith.constant 0 : i32
    return %c0_i32, %c0_i32_0, %c0_i32_1 : i32, i32, i32
  }
  func.func @transform_16(%arg0: i32) -> (i32, i32) {
    %c0_i32 = arith.constant 0 : i32
    %c0_i32_0 = arith.constant 0 : i32
    %c0_i32_1 = arith.constant 0 : i32
    return %c0_i32, %c0_i32_0 : i32, i32
  }
  func.func @transform_17(%arg0: i32) -> (i32, i32) {
    %c0_i32 = arith.constant 0 : i32
    %c0_i32_0 = arith.constant 0 : i32
    %c0_i32_1 = arith.constant 0 : i32
    return %c0_i32, %c0_i32_0 : i32, i32
  }
  func.func @transform_18(%arg0: i32) -> (i32, i32, i32) {
    %c0_i32 = arith.constant 0 : i32
    %c0_i32_0 = arith.constant 0 : i32
    %c0_i32_1 = arith.constant 0 : i32
    %c0_i32_2 = arith.constant 0 : i32
    return %c0_i32, %c0_i32_0, %c0_i32_1 : i32, i32, i32
  }
  func.func @transform_19(%arg0: i32) -> (i32, i32) {
    %c0_i32 = arith.constant 0 : i32
    %c0_i32_0 = arith.constant 0 : i32
    %c0_i32_1 = arith.constant 0 : i32
    return %c0_i32, %c0_i32_0 : i32, i32
  }
  func.func @transform_20(%arg0: i32) -> (i32, i32) {
    %c0_i32 = arith.constant 0 : i32
    %c0_i32_0 = arith.constant 0 : i32
    %c0_i32_1 = arith.constant 0 : i32
    return %c0_i32, %c0_i32_0 : i32, i32
  }
  func.func @transform_21(%arg0: i32) -> (i32, i32, i32) {
    %c0_i32 = arith.constant 0 : i32
    %c0_i32_0 = arith.constant 0 : i32
    %c0_i32_1 = arith.constant 0 : i32
    return %arg0, %c0_i32, %c0_i32_0 : i32, i32, i32
  }
}

</mosaic_0001>

<bundles_post_ra>
// kernel: patch_discriminator_forward.1
= control target key start
LH: loop header
LB: loop body
LE: loop exit
PB: predicated region body
PF: predicated region fallthrough
CT: control target
= control target key end

     0   :  { %s8651_s0 = inlined_call_operand.vmem [shape: f32[2,256,9], index: 0, kind: input, shape index: {}]   ;;  %s8652_s1 = inlined_call_operand.vmem [shape: f32[9,32], index: 1, kind: input, shape index: {}]   ;;  %s8653_s2 = inlined_call_operand.vmem [shape: f32[1,32], index: 2, kind: input, shape index: {}]   ;;  %s8654_s3 = inlined_call_operand.vmem [shape: f32[9,64,256], index: 3, kind: input, shape index: {}]   ;;  %s8655_s4 = inlined_call_operand.vmem [shape: f32[9,32], index: 4, kind: input, shape index: {}]   ;;  %s8656_s5 = inlined_call_operand.vmem [shape: f32[32,64], index: 5, kind: input, shape index: {}]   ;;  %s8657_s6 = inlined_call_operand.vmem [shape: f32[9,16,64], index: 6, kind: input, shape index: {}]   ;;  %s8658_s7 = inlined_call_operand.vmem [shape: f32[9,64], index: 7, kind: input, shape index: {}]   ;;  %s8659_s8 = inlined_call_operand.vmem [shape: f32[64,128], index: 8, kind: input, shape index: {}]   ;;  %s8660_s9 = inlined_call_operand.vmem [shape: f32[9,4,16], index: 9, kind: input, shape index: {}]   ;;  %s8661_s10 = inlined_call_operand.vmem [shape: f32[9,128], index: 10, kind: input, shape index: {}]   ;;  %s8662_s11 = inlined_call_operand.vmem [shape: f32[128,256], index: 11, kind: input, shape index: {}]   ;;  %s8663_s12 = inlined_call_operand.vmem [shape: f32[9,1,4], index: 12, kind: input, shape index: {}]   ;;  %s8664_s13 = inlined_call_operand.vmem [shape: f32[9,256], index: 13, kind: input, shape index: {}]   ;;  %s8665_s14 = inlined_call_operand.vmem [shape: f32[256,256], index: 14, kind: input, shape index: {}]   ;;  %s8666_s15 = inlined_call_operand.vmem [shape: f32[9,1,1], index: 15, kind: input, shape index: {}, may-alias: {15,18}]   ;;  %s8667_s16 = inlined_call_operand.vmem [shape: f32[9,256], index: 16, kind: input, shape index: {}]   ;;  %s8668_s17 = inlined_call_operand.vmem [shape: f32[256,256], index: 17, kind: input, shape index: {}]   ;;  %s8669_s18 = inlined_call_operand.vmem [shape: f32[9,1,1], index: 18, kind: input, shape index: {}, may-alias: {15,18}]   ;;  %s8670_s19 = inlined_call_operand.vmem [shape: f32[9,256], index: 19, kind: input, shape index: {}]   ;;  %s8671_s20 = inlined_call_operand.<no memory space> [shape: f32[1,1], index: 20, kind: input, shape index: {}]   ;;  %s8672_s21 = inlined_call_operand.vmem [shape: f32[2,1,1], index: 21, kind: output, shape index: {}]  }
   0x1   :  { %8677 = sst [smem:[#allocation3_spill]] %s8651_s0  ;;  %v26_v0 = vstv %s8671_s20 }
   0x2   :  { %8678 = sst [smem:[#allocation4_spill]] %s8652_s1  ;;  %27 = vst [vmem:[#allocation2] sm:$0x1] %v26_v0 }
   0x3   :  { %8679 = sst [smem:[#allocation5_spill]] %s8653_s2  ;;  %s6803_s2 = smov 0  }
   0x4   :  { %8680 = sst [smem:[#allocation6_spill]] %s8654_s3 }
   0x5   :  { %8681 = sst [smem:[#allocation7_spill]] %s8655_s4 }
   0x6   :  { %8682 = sst [smem:[#allocation8_spill]] %s8656_s5 }
   0x7 LB: > { %s4777_s18 = sadd.s32 4294967295, %s6684_s2   ;;  %p4781_p0 = scmp.ge.s32.totalorder %s6684_s2, 1  ;;  %s6684_s2 = sphi %s6803_s2, %s33_s2  }
   0x8   : > { %p589_p1 = scmp.lt.s32.totalorder %s6684_s2, 3 }
   0xa   : > { %p590_p2 = pnand %p4781_p0, %p589_p1 }
   0xb   : > { %s8683_s27 = sld [smem:[#allocation4_spill]] (!%p590_p2)  ;;  %vm793_vm0 = vcmask (!%p590_p2), 1040384   ;;  %p647_p3 = scmp.lt.s32.totalorder (!%p590_p2), %s4777_s18, 1  ;;  %vm6686_vm1 = vmmov (!%p590_p2), 1   ;;  %vm696_vm3 = vcmask (!%p590_p2), 72704  }
   0xc   : > { %593 = sbr.rel (%p590_p2) target bundleno = 2449 (0x991), region = 104  ;;  %vm6016_vm2 = vmpackc.low (!%p590_p2), %vm793_vm0, %vm6686_vm1  ;;  %s8684_s4 = sld [smem:[#allocation3_spill]] (!%p590_p2) }
   0xd   : > { %s8685_s22 = sld [smem:[#allocation6_spill]] (!%p590_p2)  ;;  %s8686_s25 = sld [smem:[#allocation5_spill]] (!%p590_p2) }
   0xe   : > { %s8687_s20 = sld [smem:[#allocation8_spill]] (!%p590_p2)  ;;  %s8688_s23 = sld [smem:[#allocation7_spill]] (!%p590_p2) }
  0x11   : > { %v687_v1 = vld [vmem:[%s8683_s27] sm:$0xff] (!%p590_p2)  ;;  %v688_v2 = vld [vmem:[%s8683_s27 + $0x8] sm:$0x1] (!%p590_p2) }
  0x12   : > { %v6015_v3 = vpack.c.bf16 (!%p590_p2), %v688_v2, %v687_v1 }
  0x13   : > { %s8690_s18 = smov (!%p647_p3, %s4777_s18), 1  ;;  %v1121_v36 = vld [vmem:[%s8685_s22 + $0x8] sm:$0xff]  ;;  %v6899_v38 = vld [vmem:[%s8686_s25] ss:$0 sm:$0xff] }
  0x14   : > { %6017 = vmatprep.subr.msk.bf16.mxu0 %vm6016_vm2, %v6015_v3  ;;  %6664 = vmatprep.subr.msk.bf16.mxu1 %vm6016_vm2, %v6015_v3  ;;  %s5012_s28 = sshll.u32 %s8690_s18, 8  ;;  %v4835_v37 = vld [vmem:[%s8685_s22 + $0x108] sm:$0xff]  ;;  %s654_s15 = scalar_lea.vmem %s8672_s21, %s8690_s18 }
  0x15   : > { %6020 = vmatpush3.bf16.msk.msra.mxu0 %vm6016_vm2, %v6015_v3  ;;  %6665 = vmatpush3.bf16.msk.msra.mxu1 %vm6016_vm2, %v6015_v3  ;;  %s6824_s30 = scalar_lea.vmem %s8684_s4, %s5012_s28 }
  0x16   : > { %v655_v4 = vld [vmem:[%s6824_s30] sm:$0xff]  ;;  %v656_v6 = vld [vmem:[%s6824_s30 + $0x8] sm:$0xff]  ;;  %v657_v8 = vld [vmem:[%s6824_s30 + $0x10] sm:$0xff] }
  0x17   : > { %v671_v5 = vld [vmem:[%s6824_s30 + $0x80] sm:$0xff]  ;;  %5694 = vmatprep.mubr.msk.f32.mxu0 %vm696_vm3, %v655_v4  ;;  %v672_v7 = vld [vmem:[%s6824_s30 + $0x88] sm:$0xff]  ;;  %v673_v9 = vld [vmem:[%s6824_s30 + $0x90] sm:$0xff] }
  0x18   : > { %5718 = vmatprep.mubr.msk.f32.mxu1 %vm696_vm3, %v671_v5  ;;  %5695 = vmatmul.mubr.msk.f32.vlgmr.msra.gmra.mrb[0].mxu0 %vm696_vm3, %v656_v6  ;;  %v658_v10 = vld [vmem:[%s6824_s30 + $0x18] sm:$0xff]  ;;  %v659_v12 = vld [vmem:[%s6824_s30 + $0x20] sm:$0xff]  ;;  %v660_v14 = vld [vmem:[%s6824_s30 + $0x28] sm:$0xff] }
  0x19   : > { %5719 = vmatmul.mubr.msk.f32.vlgmr.msra.gmra.mrb[0].mxu1 %vm696_vm3, %v672_v7  ;;  %5697 = vmatprep.mubr.msk.f32.mxu0 %vm696_vm3, %v657_v8  ;;  %v674_v11 = vld [vmem:[%s6824_s30 + $0x98] sm:$0xff]  ;;  %v675_v13 = vld [vmem:[%s6824_s30 + $0xa0] sm:$0xff]  ;;  %v676_v15 = vld [vmem:[%s6824_s30 + $0xa8] sm:$0xff] }
  0x1a   : > { %5721 = vmatprep.mubr.msk.f32.mxu1 %vm696_vm3, %v673_v9  ;;  %v661_v16 = vld [vmem:[%s6824_s30 + $0x30] sm:$0xff]  ;;  %v662_v18 = vld [vmem:[%s6824_s30 + $0x38] sm:$0xff]  ;;  %v663_v20 = vld [vmem:[%s6824_s30 + $0x40] sm:$0xff] }
  0x1b   : > { %v677_v17 = vld [vmem:[%s6824_s30 + $0xb0] sm:$0xff]  ;;  %v678_v19 = vld [vmem:[%s6824_s30 + $0xb8] sm:$0xff]  ;;  %v679_v21 = vld [vmem:[%s6824_s30 + $0xc0] sm:$0xff] }
  0x1c   : > { %5698 = vmatmul.mubr.msk.f32.gmra.mrb[2].mxu0 %vm696_vm3, %v658_v10  ;;  %v664_v22 = vld [vmem:[%s6824_s30 + $0x48] sm:$0xff]  ;;  %v665_v24 = vld [vmem:[%s6824_s30 + $0x50] sm:$0xff]  ;;  %v666_v26 = vld [vmem:[%s6824_s30 + $0x58] sm:$0xff] }
  0x1d   : > { %5722 = vmatmul.mubr.msk.f32.gmra.mrb[2].mxu1 %vm696_vm3, %v674_v11  ;;  %5700 = vmatprep.mubr.msk.f32.mxu0 %vm696_vm3, %v659_v12  ;;  %v680_v23 = vld [vmem:[%s6824_s30 + $0xc8] sm:$0xff]  ;;  %v681_v25 = vld [vmem:[%s6824_s30 + $0xd0] sm:$0xff]  ;;  %v682_v27 = vld [vmem:[%s6824_s30 + $0xd8] sm:$0xff] }
  0x1e   : > { %5724 = vmatprep.mubr.msk.f32.mxu1 %vm696_vm3, %v675_v13  ;;  %v667_v28 = vld [vmem:[%s6824_s30 + $0x60] sm:$0xff]  ;;  %v668_v30 = vld [vmem:[%s6824_s30 + $0x68] sm:$0xff]  ;;  %v669_v32 = vld [vmem:[%s6824_s30 + $0x70] sm:$0xff] }
  0x1f   : > { %v683_v29 = vld [vmem:[%s6824_s30 + $0xe0] sm:$0xff]  ;;  %v684_v31 = vld [vmem:[%s6824_s30 + $0xe8] sm:$0xff]  ;;  %v685_v33 = vld [vmem:[%s6824_s30 + $0xf0] sm:$0xff] }
  0x20   : > { %5701 = vmatmul.mubr.msk.f32.gmra.mrb[4].mxu0 %vm696_vm3, %v660_v14  ;;  %v670_v34 = vld [vmem:[%s6824_s30 + $0x78] sm:$0xff] }
  0x21   : > { %5725 = vmatmul.mubr.msk.f32.gmra.mrb[4].mxu1 %vm696_vm3, %v676_v15  ;;  %5703 = vmatprep.mubr.msk.f32.mxu0 %vm696_vm3, %v661_v16  ;;  %v686_v35 = vld [vmem:[%s6824_s30 + $0xf8] sm:$0xff] }
  0x22   : > { %5727 = vmatprep.mubr.msk.f32.mxu1 %vm696_vm3, %v677_v17 }
  0x24   : > { %5704 = vmatmul.mubr.msk.f32.gmra.mrb[6].mxu0 %vm696_vm3, %v662_v18 }
  0x25   : > { %5728 = vmatmul.mubr.msk.f32.gmra.mrb[6].mxu1 %vm696_vm3, %v678_v19  ;;  %5706 = vmatprep.mubr.msk.f32.mxu0 %vm696_vm3, %v663_v20 }
  0x26   : > { %5730 = vmatprep.mubr.msk.f32.mxu1 %vm696_vm3, %v679_v21 }
  0x28   : > { %5707 = vmatmul.mubr.msk.f32.gmra.mrb[8].mxu0 %vm696_vm3, %v664_v22 }
  0x29   : > { %5731 = vmatmul.mubr.msk.f32.gmra.mrb[8].mxu1 %vm696_vm3, %v680_v23  ;;  %5709 = vmatprep.mubr.msk.f32.mxu0 %vm696_vm3, %v665_v24 }
  0x2a   : > { %5733 = vmatprep.mubr.msk.f32.mxu1 %vm696_vm3, %v681_v25 }
  0x2c   : > { %5710 = vmatmul.mubr.msk.f32.gmra.mrb[10].mxu0 %vm696_vm3, %v666_v26 }
  0x2d   : > { %5734 = vmatmul.mubr.msk.f32.gmra.mrb[10].mxu1 %vm696_vm3, %v682_v27  ;;  %5712 = vmatprep.mubr.msk.f32.mxu0 %vm696_vm3, %v667_v28 }
  0x2e   : > { %5736 = vmatprep.mubr.msk.f32.mxu1 %vm696_vm3, %v683_v29 }
  0x30   : > { %5713 = vmatmul.mubr.msk.f32.gmra.mrb[12].mxu0 %vm696_vm3, %v668_v30 }
  0x31   : > { %5737 = vmatmul.mubr.msk.f32.gmra.mrb[12].mxu1 %vm696_vm3, %v684_v31  ;;  %5715 = vmatprep.mubr.msk.f32.mxu0 %vm696_vm3, %v669_v32 }
  0x32   : > { %5739 = vmatprep.mubr.msk.f32.mxu1 %vm696_vm3, %v685_v33 }
  0x34   : > { %5716 = vmatmul.mubr.msk.f32.gmra.mrb[14].mxu0 %vm696_vm3, %v670_v34 }
  0x35   : > { %5740 = vmatmul.mubr.msk.f32.gmra.mrb[14].mxu1 %vm696_vm3, %v686_v35  ;;  %1484 = vmatprep.mubr.f32.mxu0 %v4835_v37 }
  0x36   : > { %1200 = vmatprep.mubr.f32.mxu1 %v1121_v36 }
  0xeb   : > { %v5696_v39 = vpop.f32.mrb[0].mxu0 }
  0xec   : > { %v5720_v40 = vpop.f32.mrb[0].mxu1  ;;  %v869_v41 = vadd.f32 %v5696_v39, %v6899_v38  ;;  %v863_v43 = vpop.f32.mrb[1].mxu0 }
  0xed   : > { %v949_v42 = vadd.f32 %v5720_v40, %v6899_v38  ;;  %v943_v44 = vpop.f32.mrb[1].mxu1  ;;  %v864_v45 = vadd.f32 %v6899_v38, %v863_v43 }
  0xee   : > { %v944_v46 = vadd.f32 %v6899_v38, %v943_v44  ;;  %vm1023_vm4 = vcmp.ge.f32.partialorder %v869_v41, 0.0  ;;  %v1055_v47 = vmul.f32 0.2, %v869_v41 }
  0xef   : > { %vm1039_vm5 = vcmp.ge.f32.partialorder %v949_v42, 0.0  ;;  %v1071_v48 = vmul.f32 0.2, %v949_v42  ;;  %vm1022_vm6 = vcmp.ge.f32.partialorder %v864_v45, 0.0  ;;  %v1054_v49 = vmul.f32 0.2, %v864_v45 }
  0xf0   : > { %vm1038_vm7 = vcmp.ge.f32.partialorder %v944_v46, 0.0  ;;  %v1070_v50 = vmul.f32 0.2, %v944_v46  ;;  %v1087_v51 = vsel %vm1023_vm4, %v869_v41, %v1055_v47  ;;  %v5699_v53 = vpop.f32.mrb[2].mxu0  ;;  %v5723_v54 = vpop.f32.mrb[2].mxu1 }
  0xf1   : > { %v1103_v52 = vsel %vm1039_vm5, %v949_v42, %v1071_v48  ;;  %v1086_v55 = vsel %vm1022_vm6, %v864_v45, %v1054_v49  ;;  %v879_v57 = vadd.f32 %v5699_v53, %v6899_v38  ;;  %v959_v58 = vadd.f32 %v5723_v54, %v6899_v38  ;;  %v873_v59 = vpop.f32.mrb[3].mxu0  ;;  %v953_v60 = vpop.f32.mrb[3].mxu1 }
  0xf2   : > { %v1102_v56 = vsel %vm1038_vm7, %v944_v46, %v1070_v50  ;;  %v6907_v61 = vpack.c.bf16 %v1087_v51, %v1086_v55  ;;  %v874_v63 = vadd.f32 %v6899_v38, %v873_v59  ;;  %v954_v0 = vadd.f32 %v6899_v38, %v953_v60 }
  0xf3   : > { %v6909_v62 = vpack.c.bf16 %v1103_v52, %v1102_v56  ;;  %vm1025_vm8 = vcmp.ge.f32.partialorder %v879_v57, 0.0  ;;  %v1057_v1 = vmul.f32 0.2, %v879_v57  ;;  %vm1041_vm9 = vcmp.ge.f32.partialorder %v959_v58, 0.0  ;;  %v5702_v7 = vpop.f32.mrb[4].mxu0 }
  0xf4   : > { %v1073_v2 = vmul.f32 0.2, %v959_v58  ;;  %vm1024_vm10 = vcmp.ge.f32.partialorder %v874_v63, 0.0  ;;  %v1056_v3 = vmul.f32 0.2, %v874_v63  ;;  %vm1040_vm11 = vcmp.ge.f32.partialorder %v954_v0, 0.0 }
  0xf5   : > { %v1072_v4 = vmul.f32 0.2, %v954_v0  ;;  %6022 = vmatprep.subr.bf16.mxu1 %v6909_v62  ;;  %6086 = vmatprep.subr.bf16.mxu0 %v6909_v62  ;;  %v1089_v5 = vsel %vm1025_vm8, %v879_v57, %v1057_v1  ;;  %v5726_v8 = vpop.f32.mrb[4].mxu1  ;;  %v889_v11 = vadd.f32 %v5702_v7, %v6899_v38  ;;  %v883_v13 = vpop.f32.mrb[5].mxu0 }
  0xf6   : > { %v1105_v6 = vsel %vm1041_vm9, %v959_v58, %v1073_v2  ;;  %6024 = vmatpush3.bf16.msra.mxu1 %v6907_v61  ;;  %6088 = vmatpush3.bf16.msra.mxu0 %v6907_v61  ;;  %v1088_v9 = vsel %vm1024_vm10, %v874_v63, %v1056_v3  ;;  %v969_v12 = vadd.f32 %v5726_v8, %v6899_v38  ;;  %v963_v14 = vpop.f32.mrb[5].mxu1 }
  0xf7   : > { %v1104_v10 = vsel %vm1040_vm11, %v954_v0, %v1072_v4  ;;  %v6919_v15 = vpack.c.bf16 %v1089_v5, %v1088_v9  ;;  %v884_v17 = vadd.f32 %v6899_v38, %v883_v13  ;;  %v964_v18 = vadd.f32 %v6899_v38, %v963_v14  ;;  %v5705_v19 = vpop.f32.mrb[6].mxu0 }
  0xf8   : > { %v6921_v16 = vpack.c.bf16 %v1105_v6, %v1104_v10  ;;  %v5729_v20 = vpop.f32.mrb[6].mxu1  ;;  %vm1027_vm12 = vcmp.ge.f32.partialorder %v889_v11, 0.0  ;;  %v1059_v21 = vmul.f32 0.2, %v889_v11  ;;  %vm1043_vm13 = vcmp.ge.f32.partialorder %v969_v12, 0.0  ;;  %v893_v29 = vpop.f32.mrb[7].mxu0 }
  0xf9   : > { %v1075_v22 = vmul.f32 0.2, %v969_v12  ;;  %vm1026_vm14 = vcmp.ge.f32.partialorder %v884_v17, 0.0  ;;  %v1058_v23 = vmul.f32 0.2, %v884_v17  ;;  %vm1042_vm15 = vcmp.ge.f32.partialorder %v964_v18, 0.0 }
  0xfa   : > { %v1074_v24 = vmul.f32 0.2, %v964_v18  ;;  %6026 = vmatprep.subr.bf16.mxu1 %v6921_v16  ;;  %6090 = vmatprep.subr.bf16.mxu0 %v6921_v16  ;;  %v1091_v25 = vsel %vm1027_vm12, %v889_v11, %v1059_v21  ;;  %v899_v27 = vadd.f32 %v5705_v19, %v6899_v38  ;;  %v979_v28 = vadd.f32 %v5729_v20, %v6899_v38  ;;  %v973_v30 = vpop.f32.mrb[7].mxu1 }
  0xfb   : > { %v1107_v26 = vsel %vm1043_vm13, %v969_v12, %v1075_v22  ;;  %6028 = vmatpush3.bf16.msra.mxu1 %v6919_v15  ;;  %v1090_v31 = vsel %vm1026_vm14, %v884_v17, %v1058_v23  ;;  %v894_v33 = vadd.f32 %v6899_v38, %v893_v29  ;;  %v974_v34 = vadd.f32 %v6899_v38, %v973_v30  ;;  %v5708_v35 = vpop.f32.mrb[8].mxu0 }
  0xfc   : > { %v1106_v32 = vsel %vm1042_vm15, %v964_v18, %v1074_v24  ;;  %6092 = vmatpush3.bf16.msra.mxu0 %v6919_v15  ;;  %v5732_v36 = vpop.f32.mrb[8].mxu1  ;;  %v6933_v37 = vpack.c.bf16 %v1091_v25, %v1090_v31  ;;  %vm1029_vm1 = vcmp.ge.f32.partialorder %v899_v27, 0.0  ;;  %v1061_v40 = vmul.f32 0.2, %v899_v27  ;;  %v903_v41 = vpop.f32.mrb[9].mxu0 }
  0xfd   : > { %v6935_v39 = vpack.c.bf16 %v1107_v26, %v1106_v32  ;;  %v983_v42 = vpop.f32.mrb[9].mxu1  ;;  %vm1045_vm2 = vcmp.ge.f32.partialorder %v979_v28, 0.0  ;;  %v1077_v43 = vmul.f32 0.2, %v979_v28  ;;  %vm1028_vm3 = vcmp.ge.f32.partialorder %v894_v33, 0.0 }
  0xfe   : > { %v1060_v44 = vmul.f32 0.2, %v894_v33  ;;  %v1093_v45 = vsel %vm1029_vm1, %v899_v27, %v1061_v40  ;;  %vm1044_vm4 = vcmp.ge.f32.partialorder %v974_v34, 0.0  ;;  %v1076_v46 = vmul.f32 0.2, %v974_v34 }
  0xff   : > { %v909_v47 = vadd.f32 %v5708_v35, %v6899_v38  ;;  %6030 = vmatprep.subr.bf16.mxu1 %v6935_v39  ;;  %6094 = vmatprep.subr.bf16.mxu0 %v6935_v39  ;;  %v1109_v48 = vsel %vm1045_vm2, %v979_v28, %v1077_v43  ;;  %v989_v50 = vadd.f32 %v5732_v36, %v6899_v38  ;;  %v5711_v52 = vpop.f32.mrb[10].mxu0 }
 0x100   : > { %v1092_v49 = vsel %vm1028_vm3, %v894_v33, %v1060_v44  ;;  %v904_v51 = vadd.f32 %v6899_v38, %v903_v41  ;;  %6032 = vmatpush3.bf16.msra.mxu1 %v6933_v37  ;;  %v5735_v53 = vpop.f32.mrb[10].mxu1  ;;  %v1108_v55 = vsel %vm1044_vm4, %v974_v34, %v1076_v46  ;;  %6096 = vmatpush3.bf16.msra.mxu0 %v6933_v37  ;;  %v913_v57 = vpop.f32.mrb[11].mxu0 }
 0x101   : > { %v6943_v54 = vpack.c.bf16 %v1093_v45, %v1092_v49  ;;  %vm1031_vm5 = vcmp.ge.f32.partialorder %v909_v47, 0.0  ;;  %v1063_v56 = vmul.f32 0.2, %v909_v47  ;;  %v993_v58 = vpop.f32.mrb[11].mxu1  ;;  %v6946_v59 = vpack.c.bf16 %v1109_v48, %v1108_v55 }
 0x102   : > { %vm1047_vm6 = vcmp.ge.f32.partialorder %v989_v50, 0.0  ;;  %v1079_v60 = vmul.f32 0.2, %v989_v50  ;;  %vm1030_vm7 = vcmp.ge.f32.partialorder %v904_v51, 0.0  ;;  %v1062_v0 = vmul.f32 0.2, %v904_v51 }
 0x103   : > { %v1095_v63 = vsel %vm1031_vm5, %v909_v47, %v1063_v56  ;;  %v984_v1 = vadd.f32 %v6899_v38, %v983_v42  ;;  %v919_v2 = vadd.f32 %v5711_v52, %v6899_v38  ;;  %v999_v4 = vadd.f32 %v5735_v53, %v6899_v38  ;;  %6034 = vmatprep.subr.bf16.mxu1 %v6946_v59  ;;  %v5714_v7 = vpop.f32.mrb[12].mxu0 }
 0x104   : > { %v1111_v3 = vsel %vm1047_vm6, %v989_v50, %v1079_v60  ;;  %v914_v5 = vadd.f32 %v6899_v38, %v913_v57  ;;  %v994_v6 = vadd.f32 %v6899_v38, %v993_v58  ;;  %v5738_v8 = vpop.f32.mrb[12].mxu1  ;;  %v1094_v9 = vsel %vm1030_vm7, %v904_v51, %v1062_v0  ;;  %6098 = vmatprep.subr.bf16.mxu0 %v6946_v59  ;;  %v923_v11 = vpop.f32.mrb[13].mxu0 }
 0x105   : > { %vm1046_vm8 = vcmp.ge.f32.partialorder %v984_v1, 0.0  ;;  %v1078_v10 = vmul.f32 0.2, %v984_v1  ;;  %vm1033_vm9 = vcmp.ge.f32.partialorder %v919_v2, 0.0  ;;  %6036 = vmatpush3.bf16.msra.mxu1 %v6943_v54  ;;  %v1003_v12 = vpop.f32.mrb[13].mxu1  ;;  %v6956_v13 = vpack.c.bf16 %v1095_v63, %v1094_v9  ;;  %6100 = vmatpush3.bf16.msra.mxu0 %v6943_v54  ;;  %v4839_v9 = vld [vmem:[%s8685_s22 + $0x128] sm:$0xff] }
 0x106   : > { %v1065_v14 = vmul.f32 0.2, %v919_v2  ;;  %vm1049_vm10 = vcmp.ge.f32.partialorder %v999_v4, 0.0  ;;  %v1081_v17 = vmul.f32 0.2, %v999_v4  ;;  %vm1032_vm11 = vcmp.ge.f32.partialorder %v914_v5, 0.0 }
 0x107   : > { %v1110_v18 = vsel %vm1046_vm8, %v984_v1, %v1078_v10  ;;  %v1064_v19 = vmul.f32 0.2, %v914_v5  ;;  %vm1048_vm12 = vcmp.ge.f32.partialorder %v994_v6, 0.0  ;;  %v1080_v23 = vmul.f32 0.2, %v994_v6  ;;  %v5717_v24 = vpop.f32.mrb[14].mxu0 }
 0x108   : > { %v6959_v20 = vpack.c.bf16 %v1111_v3, %v1110_v18  ;;  %v1097_v21 = vsel %vm1033_vm9, %v919_v2, %v1065_v14  ;;  %v1113_v22 = vsel %vm1049_vm10, %v999_v4, %v1081_v17  ;;  %v5741_v25 = vpop.f32.mrb[14].mxu1  ;;  %v929_v27 = vadd.f32 %v5714_v7, %v6899_v38  ;;  %v933_v30 = vpop.f32.mrb[15].mxu0  ;;  %v1120_v2 = vld [vmem:[%s8685_s22] sm:$0xff]  ;;  %v1123_v4 = vld [vmem:[%s8685_s22 + $0x18] sm:$0xff]  ;;  %v4836_v7 = vld [vmem:[%s8685_s22 + $0x110] sm:$0xff] }
 0x109   : > { %v1096_v26 = vsel %vm1032_vm11, %v914_v5, %v1064_v19  ;;  %v1009_v28 = vadd.f32 %v5738_v8, %v6899_v38  ;;  %v924_v29 = vadd.f32 %v6899_v38, %v923_v11  ;;  %v1013_v31 = vpop.f32.mrb[15].mxu1  ;;  %v1112_v33 = vsel %vm1048_vm12, %v994_v6, %v1080_v23  ;;  %v4834_v3 = vld [vmem:[%s8685_s22 + $0x100] sm:$0xff]  ;;  %v4837_v5 = vld [vmem:[%s8685_s22 + $0x118] sm:$0xff]  ;;  %v1122_v6 = vld [vmem:[%s8685_s22 + $0x10] sm:$0xff] }
 0x10a   : > { %v6964_v32 = vpack.c.bf16 %v1097_v21, %v1096_v26  ;;  %v1004_v34 = vadd.f32 %v6899_v38, %v1003_v12  ;;  %6038 = vmatprep.subr.bf16.mxu1 %v6959_v20  ;;  %6102 = vmatprep.subr.bf16.mxu0 %v6959_v20  ;;  %v6969_v35 = vpack.c.bf16 %v1113_v22, %v1112_v33  ;;  %vm1035_vm13 = vcmp.ge.f32.partialorder %v929_v27, 0.0  ;;  %v1125_v8 = vld [vmem:[%s8685_s22 + $0x28] sm:$0xff]  ;;  %v1124_v10 = vld [vmem:[%s8685_s22 + $0x20] sm:$0xff]  ;;  %v1127_v12 = vld [vmem:[%s8685_s22 + $0x38] sm:$0xff] }
 0x10b   : > { %v1067_v36 = vmul.f32 0.2, %v929_v27  ;;  %vm1051_vm14 = vcmp.ge.f32.partialorder %v1009_v28, 0.0  ;;  %6040 = vmatpush3.bf16.msra.mxu1 %v6956_v13  ;;  %6104 = vmatpush3.bf16.msra.mxu0 %v6956_v13  ;;  %v1083_v40 = vmul.f32 0.2, %v1009_v28  ;;  %vm1034_vm15 = vcmp.ge.f32.partialorder %v924_v29, 0.0 }
 0x10c   : > { %v1066_v41 = vmul.f32 0.2, %v924_v29  ;;  %vm1050_vm1 = vcmp.ge.f32.partialorder %v1004_v34, 0.0  ;;  %v1082_v43 = vmul.f32 0.2, %v1004_v34  ;;  %v939_v44 = vadd.f32 %v5717_v24, %v6899_v38  ;;  %6042 = vmatprep.subr.bf16.mxu1 %v6969_v35  ;;  %6106 = vmatprep.subr.bf16.mxu0 %v6969_v35  ;;  %v4838_v11 = vld [vmem:[%s8685_s22 + $0x120] sm:$0xff] }
 0x10d   : > { %v1099_v42 = vsel %vm1035_vm13, %v929_v27, %v1067_v36  ;;  %v1019_v45 = vadd.f32 %v5741_v25, %v6899_v38  ;;  %v1115_v46 = vsel %vm1051_vm14, %v1009_v28, %v1083_v40  ;;  %v934_v48 = vadd.f32 %v6899_v38, %v933_v30  ;;  %v4841_v14 = vld [vmem:[%s8685_s22 + $0x138] sm:$0xff]  ;;  %v1126_v17 = vld [vmem:[%s8685_s22 + $0x30] sm:$0xff]  ;;  %v1129_v19 = vld [vmem:[%s8685_s22 + $0x48] sm:$0xff] }
 0x10e   : > { %v1098_v47 = vsel %vm1034_vm15, %v924_v29, %v1066_v41  ;;  %v1014_v49 = vadd.f32 %v6899_v38, %v1013_v31  ;;  %v1114_v51 = vsel %vm1050_vm1, %v1004_v34, %v1082_v43  ;;  %vm1037_vm2 = vcmp.ge.f32.partialorder %v939_v44, 0.0  ;;  %v4840_v18 = vld [vmem:[%s8685_s22 + $0x130] sm:$0xff]  ;;  %v4843_v21 = vld [vmem:[%s8685_s22 + $0x148] sm:$0xff]  ;;  %v1128_v22 = vld [vmem:[%s8685_s22 + $0x40] sm:$0xff] }
 0x10f   : > { %v6979_v50 = vpack.c.bf16 %v1099_v42, %v1098_v47  ;;  %v1069_v52 = vmul.f32 0.2, %v939_v44  ;;  %6044 = vmatpush3.bf16.msra.mxu1 %v6964_v32  ;;  %6108 = vmatpush3.bf16.msra.mxu0 %v6964_v32  ;;  %v6983_v53 = vpack.c.bf16 %v1115_v46, %v1114_v51  ;;  %vm1053_vm3 = vcmp.ge.f32.partialorder %v1019_v45, 0.0  ;;  %v4842_v23 = vld [vmem:[%s8685_s22 + $0x140] sm:$0xff]  ;;  %v1131_v24 = vld [vmem:[%s8685_s22 + $0x58] sm:$0xff]  ;;  %v1130_v26 = vld [vmem:[%s8685_s22 + $0x50] sm:$0xff] }
 0x110   : > { %v1085_v55 = vmul.f32 0.2, %v1019_v45  ;;  %vm1036_vm4 = vcmp.ge.f32.partialorder %v934_v48, 0.0  ;;  %v1068_v57 = vmul.f32 0.2, %v934_v48  ;;  %vm1052_vm5 = vcmp.ge.f32.partialorder %v1014_v49, 0.0 }
 0x111   : > { %v1101_v56 = vsel %vm1037_vm2, %v939_v44, %v1069_v52  ;;  %v1084_v58 = vmul.f32 0.2, %v1014_v49  ;;  %6046 = vmatprep.subr.bf16.mxu1 %v6983_v53  ;;  %6110 = vmatprep.subr.bf16.mxu0 %v6983_v53  ;;  %v4845_v25 = vld [vmem:[%s8685_s22 + $0x158] sm:$0xff]  ;;  %v4844_v27 = vld [vmem:[%s8685_s22 + $0x150] sm:$0xff]  ;;  %v1133_v28 = vld [vmem:[%s8685_s22 + $0x68] sm:$0xff]  ;;  %vm2425_vm6 = vcmask 261120  }
 0x112   : > { %v1117_v60 = vsel %vm1053_vm3, %v1019_v45, %v1085_v55  ;;  %v1100_v38 = vsel %vm1036_vm4, %v934_v48, %v1068_v57  ;;  %v4847_v29 = vld [vmem:[%s8685_s22 + $0x168] sm:$0xff]  ;;  %v1132_v30 = vld [vmem:[%s8685_s22 + $0x60] sm:$0xff]  ;;  %v1135_v33 = vld [vmem:[%s8685_s22 + $0x78] sm:$0xff]  ;;  %vm2583_vm15 = vcmask 523264  }
 0x113   : > { %v1116_v63 = vsel %vm1052_vm5, %v1014_v49, %v1084_v58  ;;  %6048 = vmatpush3.bf16.msra.mxu1 %v6979_v50  ;;  %6112 = vmatpush3.bf16.msra.mxu0 %v6979_v50  ;;  %v6989_v0 = vpack.c.bf16 %v1101_v56, %v1100_v38  ;;  %v4846_v31 = vld [vmem:[%s8685_s22 + $0x160] sm:$0xff]  ;;  %v4849_v34 = vld [vmem:[%s8685_s22 + $0x178] sm:$0xff]  ;;  %v1134_v36 = vld [vmem:[%s8685_s22 + $0x70] sm:$0xff] }
 0x114   : > { %v6991_v1 = vpack.c.bf16 %v1117_v60, %v1116_v63  ;;  %v4848_v40 = vld [vmem:[%s8685_s22 + $0x170] sm:$0xff]  ;;  %v4819_v41 = vld [vmem:[%s8685_s22 + $0x88] sm:$0xff]  ;;  %v4818_v43 = vld [vmem:[%s8685_s22 + $0x80] sm:$0xff] }
 0x115   : > { %v4867_v42 = vld [vmem:[%s8685_s22 + $0x208] sm:$0xff]  ;;  %v4866_v44 = vld [vmem:[%s8685_s22 + $0x200] sm:$0xff]  ;;  %v4821_v45 = vld [vmem:[%s8685_s22 + $0x98] sm:$0xff] }
 0x116   : > { %6050 = vmatprep.subr.bf16.mxu1 %v6991_v1  ;;  %6114 = vmatprep.subr.bf16.mxu0 %v6991_v1  ;;  %v4869_v46 = vld [vmem:[%s8685_s22 + $0x218] sm:$0xff]  ;;  %v4820_v47 = vld [vmem:[%s8685_s22 + $0x90] sm:$0xff]  ;;  %v4823_v49 = vld [vmem:[%s8685_s22 + $0xa8] sm:$0xff] }
 0x117   : > { %6052 = vmatpush3.bf16.msra.mxu1 %v6989_v0  ;;  %6116 = vmatpush3.bf16.msra.mxu0 %v6989_v0  ;;  %v4868_v48 = vld [vmem:[%s8685_s22 + $0x210] sm:$0xff]  ;;  %v4871_v51 = vld [vmem:[%s8685_s22 + $0x228] sm:$0xff]  ;;  %v4822_v52 = vld [vmem:[%s8685_s22 + $0xa0] sm:$0xff] }
 0x118   : > { %6054 = vmatprep.subr.bf16.mxu1 %v6909_v62  ;;  %6150 = vmatprep.subr.bf16.mxu0 %v6909_v62  ;;  %v4870_v55 = vld [vmem:[%s8685_s22 + $0x220] sm:$0xff]  ;;  %v4825_v56 = vld [vmem:[%s8685_s22 + $0xb8] sm:$0xff]  ;;  %v4824_v58 = vld [vmem:[%s8685_s22 + $0xb0] sm:$0xff] }
 0x119   : > { %v4873_v57 = vld [vmem:[%s8685_s22 + $0x238] sm:$0xff]  ;;  %v4872_v60 = vld [vmem:[%s8685_s22 + $0x230] sm:$0xff]  ;;  %v4827_v38 = vld [vmem:[%s8685_s22 + $0xc8] sm:$0xff] }
 0x11a   : > { %1201 = vmatmul.mubr.f32.vlgmr.msra.gmra.mrb[16].mxu1 %v1120_v2  ;;  %1485 = vmatmul.mubr.f32.vlgmr.msra.gmra.mrb[16].mxu0 %v4834_v3  ;;  %v4875_v63 = vld [vmem:[%s8685_s22 + $0x248] sm:$0xff]  ;;  %v4826_v2 = vld [vmem:[%s8685_s22 + $0xc0] sm:$0xff] }
 0x11b   : > { %6056 = vmatpush3.bf16.msra.mxu1 %v6907_v61  ;;  %6152 = vmatpush3.bf16.msra.mxu0 %v6907_v61  ;;  %v4874_v3 = vld [vmem:[%s8685_s22 + $0x240] sm:$0xff] }
 0x11c   : > { %6058 = vmatprep.subr.bf16.mxu1 %v6921_v16  ;;  %6154 = vmatprep.subr.bf16.mxu0 %v6921_v16 }
 0x11d   : > { %1205 = vmatprep.mubr.f32.mxu1 %v1123_v4  ;;  %1489 = vmatprep.mubr.f32.mxu0 %v4837_v5  ;;  %v4829_v4 = vld [vmem:[%s8685_s22 + $0xd8] sm:$0xff] }
 0x11e   : > { %1206 = vmatmul.mubr.f32.gmra.mrb[18].mxu1 %v1122_v6  ;;  %1490 = vmatmul.mubr.f32.gmra.mrb[18].mxu0 %v4836_v7  ;;  %v4877_v5 = vld [vmem:[%s8685_s22 + $0x258] sm:$0xff]  ;;  %v4828_v6 = vld [vmem:[%s8685_s22 + $0xd0] sm:$0xff] }
 0x11f   : > { %6060 = vmatpush3.bf16.msra.mxu1 %v6919_v15  ;;  %6156 = vmatpush3.bf16.msra.mxu0 %v6919_v15  ;;  %v4876_v7 = vld [vmem:[%s8685_s22 + $0x250] sm:$0xff] }
 0x120   : > { %6062 = vmatprep.subr.bf16.mxu1 %v6935_v39  ;;  %6158 = vmatprep.subr.bf16.mxu0 %v6935_v39 }
 0x121   : > { %1210 = vmatprep.mubr.f32.mxu1 %v1125_v8  ;;  %1494 = vmatprep.mubr.f32.mxu0 %v4839_v9  ;;  %v4831_v8 = vld [vmem:[%s8685_s22 + $0xe8] sm:$0xff] }
 0x122   : > { %1211 = vmatmul.mubr.f32.gmra.mrb[20].mxu1 %v1124_v10  ;;  %1495 = vmatmul.mubr.f32.gmra.mrb[20].mxu0 %v4838_v11  ;;  %v4879_v9 = vld [vmem:[%s8685_s22 + $0x268] sm:$0xff]  ;;  %v4830_v10 = vld [vmem:[%s8685_s22 + $0xe0] sm:$0xff] }
 0x123   : > { %6064 = vmatpush3.bf16.msra.mxu1 %v6933_v37  ;;  %6160 = vmatpush3.bf16.msra.mxu0 %v6933_v37  ;;  %v4878_v11 = vld [vmem:[%s8685_s22 + $0x260] sm:$0xff] }
 0x124   : > { %6066 = vmatprep.subr.bf16.mxu1 %v6946_v59  ;;  %6162 = vmatprep.subr.bf16.mxu0 %v6946_v59 }
 0x125   : > { %1215 = vmatprep.mubr.f32.mxu1 %v1127_v12  ;;  %1499 = vmatprep.mubr.f32.mxu0 %v4841_v14  ;;  %v4833_v12 = vld [vmem:[%s8685_s22 + $0xf8] sm:$0xff] }
 0x126   : > { %1216 = vmatmul.mubr.f32.gmra.mrb[22].mxu1 %v1126_v17  ;;  %1500 = vmatmul.mubr.f32.gmra.mrb[22].mxu0 %v4840_v18  ;;  %v4881_v14 = vld [vmem:[%s8685_s22 + $0x278] sm:$0xff]  ;;  %v4832_v17 = vld [vmem:[%s8685_s22 + $0xf0] sm:$0xff] }
 0x127   : > { %6068 = vmatpush3.bf16.msra.mxu1 %v6943_v54  ;;  %6164 = vmatpush3.bf16.msra.mxu0 %v6943_v54  ;;  %v4880_v18 = vld [vmem:[%s8685_s22 + $0x270] sm:$0xff] }
 0x128   : > { %6070 = vmatprep.subr.bf16.mxu1 %v6959_v20  ;;  %6166 = vmatprep.subr.bf16.mxu0 %v6959_v20 }
 0x129   : > { %1220 = vmatprep.mubr.f32.mxu1 %v1129_v19  ;;  %1504 = vmatprep.mubr.f32.mxu0 %v4843_v21  ;;  %v4851_v19 = vld [vmem:[%s8685_s22 + $0x188] sm:$0xff] }
 0x12a   : > { %1221 = vmatmul.mubr.f32.gmra.mrb[24].mxu1 %v1128_v22  ;;  %1505 = vmatmul.mubr.f32.gmra.mrb[24].mxu0 %v4842_v23  ;;  %v4899_v21 = vld [vmem:[%s8685_s22 + $0x308] sm:$0xff]  ;;  %v4850_v22 = vld [vmem:[%s8685_s22 + $0x180] sm:$0xff] }
 0x12b   : > { %6072 = vmatpush3.bf16.msra.mxu1 %v6956_v13  ;;  %6168 = vmatpush3.bf16.msra.mxu0 %v6956_v13  ;;  %v4898_v23 = vld [vmem:[%s8685_s22 + $0x300] sm:$0xff] }
 0x12c   : > { %6074 = vmatprep.subr.bf16.mxu1 %v6969_v35  ;;  %6170 = vmatprep.subr.bf16.mxu0 %v6969_v35 }
 0x12d   : > { %1225 = vmatprep.mubr.f32.mxu1 %v1131_v24  ;;  %1509 = vmatprep.mubr.f32.mxu0 %v4845_v25  ;;  %v4853_v24 = vld [vmem:[%s8685_s22 + $0x198] sm:$0xff] }
 0x12e   : > { %1226 = vmatmul.mubr.f32.gmra.mrb[26].mxu1 %v1130_v26  ;;  %1510 = vmatmul.mubr.f32.gmra.mrb[26].mxu0 %v4844_v27  ;;  %v4901_v25 = vld [vmem:[%s8685_s22 + $0x318] sm:$0xff]  ;;  %v4852_v26 = vld [vmem:[%s8685_s22 + $0x190] sm:$0xff] }
 0x12f   : > { %6076 = vmatpush3.bf16.msra.mxu1 %v6964_v32  ;;  %6172 = vmatpush3.bf16.msra.mxu0 %v6964_v32  ;;  %v4900_v27 = vld [vmem:[%s8685_s22 + $0x310] sm:$0xff] }
 0x130   : > { %6078 = vmatprep.subr.bf16.mxu1 %v6983_v53  ;;  %6174 = vmatprep.subr.bf16.mxu0 %v6983_v53 }
 0x131   : > { %1230 = vmatprep.mubr.f32.mxu1 %v1133_v28  ;;  %1514 = vmatprep.mubr.f32.mxu0 %v4847_v29  ;;  %v4855_v28 = vld [vmem:[%s8685_s22 + $0x1a8] sm:$0xff] }
 0x132   : > { %1231 = vmatmul.mubr.f32.gmra.mrb[28].mxu1 %v1132_v30  ;;  %1515 = vmatmul.mubr.f32.gmra.mrb[28].mxu0 %v4846_v31  ;;  %v4903_v29 = vld [vmem:[%s8685_s22 + $0x328] sm:$0xff]  ;;  %v4854_v30 = vld [vmem:[%s8685_s22 + $0x1a0] sm:$0xff] }
 0x133   : > { %6080 = vmatpush3.bf16.msra.mxu1 %v6979_v50  ;;  %6176 = vmatpush3.bf16.msra.mxu0 %v6979_v50  ;;  %v4902_v31 = vld [vmem:[%s8685_s22 + $0x320] sm:$0xff] }
 0x134   : > { %6082 = vmatprep.subr.bf16.mxu1 %v6991_v1  ;;  %6178 = vmatprep.subr.bf16.mxu0 %v6991_v1 }
 0x135   : > { %1235 = vmatprep.mubr.f32.mxu1 %v1135_v33  ;;  %1519 = vmatprep.mubr.f32.mxu0 %v4849_v34  ;;  %v4857_v33 = vld [vmem:[%s8685_s22 + $0x1b8] sm:$0xff] }
 0x136   : > { %1236 = vmatmul.mubr.f32.gmra.mrb[30].mxu1 %v1134_v36  ;;  %1520 = vmatmul.mubr.f32.gmra.mrb[30].mxu0 %v4848_v40  ;;  %v4905_v34 = vld [vmem:[%s8685_s22 + $0x338] sm:$0xff]  ;;  %v4856_v36 = vld [vmem:[%s8685_s22 + $0x1b0] sm:$0xff] }
 0x137   : > { %6084 = vmatpush3.bf16.msra.mxu1 %v6989_v0  ;;  %6180 = vmatpush3.bf16.msra.mxu0 %v6989_v0  ;;  %v4904_v40 = vld [vmem:[%s8685_s22 + $0x330] sm:$0xff] }
 0x138   : > { %6118 = vmatprep.subr.bf16.mxu1 %v6909_v62  ;;  %6214 = vmatprep.subr.bf16.mxu0 %v6909_v62 }
 0x139   : > { %1342 = vmatprep.mubr.f32.mxu1 %v4819_v41  ;;  %1768 = vmatprep.mubr.f32.mxu0 %v4867_v42  ;;  %v4859_v41 = vld [vmem:[%s8685_s22 + $0x1c8] sm:$0xff] }
 0x13a   : > { %1343 = vmatmul.mubr.f32.vlgmr.msra.gmra.mrb[32].mxu1 %v4818_v43  ;;  %1769 = vmatmul.mubr.f32.vlgmr.msra.gmra.mrb[32].mxu0 %v4866_v44  ;;  %v4907_v42 = vld [vmem:[%s8685_s22 + $0x348] sm:$0xff]  ;;  %v4858_v43 = vld [vmem:[%s8685_s22 + $0x1c0] sm:$0xff] }
 0x13b   : > { %6120 = vmatpush3.bf16.msra.mxu1 %v6907_v61  ;;  %6216 = vmatpush3.bf16.msra.mxu0 %v6907_v61  ;;  %v4906_v44 = vld [vmem:[%s8685_s22 + $0x340] sm:$0xff] }
 0x13c   : > { %6122 = vmatprep.subr.bf16.mxu1 %v6921_v16  ;;  %6218 = vmatprep.subr.bf16.mxu0 %v6921_v16 }
 0x13d   : > { %1347 = vmatprep.mubr.f32.mxu1 %v4821_v45  ;;  %1773 = vmatprep.mubr.f32.mxu0 %v4869_v46  ;;  %v4861_v45 = vld [vmem:[%s8685_s22 + $0x1d8] sm:$0xff] }
 0x13e   : > { %1348 = vmatmul.mubr.f32.gmra.mrb[34].mxu1 %v4820_v47  ;;  %1774 = vmatmul.mubr.f32.gmra.mrb[34].mxu0 %v4868_v48  ;;  %v4909_v46 = vld [vmem:[%s8685_s22 + $0x358] sm:$0xff]  ;;  %v4860_v47 = vld [vmem:[%s8685_s22 + $0x1d0] sm:$0xff] }
 0x13f   : > { %6124 = vmatpush3.bf16.msra.mxu1 %v6919_v15  ;;  %6220 = vmatpush3.bf16.msra.mxu0 %v6919_v15  ;;  %v4908_v48 = vld [vmem:[%s8685_s22 + $0x350] sm:$0xff] }
 0x140   : > { %6126 = vmatprep.subr.bf16.mxu1 %v6935_v39  ;;  %6222 = vmatprep.subr.bf16.mxu0 %v6935_v39 }
 0x141   : > { %1352 = vmatprep.mubr.f32.mxu1 %v4823_v49  ;;  %1778 = vmatprep.mubr.f32.mxu0 %v4871_v51  ;;  %v4863_v49 = vld [vmem:[%s8685_s22 + $0x1e8] sm:$0xff] }
 0x142   : > { %1353 = vmatmul.mubr.f32.gmra.mrb[36].mxu1 %v4822_v52  ;;  %1779 = vmatmul.mubr.f32.gmra.mrb[36].mxu0 %v4870_v55  ;;  %v4911_v51 = vld [vmem:[%s8685_s22 + $0x368] sm:$0xff]  ;;  %v4862_v52 = vld [vmem:[%s8685_s22 + $0x1e0] sm:$0xff] }
 0x143   : > { %6128 = vmatpush3.bf16.msra.mxu1 %v6933_v37  ;;  %6224 = vmatpush3.bf16.msra.mxu0 %v6933_v37  ;;  %v4910_v55 = vld [vmem:[%s8685_s22 + $0x360] sm:$0xff] }
 0x144   : > { %6130 = vmatprep.subr.bf16.mxu1 %v6946_v59  ;;  %6226 = vmatprep.subr.bf16.mxu0 %v6946_v59 }
 0x145   : > { %1357 = vmatprep.mubr.f32.mxu1 %v4825_v56  ;;  %1783 = vmatprep.mubr.f32.mxu0 %v4873_v57  ;;  %v4865_v56 = vld [vmem:[%s8685_s22 + $0x1f8] sm:$0xff] }
 0x146   : > { %1358 = vmatmul.mubr.f32.gmra.mrb[38].mxu1 %v4824_v58  ;;  %1784 = vmatmul.mubr.f32.gmra.mrb[38].mxu0 %v4872_v60  ;;  %v4913_v57 = vld [vmem:[%s8685_s22 + $0x378] sm:$0xff]  ;;  %v4864_v58 = vld [vmem:[%s8685_s22 + $0x1f0] sm:$0xff] }
 0x147   : > { %6132 = vmatpush3.bf16.msra.mxu1 %v6943_v54  ;;  %6228 = vmatpush3.bf16.msra.mxu0 %v6943_v54  ;;  %v4912_v60 = vld [vmem:[%s8685_s22 + $0x370] sm:$0xff] }
 0x148   : > { %6134 = vmatprep.subr.bf16.mxu1 %v6959_v20  ;;  %6230 = vmatprep.subr.bf16.mxu0 %v6959_v20 }
 0x149   : > { %1362 = vmatprep.mubr.f32.mxu1 %v4827_v38  ;;  %1788 = vmatprep.mubr.f32.mxu0 %v4875_v63  ;;  %v4883_v38 = vld [vmem:[%s8685_s22 + $0x288] sm:$0xff] }
 0x14a   : > { %1363 = vmatmul.mubr.f32.gmra.mrb[40].mxu1 %v4826_v2  ;;  %1789 = vmatmul.mubr.f32.gmra.mrb[40].mxu0 %v4874_v3  ;;  %v4931_v63 = vld [vmem:[%s8685_s22 + $0x408] sm:$0xff]  ;;  %v4882_v2 = vld [vmem:[%s8685_s22 + $0x280] sm:$0xff] }
 0x14b   : > { %6136 = vmatpush3.bf16.msra.mxu1 %v6956_v13  ;;  %6232 = vmatpush3.bf16.msra.mxu0 %v6956_v13  ;;  %v4930_v3 = vld [vmem:[%s8685_s22 + $0x400] sm:$0xff] }
 0x14c   : > { %6138 = vmatprep.subr.bf16.mxu1 %v6969_v35  ;;  %6234 = vmatprep.subr.bf16.mxu0 %v6969_v35 }
 0x14d   : > { %1367 = vmatprep.mubr.f32.mxu1 %v4829_v4  ;;  %1793 = vmatprep.mubr.f32.mxu0 %v4877_v5  ;;  %v4885_v4 = vld [vmem:[%s8685_s22 + $0x298] sm:$0xff] }
 0x14e   : > { %1368 = vmatmul.mubr.f32.gmra.mrb[42].mxu1 %v4828_v6  ;;  %1794 = vmatmul.mubr.f32.gmra.mrb[42].mxu0 %v4876_v7  ;;  %v4933_v5 = vld [vmem:[%s8685_s22 + $0x418] sm:$0xff]  ;;  %v4884_v6 = vld [vmem:[%s8685_s22 + $0x290] sm:$0xff]  ;;  %v4887_v7 = vld [vmem:[%s8685_s22 + $0x2a8] sm:$0xff] }
 0x14f   : > { %6140 = vmatpush3.bf16.msra.mxu1 %v6964_v32  ;;  %6236 = vmatpush3.bf16.msra.mxu0 %v6964_v32 }
 0x150   : > { %6142 = vmatprep.subr.bf16.mxu1 %v6983_v53  ;;  %6238 = vmatprep.subr.bf16.mxu0 %v6983_v53 }
 0x151   : > { %1372 = vmatprep.mubr.f32.mxu1 %v4831_v8  ;;  %1798 = vmatprep.mubr.f32.mxu0 %v4879_v9  ;;  %v4886_v8 = vld [vmem:[%s8685_s22 + $0x2a0] sm:$0xff]  ;;  %v4889_v9 = vld [vmem:[%s8685_s22 + $0x2b8] sm:$0xff] }
 0x152   : > { %1373 = vmatmul.mubr.f32.gmra.mrb[44].mxu1 %v4830_v10  ;;  %1799 = vmatmul.mubr.f32.gmra.mrb[44].mxu0 %v4878_v11  ;;  %v4888_v10 = vld [vmem:[%s8685_s22 + $0x2b0] sm:$0xff]  ;;  %v4891_v11 = vld [vmem:[%s8685_s22 + $0x2c8] sm:$0xff] }
 0x153   : > { %6144 = vmatpush3.bf16.msra.mxu1 %v6979_v50  ;;  %6240 = vmatpush3.bf16.msra.mxu0 %v6979_v50 }
 0x154   : > { %6146 = vmatprep.subr.bf16.mxu1 %v6991_v1  ;;  %6242 = vmatprep.subr.bf16.mxu0 %v6991_v1 }
 0x155   : > { %1377 = vmatprep.mubr.f32.mxu1 %v4833_v12  ;;  %1803 = vmatprep.mubr.f32.mxu0 %v4881_v14  ;;  %v4890_v12 = vld [vmem:[%s8685_s22 + $0x2c0] sm:$0xff]  ;;  %v4893_v14 = vld [vmem:[%s8685_s22 + $0x2d8] sm:$0xff] }
 0x156   : > { %1378 = vmatmul.mubr.f32.gmra.mrb[46].mxu1 %v4832_v17  ;;  %1804 = vmatmul.mubr.f32.gmra.mrb[46].mxu0 %v4880_v18  ;;  %v4892_v17 = vld [vmem:[%s8685_s22 + $0x2d0] sm:$0xff]  ;;  %v4895_v18 = vld [vmem:[%s8685_s22 + $0x2e8] sm:$0xff] }
 0x157   : > { %6148 = vmatpush3.bf16.msra.mxu1 %v6989_v0  ;;  %6244 = vmatpush3.bf16.msra.mxu0 %v6989_v0 }
 0x158   : > { %6182 = vmatprep.subr.bf16.mxu1 %v6909_v62  ;;  %6278 = vmatprep.subr.bf16.mxu0 %v6909_v62 }
 0x159   : > { %1626 = vmatprep.mubr.f32.mxu1 %v4851_v19  ;;  %2052 = vmatprep.mubr.f32.mxu0 %v4899_v21  ;;  %v4894_v19 = vld [vmem:[%s8685_s22 + $0x2e0] sm:$0xff]  ;;  %v4897_v21 = vld [vmem:[%s8685_s22 + $0x2f8] sm:$0xff] }
 0x15a   : > { %1627 = vmatmul.mubr.f32.vlgmr.msra.gmra.mrb[48].mxu1 %v4850_v22  ;;  %2053 = vmatmul.mubr.f32.vlgmr.msra.gmra.mrb[48].mxu0 %v4898_v23  ;;  %v4896_v22 = vld [vmem:[%s8685_s22 + $0x2f0] sm:$0xff]  ;;  %v4915_v23 = vld [vmem:[%s8685_s22 + $0x388] sm:$0xff] }
 0x15b   : > { %6184 = vmatpush3.bf16.msra.mxu1 %v6907_v61  ;;  %6280 = vmatpush3.bf16.msra.mxu0 %v6907_v61 }
 0x15c   : > { %6186 = vmatprep.subr.bf16.mxu1 %v6921_v16  ;;  %6282 = vmatprep.subr.bf16.mxu0 %v6921_v16 }
 0x15d   : > { %1631 = vmatprep.mubr.f32.mxu1 %v4853_v24  ;;  %2057 = vmatprep.mubr.f32.mxu0 %v4901_v25  ;;  %v4917_v24 = vld [vmem:[%s8685_s22 + $0x398] sm:$0xff]  ;;  %v4919_v25 = vld [vmem:[%s8685_s22 + $0x3a8] sm:$0xff] }
 0x15e   : > { %1632 = vmatmul.mubr.f32.gmra.mrb[50].mxu1 %v4852_v26  ;;  %2058 = vmatmul.mubr.f32.gmra.mrb[50].mxu0 %v4900_v27  ;;  %v4921_v26 = vld [vmem:[%s8685_s22 + $0x3b8] sm:$0xff]  ;;  %v4920_v27 = vld [vmem:[%s8685_s22 + $0x3b0] sm:$0xff] }
 0x15f   : > { %6188 = vmatpush3.bf16.msra.mxu1 %v6919_v15  ;;  %6284 = vmatpush3.bf16.msra.mxu0 %v6919_v15 }
 0x160   : > { %6190 = vmatprep.subr.bf16.mxu1 %v6935_v39  ;;  %6286 = vmatprep.subr.bf16.mxu0 %v6935_v39 }
 0x161   : > { %1636 = vmatprep.mubr.f32.mxu1 %v4855_v28  ;;  %2062 = vmatprep.mubr.f32.mxu0 %v4903_v29  ;;  %v4923_v28 = vld [vmem:[%s8685_s22 + $0x3c8] sm:$0xff]  ;;  %v4922_v29 = vld [vmem:[%s8685_s22 + $0x3c0] sm:$0xff] }
 0x162   : > { %1637 = vmatmul.mubr.f32.gmra.mrb[52].mxu1 %v4854_v30  ;;  %2063 = vmatmul.mubr.f32.gmra.mrb[52].mxu0 %v4902_v31  ;;  %v4925_v30 = vld [vmem:[%s8685_s22 + $0x3d8] sm:$0xff]  ;;  %v4924_v31 = vld [vmem:[%s8685_s22 + $0x3d0] sm:$0xff] }
 0x163   : > { %6192 = vmatpush3.bf16.msra.mxu1 %v6933_v37  ;;  %6288 = vmatpush3.bf16.msra.mxu0 %v6933_v37 }
 0x164   : > { %6194 = vmatprep.subr.bf16.mxu1 %v6946_v59  ;;  %6290 = vmatprep.subr.bf16.mxu0 %v6946_v59 }
 0x165   : > { %1641 = vmatprep.mubr.f32.mxu1 %v4857_v33  ;;  %2067 = vmatprep.mubr.f32.mxu0 %v4905_v34  ;;  %v4927_v33 = vld [vmem:[%s8685_s22 + $0x3e8] sm:$0xff]  ;;  %v4926_v34 = vld [vmem:[%s8685_s22 + $0x3e0] sm:$0xff] }
 0x166   : > { %1642 = vmatmul.mubr.f32.gmra.mrb[54].mxu1 %v4856_v36  ;;  %2068 = vmatmul.mubr.f32.gmra.mrb[54].mxu0 %v4904_v40  ;;  %v4929_v36 = vld [vmem:[%s8685_s22 + $0x3f8] sm:$0xff]  ;;  %v4928_v40 = vld [vmem:[%s8685_s22 + $0x3f0] sm:$0xff] }
 0x167   : > { %6196 = vmatpush3.bf16.msra.mxu1 %v6943_v54  ;;  %6292 = vmatpush3.bf16.msra.mxu0 %v6943_v54 }
 0x168   : > { %6198 = vmatprep.subr.bf16.mxu1 %v6959_v20  ;;  %6294 = vmatprep.subr.bf16.mxu0 %v6959_v20 }
 0x169   : > { %1646 = vmatprep.mubr.f32.mxu1 %v4859_v41  ;;  %2072 = vmatprep.mubr.f32.mxu0 %v4907_v42 }
 0x16a   : > { %1647 = vmatmul.mubr.f32.gmra.mrb[56].mxu1 %v4858_v43  ;;  %2073 = vmatmul.mubr.f32.gmra.mrb[56].mxu0 %v4906_v44 }
 0x16b   : > { %6200 = vmatpush3.bf16.msra.mxu1 %v6956_v13  ;;  %6296 = vmatpush3.bf16.msra.mxu0 %v6956_v13 }
 0x16c   : > { %6202 = vmatprep.subr.bf16.mxu1 %v6969_v35  ;;  %6298 = vmatprep.subr.bf16.mxu0 %v6969_v35 }
 0x16d   : > { %1651 = vmatprep.mubr.f32.mxu1 %v4861_v45  ;;  %2077 = vmatprep.mubr.f32.mxu0 %v4909_v46 }
 0x16e   : > { %1652 = vmatmul.mubr.f32.gmra.mrb[58].mxu1 %v4860_v47  ;;  %2078 = vmatmul.mubr.f32.gmra.mrb[58].mxu0 %v4908_v48 }
 0x16f   : > { %6204 = vmatpush3.bf16.msra.mxu1 %v6964_v32  ;;  %6300 = vmatpush3.bf16.msra.mxu0 %v6964_v32 }
 0x170   : > { %6206 = vmatprep.subr.bf16.mxu1 %v6983_v53  ;;  %6302 = vmatprep.subr.bf16.mxu0 %v6983_v53 }
 0x171   : > { %1656 = vmatprep.mubr.f32.mxu1 %v4863_v49  ;;  %2082 = vmatprep.mubr.f32.mxu0 %v4911_v51  ;;  %v2421_v49 = vld [vmem:[%s8687_s20] sm:$0xff]  ;;  %v2422_v51 = vld [vmem:[%s8687_s20 + $0x8] sm:$0xff] }
 0x172   : > { %1657 = vmatmul.mubr.f32.gmra.mrb[60].mxu1 %v4862_v52  ;;  %2083 = vmatmul.mubr.f32.gmra.mrb[60].mxu0 %v4910_v55 }
 0x173   : > { %6208 = vmatpush3.bf16.msra.mxu1 %v6979_v50  ;;  %6304 = vmatpush3.bf16.msra.mxu0 %v6979_v50 }
 0x174   : > { %6210 = vmatprep.subr.bf16.mxu1 %v6991_v1  ;;  %6306 = vmatprep.subr.bf16.mxu0 %v6991_v1 }
 0x175   : > { %1661 = vmatprep.mubr.f32.mxu1 %v4865_v56  ;;  %2087 = vmatprep.mubr.f32.mxu0 %v4913_v57  ;;  %v6309_v56 = vpack.c.bf16 %v2422_v51, %v2421_v49 }
 0x176   : > { %1662 = vmatmul.mubr.f32.gmra.mrb[62].mxu1 %v4864_v58  ;;  %2088 = vmatmul.mubr.f32.gmra.mrb[62].mxu0 %v4912_v60 }
 0x177   : > { %6212 = vmatpush3.bf16.msra.mxu1 %v6989_v0  ;;  %6308 = vmatpush3.bf16.msra.mxu0 %v6989_v0 }
 0x178   : > { %6246 = vmatprep.subr.bf16.mxu1 %v6909_v62  ;;  %1910 = vmatprep.mubr.f32.mxu1 %v4883_v38  ;;  %v4932_v62 = vld [vmem:[%s8685_s22 + $0x410] sm:$0xff] }
 0x179   : > { %2336 = vmatprep.mubr.f32.mxu0 %v4931_v63 }
 0x17a   : > { %1911 = vmatmul.mubr.f32.vlgmr.msra.gmra.mrb[64].mxu1 %v4882_v2  ;;  %2337 = vmatmul.mubr.f32.vlgmr.msra.gmra.mrb[64].mxu0 %v4930_v3 }
 0x17b   : > { %6248 = vmatpush3.bf16.msra.mxu1 %v6907_v61  ;;  %1915 = vmatprep.mubr.f32.mxu1 %v4885_v4  ;;  %v4935_v61 = vld [vmem:[%s8685_s22 + $0x428] sm:$0xff] }
 0x17c   : > { %6250 = vmatprep.subr.bf16.mxu1 %v6921_v16  ;;  %2341 = vmatprep.mubr.f32.mxu0 %v4933_v5  ;;  %v4934_v16 = vld [vmem:[%s8685_s22 + $0x420] sm:$0xff]  ;;  %v2423_v5 = vld [vmem:[%s8687_s20 + $0x10] sm:$0xff] }
 0x17e   : > { %1916 = vmatmul.mubr.f32.gmra.mrb[66].mxu1 %v4884_v6  ;;  %2342 = vmatmul.mubr.f32.gmra.mrb[66].mxu0 %v4932_v62  ;;  %v2424_v6 = vld [vmem:[%s8687_s20 + $0x18] sm:$0xff] }
 0x17f   : > { %6252 = vmatpush3.bf16.msra.mxu1 %v6919_v15  ;;  %1920 = vmatprep.mubr.f32.mxu1 %v4887_v7  ;;  %v4937_v15 = vld [vmem:[%s8685_s22 + $0x438] sm:$0xff]  ;;  %v6313_v62 = vpack.c.bf16 %v2424_v6, %v2423_v5 }
 0x180   : > { %6254 = vmatprep.subr.bf16.mxu1 %v6935_v39  ;;  %2346 = vmatprep.mubr.f32.mxu0 %v4935_v61  ;;  %v4936_v39 = vld [vmem:[%s8685_s22 + $0x430] sm:$0xff] }
 0x182   : > { %1921 = vmatmul.mubr.f32.gmra.mrb[68].mxu1 %v4886_v8  ;;  %2347 = vmatmul.mubr.f32.gmra.mrb[68].mxu0 %v4934_v16 }
 0x183   : > { %6256 = vmatpush3.bf16.msra.mxu1 %v6933_v37  ;;  %1925 = vmatprep.mubr.f32.mxu1 %v4889_v9  ;;  %v4939_v37 = vld [vmem:[%s8685_s22 + $0x448] sm:$0xff] }
 0x184   : > { %6258 = vmatprep.subr.bf16.mxu1 %v6946_v59  ;;  %2351 = vmatprep.mubr.f32.mxu0 %v4937_v15  ;;  %v4938_v59 = vld [vmem:[%s8685_s22 + $0x440] sm:$0xff] }
 0x186   : > { %1926 = vmatmul.mubr.f32.gmra.mrb[70].mxu1 %v4888_v10  ;;  %2352 = vmatmul.mubr.f32.gmra.mrb[70].mxu0 %v4936_v39 }
 0x187   : > { %6260 = vmatpush3.bf16.msra.mxu1 %v6943_v54  ;;  %1930 = vmatprep.mubr.f32.mxu1 %v4891_v11  ;;  %v4941_v54 = vld [vmem:[%s8685_s22 + $0x458] sm:$0xff] }
 0x188   : > { %6262 = vmatprep.subr.bf16.mxu1 %v6959_v20  ;;  %2356 = vmatprep.mubr.f32.mxu0 %v4939_v37  ;;  %v4940_v20 = vld [vmem:[%s8685_s22 + $0x450] sm:$0xff] }
 0x18a   : > { %1931 = vmatmul.mubr.f32.gmra.mrb[72].mxu1 %v4890_v12  ;;  %2357 = vmatmul.mubr.f32.gmra.mrb[72].mxu0 %v4938_v59 }
 0x18b   : > { %6264 = vmatpush3.bf16.msra.mxu1 %v6956_v13  ;;  %1935 = vmatprep.mubr.f32.mxu1 %v4893_v14  ;;  %v4943_v13 = vld [vmem:[%s8685_s22 + $0x468] sm:$0xff]  ;;  %v1241_v14 = vlaneseq }
 0x18c   : > { %6266 = vmatprep.subr.bf16.mxu1 %v6969_v35  ;;  %2361 = vmatprep.mubr.f32.mxu0 %v4941_v54  ;;  %v4942_v35 = vld [vmem:[%s8685_s22 + $0x460] sm:$0xff] }
 0x18e   : > { %1936 = vmatmul.mubr.f32.gmra.mrb[74].mxu1 %v4892_v17  ;;  %2362 = vmatmul.mubr.f32.gmra.mrb[74].mxu0 %v4940_v20 }
 0x18f   : > { %6268 = vmatpush3.bf16.msra.mxu1 %v6964_v32  ;;  %1940 = vmatprep.mubr.f32.mxu1 %v4895_v18  ;;  %v4945_v32 = vld [vmem:[%s8685_s22 + $0x478] sm:$0xff] }
 0x190   : > { %6270 = vmatprep.subr.bf16.mxu1 %v6983_v53  ;;  %2366 = vmatprep.mubr.f32.mxu0 %v4943_v13  ;;  %v4944_v53 = vld [vmem:[%s8685_s22 + $0x470] sm:$0xff] }
 0x192   : > { %1941 = vmatmul.mubr.f32.gmra.mrb[76].mxu1 %v4894_v19  ;;  %2367 = vmatmul.mubr.f32.gmra.mrb[76].mxu0 %v4942_v35  ;;  %v7571_v35 = vshrl.u32 %v1241_v14, 7 }
 0x193   : > { %6272 = vmatpush3.bf16.msra.mxu1 %v6979_v50  ;;  %1945 = vmatprep.mubr.f32.mxu1 %v4897_v21  ;;  %v4914_v50 = vld [vmem:[%s8685_s22 + $0x380] sm:$0xff] }
 0x194   : > { %6274 = vmatprep.subr.bf16.mxu1 %v6991_v1  ;;  %2371 = vmatprep.mubr.f32.mxu0 %v4945_v32  ;;  %v4916_v1 = vld [vmem:[%s8685_s22 + $0x390] sm:$0xff] }
 0x196   : > { %1946 = vmatmul.mubr.f32.gmra.mrb[78].mxu1 %v4896_v22  ;;  %2372 = vmatmul.mubr.f32.gmra.mrb[78].mxu0 %v4944_v53 }
 0x197   : > { %6276 = vmatpush3.bf16.msra.mxu1 %v6989_v0  ;;  %2194 = vmatprep.mubr.f32.mxu1 %v4915_v23  ;;  %v4918_v0 = vld [vmem:[%s8685_s22 + $0x3a0] sm:$0xff] }
 0x198   : > { %6310 = vmatprep.subr.bf16.mxu1 %v6309_v56 }
 0x19a   : > { %2195 = vmatmul.mubr.f32.vlgmr.msra.gmra.mrb[80].mxu1 %v4914_v50 }
 0x19b   : > { %2199 = vmatprep.mubr.f32.mxu1 %v4917_v24  ;;  %6312 = vmatpush3.bf16.msra.mxu1 %v6309_v56  ;;  %v7578_v24 = vsub.s32 0, %v7571_v35 }
 0x19c   : > { %6314 = vmatprep.subr.bf16.mxu1 %v6313_v62 }
 0x19e   : > { %2200 = vmatmul.mubr.f32.gmra.mrb[82].mxu1 %v4916_v1 }
 0x19f   : > { %2204 = vmatprep.mubr.f32.mxu1 %v4919_v25  ;;  %6316 = vmatpush3.bf16.msra.mxu1 %v6313_v62  ;;  %v7581_v25 = vsub.s32 1, %v7571_v35 }
 0x1a2   : > { %2205 = vmatmul.mubr.f32.gmra.mrb[84].mxu1 %v4918_v0  ;;  %v7584_v0 = vsub.s32 2, %v7571_v35 }
 0x1a3   : > { %2209 = vmatprep.mubr.f32.mxu1 %v4921_v26 }
 0x1a6   : > { %2210 = vmatmul.mubr.f32.gmra.mrb[86].mxu1 %v4920_v27  ;;  %v7589_v27 = vld [vmem:[%s8688_s23] sm:$0xff] }
 0x1a7   : > { %2214 = vmatprep.mubr.f32.mxu1 %v4923_v28 }
 0x1aa   : > { %2215 = vmatmul.mubr.f32.gmra.mrb[88].mxu1 %v4922_v29 }
 0x1ab   : > { %2219 = vmatprep.mubr.f32.mxu1 %v4925_v30 }
 0x1ae   : > { %2220 = vmatmul.mubr.f32.gmra.mrb[90].mxu1 %v4924_v31 }
 0x1af   : > { %2224 = vmatprep.mubr.f32.mxu1 %v4927_v33  ;;  %v7597_v33 = vrot.slane %v7589_v27, %v7578_v24 }
 0x1b2   : > { %2225 = vmatmul.mubr.f32.gmra.mrb[92].mxu1 %v4926_v34 }
 0x1b3   : > { %2229 = vmatprep.mubr.f32.mxu1 %v4929_v36  ;;  %v7601_v36 = vrot.slane %v7589_v27, %v7581_v25 }
 0x1b6   : > { %2230 = vmatmul.mubr.f32.gmra.mrb[94].mxu1 %v4928_v40  ;;  %v7605_v40 = vrot.slane %v7589_v27, %v7584_v0 }
 0x1ed   : > { %v5079_v41 = vpop.f32.mrb[16].mxu1  ;;  %v5191_v42 = vpop.f32.mrb[16].mxu0 }
 0x1ee   : > { %v5080_v43 = vpop.f32.mrb[17].mxu1  ;;  %v5192_v44 = vpop.f32.mrb[17].mxu0 }
 0x1ef   : > { %v7535_v45 = vadd.f32 %v5080_v43, %v5079_v41  ;;  %v7537_v46 = vadd.f32 %v5192_v44, %v5191_v42 }
 0x1f1   : > { %v5082_v47 = vpop.f32.mrb[18].mxu1  ;;  %v5194_v48 = vpop.f32.mrb[18].mxu0  ;;  %v1529_v51 = vmul.f32 %v7537_v46, %v7605_v40 }
 0x1f2   : > { %v5083_v52 = vpop.f32.mrb[19].mxu1  ;;  %v5195_v55 = vpop.f32.mrb[19].mxu0 }
 0x1f3   : > { %v7545_v57 = vadd.f32 %v5083_v52, %v5082_v47  ;;  %v7547_v58 = vadd.f32 %v5195_v55, %v5194_v48  ;;  %v1245_v48 = vmul.f32 %v7535_v45, %v7597_v33 }
 0x1f5   : > { %v5085_v60 = vpop.f32.mrb[20].mxu1  ;;  %v5197_v38 = vpop.f32.mrb[20].mxu0  ;;  %v1246_v5 = vmul.f32 %v7545_v57, %v7597_v33  ;;  %v1530_v62 = vmul.f32 %v7547_v58, %v7605_v40 }
 0x1f6   : > { %v5086_v63 = vpop.f32.mrb[21].mxu1  ;;  %v5198_v2 = vpop.f32.mrb[21].mxu0 }
 0x1f7   : > { %v7549_v3 = vadd.f32 %v5086_v63, %v5085_v60  ;;  %v7551_v4 = vadd.f32 %v5198_v2, %v5197_v38 }
 0x1f9   : > { %v5088_v7 = vpop.f32.mrb[22].mxu1  ;;  %v5200_v61 = vpop.f32.mrb[22].mxu0  ;;  %v1531_v14 = vmul.f32 %v7551_v4, %v7605_v40 }
 0x1fa   : > { %v5089_v8 = vpop.f32.mrb[23].mxu1  ;;  %v5201_v16 = vpop.f32.mrb[23].mxu0 }
 0x1fb   : > { %v7559_v9 = vadd.f32 %v5089_v8, %v5088_v7  ;;  %v7561_v15 = vadd.f32 %v5201_v16, %v5200_v61 }
 0x1fd   : > { %v5091_v10 = vpop.f32.mrb[24].mxu1  ;;  %v5203_v39 = vpop.f32.mrb[24].mxu0 }
 0x1fe   : > { %v5092_v11 = vpop.f32.mrb[25].mxu1  ;;  %v5204_v37 = vpop.f32.mrb[25].mxu0 }
 0x1ff   : > { %v7563_v12 = vadd.f32 %v5092_v11, %v5091_v10  ;;  %v7565_v59 = vadd.f32 %v5204_v37, %v5203_v39  ;;  %v1247_v11 = vmul.f32 %v7549_v3, %v7597_v33 }
 0x201   : > { %v5094_v54 = vpop.f32.mrb[26].mxu1  ;;  %v5206_v17 = vpop.f32.mrb[26].mxu0 }
 0x202   : > { %v5095_v20 = vpop.f32.mrb[27].mxu1  ;;  %v5207_v18 = vpop.f32.mrb[27].mxu0 }
 0x203   : > { %v7567_v13 = vadd.f32 %v5095_v20, %v5094_v54  ;;  %v7569_v19 = vadd.f32 %v5207_v18, %v5206_v17 }
 0x205   : > { %v5097_v21 = vpop.f32.mrb[28].mxu1  ;;  %v5209_v32 = vpop.f32.mrb[28].mxu0 }
 0x206   : > { %v5098_v22 = vpop.f32.mrb[29].mxu1  ;;  %v5210_v53 = vpop.f32.mrb[29].mxu0 }
 0x207   : > { %v7573_v23 = vadd.f32 %v5098_v22, %v5097_v21  ;;  %v7575_v50 = vadd.f32 %v5210_v53, %v5209_v32  ;;  %v1248_v22 = vmul.f32 %v7559_v9, %v7597_v33 }
 0x209   : > { %v5100_v1 = vpop.f32.mrb[30].mxu1  ;;  %v5212_v26 = vpop.f32.mrb[30].mxu0 }
 0x20a   : > { %v5101_v28 = vpop.f32.mrb[31].mxu1  ;;  %v5213_v29 = vpop.f32.mrb[31].mxu0 }
 0x20b   : > { %v7591_v30 = vadd.f32 %v5101_v28, %v5100_v1  ;;  %v7593_v31 = vadd.f32 %v5213_v29, %v5212_v26  ;;  %v1532_v1 = vmul.f32 %v7561_v15, %v7605_v40 }
 0x20d   : > { %v5135_v34 = vpop.f32.mrb[32].mxu1  ;;  %v5303_v41 = vpop.f32.mrb[32].mxu0 }
 0x20e   : > { %v5136_v42 = vpop.f32.mrb[33].mxu1  ;;  %v5304_v43 = vpop.f32.mrb[33].mxu0 }
 0x20f   : > { %v5137_v44 = vadd.f32 %v5136_v42, %v5135_v34  ;;  %v7607_v47 = vadd.f32 %v5304_v43, %v5303_v41  ;;  %v1249_v43 = vmul.f32 %v7563_v12, %v7597_v33 }
 0x211   : > { %v1387_v49 = vmul.f32 %v5137_v44, %v7601_v36  ;;  %v5138_v52 = vpop.f32.mrb[34].mxu1  ;;  %v5306_v55 = vpop.f32.mrb[34].mxu0 }
 0x212   : > { %v5139_v56 = vpop.f32.mrb[35].mxu1  ;;  %v5307_v60 = vpop.f32.mrb[35].mxu0 }
 0x213   : > { %v1395_v38 = vadd.f32 %v1387_v49, %v1245_v48  ;;  %v5140_v63 = vadd.f32 %v5139_v56, %v5138_v52  ;;  %v7614_v2 = vadd.f32 %v5307_v60, %v5306_v55  ;;  %v1533_v48 = vmul.f32 %v7565_v59, %v7605_v40 }
 0x215   : > { %v7618_v6 = vadd.f32 %v1529_v51, %v1395_v38  ;;  %v1388_v45 = vmul.f32 %v5140_v63, %v7601_v36  ;;  %v5141_v7 = vpop.f32.mrb[36].mxu1  ;;  %v5309_v46 = vpop.f32.mrb[36].mxu0  ;;  %v1250_v38 = vmul.f32 %v7567_v13, %v7597_v33  ;;  %v7665_v13 = vsub.s32 4, %v7571_v35 }
 0x216   : > { %v5142_v61 = vpop.f32.mrb[37].mxu1  ;;  %v5310_v8 = vpop.f32.mrb[37].mxu0 }
 0x217   : > { %v1396_v16 = vadd.f32 %v1388_v45, %v1246_v5  ;;  %v5143_v10 = vadd.f32 %v5142_v61, %v5141_v7  ;;  %v7623_v39 = vadd.f32 %v5310_v8, %v5309_v46  ;;  %v1534_v5 = vmul.f32 %v7569_v19, %v7605_v40 }
 0x219   : > { %v7627_v37 = vadd.f32 %v1530_v62, %v1396_v16  ;;  %v1389_v57 = vmul.f32 %v5143_v10, %v7601_v36  ;;  %v5144_v54 = vpop.f32.mrb[38].mxu1  ;;  %v5312_v58 = vpop.f32.mrb[38].mxu0  ;;  %v7662_v16 = vsub.s32 3, %v7571_v35  ;;  %v1251_v10 = vmul.f32 %v7573_v23, %v7597_v33 }
 0x21a   : > { %v5145_v17 = vpop.f32.mrb[39].mxu1  ;;  %v5313_v20 = vpop.f32.mrb[39].mxu0  ;;  %v7682_v23 = vrot.slane %v7589_v27, %v7665_v13 }
 0x21b   : > { %v1397_v18 = vadd.f32 %v1389_v57, %v1247_v11  ;;  %v5146_v21 = vadd.f32 %v5145_v17, %v5144_v54  ;;  %v7632_v32 = vadd.f32 %v5313_v20, %v5312_v58  ;;  %v1535_v57 = vmul.f32 %v7575_v50, %v7605_v40 }
 0x21d   : > { %v7636_v53 = vadd.f32 %v1531_v14, %v1397_v18  ;;  %v1390_v3 = vmul.f32 %v5146_v21, %v7601_v36  ;;  %v5147_v26 = vpop.f32.mrb[40].mxu1  ;;  %v5315_v4 = vpop.f32.mrb[40].mxu0 }
 0x21e   : > { %v5148_v28 = vpop.f32.mrb[41].mxu1  ;;  %v5316_v29 = vpop.f32.mrb[41].mxu0 }
 0x21f   : > { %v1398_v34 = vadd.f32 %v1390_v3, %v1248_v22  ;;  %v5149_v41 = vadd.f32 %v5148_v28, %v5147_v26  ;;  %v7641_v42 = vadd.f32 %v5316_v29, %v5315_v4  ;;  %v7678_v22 = vrot.slane %v7589_v27, %v7662_v16 }
 0x220   : > { %v1252_v3 = vmul.f32 %v7591_v30, %v7597_v33  ;;  %v1536_v26 = vmul.f32 %v7593_v31, %v7605_v40  ;;  %v1813_v30 = vmul.f32 %v7607_v47, %v7682_v23 }
 0x221   : > { %v7645_v44 = vadd.f32 %v1532_v1, %v1398_v34  ;;  %v1391_v9 = vmul.f32 %v5149_v41, %v7601_v36  ;;  %v5150_v49 = vpop.f32.mrb[42].mxu1  ;;  %v5318_v15 = vpop.f32.mrb[42].mxu0 }
 0x222   : > { %v5151_v51 = vpop.f32.mrb[43].mxu1  ;;  %v5319_v52 = vpop.f32.mrb[43].mxu0 }
 0x223   : > { %v1399_v55 = vadd.f32 %v1391_v9, %v1249_v43  ;;  %v5152_v56 = vadd.f32 %v5151_v51, %v5150_v49  ;;  %v7650_v60 = vadd.f32 %v5319_v52, %v5318_v15 }
 0x225   : > { %v7654_v63 = vadd.f32 %v1533_v48, %v1399_v55  ;;  %v1392_v12 = vmul.f32 %v5152_v56, %v7601_v36  ;;  %v5153_v45 = vpop.f32.mrb[44].mxu1  ;;  %v5321_v59 = vpop.f32.mrb[44].mxu0 }
 0x226   : > { %v5154_v62 = vpop.f32.mrb[45].mxu1  ;;  %v5322_v7 = vpop.f32.mrb[45].mxu0 }
 0x227   : > { %v1400_v46 = vadd.f32 %v1392_v12, %v1250_v38  ;;  %v5155_v61 = vadd.f32 %v5154_v62, %v5153_v45  ;;  %v7659_v8 = vadd.f32 %v5322_v7, %v5321_v59  ;;  %v1814_v38 = vmul.f32 %v7614_v2, %v7682_v23 }
 0x229   : > { %v7669_v11 = vadd.f32 %v1534_v5, %v1400_v46  ;;  %v1393_v19 = vmul.f32 %v5155_v61, %v7601_v36  ;;  %v5156_v14 = vpop.f32.mrb[46].mxu1  ;;  %v5324_v54 = vpop.f32.mrb[46].mxu0  ;;  %v1815_v61 = vmul.f32 %v7623_v39, %v7682_v23 }
 0x22a   : > { %v5157_v58 = vpop.f32.mrb[47].mxu1  ;;  %v5325_v17 = vpop.f32.mrb[47].mxu0 }
 0x22b   : > { %v1401_v20 = vadd.f32 %v1393_v19, %v1251_v10  ;;  %v5158_v18 = vadd.f32 %v5157_v58, %v5156_v14  ;;  %v7674_v21 = vadd.f32 %v5325_v17, %v5324_v54 }
 0x22d   : > { %v7686_v50 = vadd.f32 %v1535_v57, %v1401_v20  ;;  %v1394_v1 = vmul.f32 %v5158_v18, %v7601_v36  ;;  %v5247_v4 = vpop.f32.mrb[48].mxu1  ;;  %v5415_v28 = vpop.f32.mrb[48].mxu0  ;;  %v1816_v20 = vmul.f32 %v7632_v32, %v7682_v23 }
 0x22e   : > { %v5248_v29 = vpop.f32.mrb[49].mxu1  ;;  %v5416_v34 = vpop.f32.mrb[49].mxu0 }
 0x22f   : > { %v1402_v41 = vadd.f32 %v1394_v1, %v1252_v3  ;;  %v5249_v43 = vadd.f32 %v5248_v29, %v5247_v4  ;;  %v7691_v9 = vadd.f32 %v5416_v34, %v5415_v28  ;;  %v1817_v34 = vmul.f32 %v7641_v42, %v7682_v23 }
 0x231   : > { %v7693_v48 = vadd.f32 %v1536_v26, %v1402_v41  ;;  %v1671_v49 = vmul.f32 %v5249_v43, %v7678_v22  ;;  %v5250_v33 = vpop.f32.mrb[50].mxu1  ;;  %v5418_v36 = vpop.f32.mrb[50].mxu0 }
 0x232   : > { %v5251_v15 = vpop.f32.mrb[51].mxu1  ;;  %v5419_v51 = vpop.f32.mrb[51].mxu0 }
 0x233   : > { %v1679_v31 = vadd.f32 %v1671_v49, %v7618_v6  ;;  %v5252_v40 = vadd.f32 %v5251_v15, %v5250_v33  ;;  %v7699_v52 = vadd.f32 %v5419_v51, %v5418_v36  ;;  %v1818_v51 = vmul.f32 %v7650_v60, %v7682_v23 }
 0x235   : > { %v7701_v55 = vadd.f32 %v1813_v30, %v1679_v31  ;;  %v1672_v56 = vmul.f32 %v5252_v40, %v7678_v22  ;;  %v5253_v12 = vpop.f32.mrb[52].mxu1  ;;  %v5421_v5 = vpop.f32.mrb[52].mxu0 }
 0x236   : > { %v5254_v45 = vpop.f32.mrb[53].mxu1  ;;  %v5422_v47 = vpop.f32.mrb[53].mxu0 }
 0x237   : > { %v1680_v59 = vadd.f32 %v1672_v56, %v7627_v37  ;;  %v5255_v62 = vadd.f32 %v5254_v45, %v5253_v12  ;;  %v7707_v7 = vadd.f32 %v5422_v47, %v5421_v5 }
 0x239   : > { %v7709_v6 = vadd.f32 %v1814_v38, %v1680_v59  ;;  %v1673_v46 = vmul.f32 %v5255_v62, %v7678_v22  ;;  %v5256_v10 = vpop.f32.mrb[54].mxu1  ;;  %v5424_v19 = vpop.f32.mrb[54].mxu0  ;;  %v1819_v59 = vmul.f32 %v7659_v8, %v7682_v23  ;;  %v7750_v62 = vsub.s32 6, %v7571_v35 }
 0x23a   : > { %v5257_v57 = vpop.f32.mrb[55].mxu1  ;;  %v5425_v2 = vpop.f32.mrb[55].mxu0 }
 0x23b   : > { %v1681_v14 = vadd.f32 %v1673_v46, %v7636_v53  ;;  %v5258_v54 = vadd.f32 %v5257_v57, %v5256_v10  ;;  %v7715_v58 = vadd.f32 %v5425_v2, %v5424_v19 }
 0x23d   : > { %v7717_v37 = vadd.f32 %v1815_v61, %v1681_v14  ;;  %v1674_v17 = vmul.f32 %v5258_v54, %v7678_v22  ;;  %v5259_v18 = vpop.f32.mrb[56].mxu1  ;;  %v5427_v3 = vpop.f32.mrb[56].mxu0  ;;  %v1820_v54 = vmul.f32 %v7674_v21, %v7682_v23 }
 0x23e   : > { %v5260_v1 = vpop.f32.mrb[57].mxu1  ;;  %v5428_v39 = vpop.f32.mrb[57].mxu0 }
 0x23f   : > { %v1682_v26 = vadd.f32 %v1674_v17, %v7645_v44  ;;  %v5261_v4 = vadd.f32 %v5260_v1, %v5259_v18  ;;  %v7723_v28 = vadd.f32 %v5428_v39, %v5427_v3 }
 0x241   : > { %v7725_v53 = vadd.f32 %v1816_v20, %v1682_v26  ;;  %v1675_v29 = vmul.f32 %v5261_v4, %v7678_v22  ;;  %v5262_v41 = vpop.f32.mrb[58].mxu1  ;;  %v5430_v43 = vpop.f32.mrb[58].mxu0  ;;  %v7766_v20 = vrot.slane %v7589_v27, %v7750_v62 }
 0x242   : > { %v5263_v49 = vpop.f32.mrb[59].mxu1  ;;  %v5431_v32 = vpop.f32.mrb[59].mxu0 }
 0x243   : > { %v1683_v30 = vadd.f32 %v1675_v29, %v7654_v63  ;;  %v5264_v33 = vadd.f32 %v5263_v49, %v5262_v41  ;;  %v7731_v36 = vadd.f32 %v5431_v32, %v5430_v43  ;;  %v7742_v63 = vsub.s32 5, %v7571_v35 }
 0x244   : > { %v2097_v21 = vmul.f32 %v7691_v9, %v7766_v20 }
 0x245   : > { %v7733_v44 = vadd.f32 %v1817_v34, %v1683_v30  ;;  %v1676_v15 = vmul.f32 %v5264_v33, %v7678_v22  ;;  %v5265_v31 = vpop.f32.mrb[60].mxu1  ;;  %v5433_v40 = vpop.f32.mrb[60].mxu0  ;;  %v7757_v2 = vrot.slane %v7589_v27, %v7742_v63  ;;  %v2098_v33 = vmul.f32 %v7699_v52, %v7766_v20 }
 0x246   : > { %v5266_v56 = vpop.f32.mrb[61].mxu1  ;;  %v5434_v42 = vpop.f32.mrb[61].mxu0 }
 0x247   : > { %v1684_v38 = vadd.f32 %v1676_v15, %v7669_v11  ;;  %v5267_v12 = vadd.f32 %v5266_v56, %v5265_v31  ;;  %v7739_v5 = vadd.f32 %v5434_v42, %v5433_v40 }
 0x249   : > { %v7744_v45 = vadd.f32 %v1818_v51, %v1684_v38  ;;  %v1677_v47 = vmul.f32 %v5267_v12, %v7678_v22  ;;  %v5268_v60 = vpop.f32.mrb[62].mxu1  ;;  %v5436_v46 = vpop.f32.mrb[62].mxu0  ;;  %v2099_v12 = vmul.f32 %v7707_v7, %v7766_v20 }
 0x24a   : > { %v5269_v61 = vpop.f32.mrb[63].mxu1  ;;  %v5437_v11 = vpop.f32.mrb[63].mxu0 }
 0x24b   : > { %v1685_v10 = vadd.f32 %v1677_v47, %v7686_v50  ;;  %v5270_v19 = vadd.f32 %v5269_v61, %v5268_v60  ;;  %v7753_v57 = vadd.f32 %v5437_v11, %v5436_v46 }
 0x24d   : > { %v7759_v14 = vadd.f32 %v1819_v59, %v1685_v10  ;;  %v1678_v8 = vmul.f32 %v5270_v19, %v7678_v22  ;;  %v5359_v17 = vpop.f32.mrb[64].mxu1  ;;  %v5527_v50 = vpop.f32.mrb[64].mxu0  ;;  %v2100_v19 = vmul.f32 %v7715_v58, %v7766_v20 }
 0x24e   : > { %v5360_v18 = vpop.f32.mrb[65].mxu1  ;;  %v5528_v3 = vpop.f32.mrb[65].mxu0 }
 0x24f   : > { %v1686_v1 = vadd.f32 %v1678_v8, %v7693_v48  ;;  %v5361_v39 = vadd.f32 %v5360_v18, %v5359_v17  ;;  %v7769_v26 = vadd.f32 %v5528_v3, %v5527_v50 }
 0x251   : > { %v7771_v4 = vadd.f32 %v1820_v54, %v1686_v1  ;;  %v1955_v22 = vmul.f32 %v5361_v39, %v7757_v2  ;;  %v5362_v23 = vpop.f32.mrb[66].mxu1  ;;  %v5530_v29 = vpop.f32.mrb[66].mxu0  ;;  %v2101_v39 = vmul.f32 %v7723_v28, %v7766_v20 }
 0x252   : > { %v5363_v34 = vpop.f32.mrb[67].mxu1  ;;  %v5531_v41 = vpop.f32.mrb[67].mxu0 }
 0x253   : > { %v1963_v43 = vadd.f32 %v1955_v22, %v7701_v55  ;;  %v5364_v49 = vadd.f32 %v5363_v34, %v5362_v23  ;;  %v7777_v32 = vadd.f32 %v5531_v41, %v5530_v29 }
 0x255   : > { %v7779_v48 = vadd.f32 %v2097_v21, %v1963_v43  ;;  %v1956_v30 = vmul.f32 %v5364_v49, %v7757_v2  ;;  %v5365_v15 = vpop.f32.mrb[68].mxu1  ;;  %v5533_v51 = vpop.f32.mrb[68].mxu0  ;;  %v2102_v49 = vmul.f32 %v7731_v36, %v7766_v20 }
 0x256   : > { %v5366_v31 = vpop.f32.mrb[69].mxu1  ;;  %v5534_v9 = vpop.f32.mrb[69].mxu0 }
 0x257   : > { %v1964_v40 = vadd.f32 %v1956_v30, %v7709_v6  ;;  %v5367_v56 = vadd.f32 %v5366_v31, %v5365_v15  ;;  %v7785_v42 = vadd.f32 %v5534_v9, %v5533_v51 }
 0x259   : > { %v7787_v55 = vadd.f32 %v2098_v33, %v1964_v40  ;;  %v1957_v38 = vmul.f32 %v5367_v56, %v7757_v2  ;;  %v5368_v47 = vpop.f32.mrb[70].mxu1  ;;  %v5536_v59 = vpop.f32.mrb[70].mxu0  ;;  %v2103_v56 = vmul.f32 %v7739_v5, %v7766_v20 }
 0x25a   : > { %v5369_v60 = vpop.f32.mrb[71].mxu1  ;;  %v5537_v52 = vpop.f32.mrb[71].mxu0 }
 0x25b   : > { %v1965_v46 = vadd.f32 %v1957_v38, %v7717_v37  ;;  %v5370_v61 = vadd.f32 %v5369_v60, %v5368_v47  ;;  %v7793_v11 = vadd.f32 %v5537_v52, %v5536_v59 }
 0x25d   : > { %v7795_v6 = vadd.f32 %v2099_v12, %v1965_v46  ;;  %v1958_v10 = vmul.f32 %v5370_v61, %v7757_v2  ;;  %v5371_v8 = vpop.f32.mrb[72].mxu1  ;;  %v5539_v54 = vpop.f32.mrb[72].mxu0  ;;  %v7825_v12 = vsub.s32 7, %v7571_v35 }
 0x25e   : > { %v5372_v17 = vpop.f32.mrb[73].mxu1  ;;  %v5540_v7 = vpop.f32.mrb[73].mxu0 }
 0x25f   : > { %v1966_v50 = vadd.f32 %v1958_v10, %v7725_v53  ;;  %v5373_v18 = vadd.f32 %v5372_v17, %v5371_v8  ;;  %v7801_v3 = vadd.f32 %v5540_v7, %v5539_v54  ;;  %v2104_v10 = vmul.f32 %v7753_v57, %v7766_v20 }
 0x260   : > { %v7837_v35 = vrot.slane %v7589_v27, %v7825_v12 }
 0x261   : > { %v7803_v37 = vadd.f32 %v2100_v19, %v1966_v50  ;;  %v1959_v1 = vmul.f32 %v5373_v18, %v7757_v2  ;;  %v5374_v22 = vpop.f32.mrb[74].mxu1  ;;  %v5542_v21 = vpop.f32.mrb[74].mxu0 }
 0x262   : > { %v5375_v23 = vpop.f32.mrb[75].mxu1  ;;  %v5543_v58 = vpop.f32.mrb[75].mxu0 }
 0x263   : > { %v1967_v29 = vadd.f32 %v1959_v1, %v7733_v44  ;;  %v5376_v34 = vadd.f32 %v5375_v23, %v5374_v22  ;;  %v7809_v41 = vadd.f32 %v5543_v58, %v5542_v21 }
 0x265   : > { %v7811_v53 = vadd.f32 %v2101_v39, %v1967_v29  ;;  %v1960_v43 = vmul.f32 %v5376_v34, %v7757_v2  ;;  %v5377_v30 = vpop.f32.mrb[76].mxu1  ;;  %v5545_v33 = vpop.f32.mrb[76].mxu0 }
 0x266   : > { %v5378_v15 = vpop.f32.mrb[77].mxu1  ;;  %v5546_v28 = vpop.f32.mrb[77].mxu0 }
 0x267   : > { %v1968_v51 = vadd.f32 %v1960_v43, %v7744_v45  ;;  %v5379_v31 = vadd.f32 %v5378_v15, %v5377_v30  ;;  %v7817_v9 = vadd.f32 %v5546_v28, %v5545_v33 }
 0x269   : > { %v7819_v44 = vadd.f32 %v2102_v49, %v1968_v51  ;;  %v1961_v40 = vmul.f32 %v5379_v31, %v7757_v2  ;;  %v5380_v38 = vpop.f32.mrb[78].mxu1  ;;  %v5548_v36 = vpop.f32.mrb[78].mxu0 }
 0x26a   : > { %v5381_v47 = vpop.f32.mrb[79].mxu1  ;;  %v5549_v59 = vpop.f32.mrb[79].mxu0 }
 0x26b   : > { %v1969_v60 = vadd.f32 %v1961_v40, %v7759_v14  ;;  %v5382_v45 = vadd.f32 %v5381_v47, %v5380_v38  ;;  %v7828_v52 = vadd.f32 %v5549_v59, %v5548_v36  ;;  %v7842_v14 = vld [vmem:[%s8688_s23 + $0x8] ss:$0 sm:$0xff] }
 0x26c   : > { %v2381_v57 = vmul.f32 %v7769_v26, %v7842_v14  ;;  %v2382_v39 = vmul.f32 %v7777_v32, %v7842_v14  ;;  %v2384_v28 = vmul.f32 %v7793_v11, %v7842_v14  ;;  %v2385_v47 = vmul.f32 %v7801_v3, %v7842_v14 }
 0x26d   : > { %v7830_v46 = vadd.f32 %v2103_v56, %v1969_v60  ;;  %v1962_v61 = vmul.f32 %v5382_v45, %v7757_v2  ;;  %v5471_v5 = vpop.f32.mrb[80].mxu1 }
 0x26e   : > { %v5472_v19 = vpop.f32.mrb[81].mxu1 }
 0x26f   : > { %v1970_v8 = vadd.f32 %v1962_v61, %v7771_v4  ;;  %v5473_v54 = vadd.f32 %v5472_v19, %v5471_v5  ;;  %v2386_v19 = vmul.f32 %v7809_v41, %v7842_v14 }
 0x271   : > { %v7845_v17 = vadd.f32 %v2104_v10, %v1970_v8  ;;  %v2239_v2 = vmul.f32 %v5473_v54, %v7837_v35  ;;  %v5474_v20 = vpop.f32.mrb[82].mxu1 }
 0x272   : > { %v5475_v7 = vpop.f32.mrb[83].mxu1 }
 0x273   : > { %v2247_v27 = vadd.f32 %v2239_v2, %v7779_v48  ;;  %v5476_v50 = vadd.f32 %v5475_v7, %v5474_v20  ;;  %v2383_v48 = vmul.f32 %v7785_v42, %v7842_v14 }
 0x275   : > { %v2389_v18 = vadd.f32 %v2381_v57, %v2247_v27  ;;  %v2240_v1 = vmul.f32 %v5476_v50, %v7837_v35  ;;  %v5477_v4 = vpop.f32.mrb[84].mxu1  ;;  %v2387_v27 = vmul.f32 %v7817_v9, %v7842_v14 }
 0x276   : > { %v5478_v22 = vpop.f32.mrb[85].mxu1 }
 0x277   : > { %v2248_v21 = vadd.f32 %v2240_v1, %v7787_v55  ;;  %v5479_v23 = vadd.f32 %v5478_v22, %v5477_v4  ;;  %vm2397_vm7 = vcmp.ge.f32.partialorder %v2389_v18, 0.0  ;;  %v2405_v58 = vmul.f32 0.2, %v2389_v18 }
 0x279   : > { %v2390_v26 = vadd.f32 %v2382_v39, %v2248_v21  ;;  %v2241_v29 = vmul.f32 %v5479_v23, %v7837_v35  ;;  %v5480_v34 = vpop.f32.mrb[86].mxu1  ;;  %v2413_v43 = vsel %vm2397_vm7, %v2389_v18, %v2405_v58  ;;  %v2388_v21 = vmul.f32 %v7828_v52, %v7842_v14  ;;  %v2581_v52 = vld [vmem:[%s8657_s6] sm:$0xff] }
 0x27a   : > { %v5481_v49 = vpop.f32.mrb[87].mxu1  ;;  %5750 = vmatprep.mubr.msk.f32.mxu1 %vm2425_vm6, %v2413_v43  ;;  %5778 = vmatprep.mubr.msk.f32.mxu0 %vm2583_vm15, %v2581_v52  ;;  %v3422_v52 = vld [vmem:[%s8659_s8 + $0x38] sm:$0xff] }
 0x27b   : > { %vm2398_vm8 = vcmp.ge.f32.partialorder %v2390_v26, 0.0  ;;  %v2406_v32 = vmul.f32 0.2, %v2390_v26  ;;  %v2249_v30 = vadd.f32 %v2241_v29, %v7795_v6  ;;  %v5482_v33 = vadd.f32 %v5481_v49, %v5480_v34 }
 0x27d   : > { %v2391_v55 = vadd.f32 %v2383_v48, %v2249_v30  ;;  %v2242_v15 = vmul.f32 %v5482_v33, %v7837_v35  ;;  %v5483_v51 = vpop.f32.mrb[88].mxu1  ;;  %v2414_v31 = vsel %vm2398_vm8, %v2390_v26, %v2406_v32 }
 0x27e   : > { %v5484_v40 = vpop.f32.mrb[89].mxu1  ;;  %5751 = vmatmul.mubr.msk.f32.vlgmr.msra.gmra.mrb[96].mxu1 %vm2425_vm6, %v2414_v31 }
 0x27f   : > { %v2250_v42 = vadd.f32 %v2242_v15, %v7803_v37  ;;  %v5485_v56 = vadd.f32 %v5484_v40, %v5483_v51  ;;  %vm2399_vm9 = vcmp.ge.f32.partialorder %v2391_v55, 0.0  ;;  %v2407_v38 = vmul.f32 0.2, %v2391_v55 }
 0x281   : > { %v2392_v36 = vadd.f32 %v2384_v28, %v2250_v42  ;;  %v2243_v6 = vmul.f32 %v5485_v56, %v7837_v35  ;;  %v5486_v59 = vpop.f32.mrb[90].mxu1  ;;  %v2415_v60 = vsel %vm2399_vm9, %v2391_v55, %v2407_v38 }
 0x282   : > { %v5487_v45 = vpop.f32.mrb[91].mxu1  ;;  %5753 = vmatprep.mubr.msk.f32.mxu1 %vm2425_vm6, %v2415_v60 }
 0x283   : > { %v2251_v11 = vadd.f32 %v2243_v6, %v7811_v53  ;;  %v5488_v61 = vadd.f32 %v5487_v45, %v5486_v59  ;;  %vm2400_vm10 = vcmp.ge.f32.partialorder %v2392_v36, 0.0  ;;  %v2408_v10 = vmul.f32 0.2, %v2392_v36 }
 0x285   : > { %v2393_v37 = vadd.f32 %v2385_v47, %v2251_v11  ;;  %v2244_v5 = vmul.f32 %v5488_v61, %v7837_v35  ;;  %v5489_v8 = vpop.f32.mrb[92].mxu1  ;;  %v2416_v54 = vsel %vm2400_vm10, %v2392_v36, %v2408_v10 }
 0x286   : > { %v5490_v2 = vpop.f32.mrb[93].mxu1  ;;  %5754 = vmatmul.mubr.msk.f32.gmra.mrb[98].mxu1 %vm2425_vm6, %v2416_v54  ;;  %v4961_v54 = vld [vmem:[%s8657_s6 + $0x20] sm:$0xff] }
 0x287   : > { %v2252_v3 = vadd.f32 %v2244_v5, %v7819_v44  ;;  %v5491_v57 = vadd.f32 %v5490_v2, %v5489_v8  ;;  %vm2401_vm11 = vcmp.ge.f32.partialorder %v2393_v37, 0.0  ;;  %v2409_v20 = vmul.f32 0.2, %v2393_v37  ;;  %v4958_v8 = vld [vmem:[%s8657_s6 + $0x18] sm:$0xff]  ;;  %v4965_v2 = vld [vmem:[%s8657_s6 + $0x30] sm:$0xff] }
 0x289   : > { %v2394_v53 = vadd.f32 %v2386_v19, %v2252_v3  ;;  %v2245_v7 = vmul.f32 %v5491_v57, %v7837_v35  ;;  %v5492_v50 = vpop.f32.mrb[94].mxu1  ;;  %v2417_v18 = vsel %vm2401_vm11, %v2393_v37, %v2409_v20  ;;  %v2582_v19 = vld [vmem:[%s8657_s6 + $0x8] sm:$0xff]  ;;  %v4966_v57 = vld [vmem:[%s8657_s6 + $0x38] sm:$0xff]  ;;  %v4969_v20 = vld [vmem:[%s8657_s6 + $0x40] sm:$0xff]  ;;  %vm6688_vm11 = vmmov 0  }
 0x28a   : > { %v5493_v1 = vpop.f32.mrb[95].mxu1  ;;  %5756 = vmatprep.mubr.msk.f32.mxu1 %vm2425_vm6, %v2417_v18  ;;  %v4962_v3 = vld [vmem:[%s8657_s6 + $0x28] sm:$0xff]  ;;  %v4981_v18 = vld [vmem:[%s8657_s6 + $0x70] sm:$0xff] }
 0x28b   : > { %v2253_v41 = vadd.f32 %v2245_v7, %v7830_v46  ;;  %v5494_v39 = vadd.f32 %v5493_v1, %v5492_v50  ;;  %vm2402_vm12 = vcmp.ge.f32.partialorder %v2394_v53, 0.0  ;;  %v2410_v4 = vmul.f32 0.2, %v2394_v53  ;;  %v4970_v7 = vld [vmem:[%s8657_s6 + $0x48] sm:$0xff]  ;;  %v4977_v50 = vld [vmem:[%s8657_s6 + $0x60] sm:$0xff] }
 0x28c   : > { %v4978_v1 = vld [vmem:[%s8657_s6 + $0x68] sm:$0xff] }
 0x28d   : > { %v2395_v44 = vadd.f32 %v2387_v27, %v2253_v41  ;;  %v2246_v22 = vmul.f32 %v5494_v39, %v7837_v35  ;;  %v2418_v23 = vsel %vm2402_vm12, %v2394_v53, %v2410_v4  ;;  %v4957_v35 = vld [vmem:[%s8657_s6 + $0x10] sm:$0xff]  ;;  %v4974_v27 = vld [vmem:[%s8657_s6 + $0x58] sm:$0xff]  ;;  %v4985_v39 = vld [vmem:[%s8657_s6 + $0x80] sm:$0xff] }
 0x28e   : > { %5757 = vmatmul.mubr.msk.f32.gmra.mrb[100].mxu1 %vm2425_vm6, %v2418_v23  ;;  %v4973_v53 = vld [vmem:[%s8657_s6 + $0x50] sm:$0xff]  ;;  %v4982_v41 = vld [vmem:[%s8657_s6 + $0x78] sm:$0xff]  ;;  %v4986_v4 = vld [vmem:[%s8657_s6 + $0x88] sm:$0xff] }
 0x28f   : > { %v2254_v9 = vadd.f32 %v2246_v22, %v7845_v17  ;;  %vm2403_vm13 = vcmp.ge.f32.partialorder %v2395_v44, 0.0  ;;  %v2411_v58 = vmul.f32 0.2, %v2395_v44  ;;  %v3416_v22 = vld [vmem:[%s8659_s8 + $0x8] sm:$0xff] }
 0x291   : > { %v2396_v26 = vadd.f32 %v2388_v21, %v2254_v9  ;;  %v2419_v29 = vsel %vm2403_vm13, %v2395_v44, %v2411_v58  ;;  %v3415_v44 = vld [vmem:[%s8659_s8] sm:$0xff]  ;;  %v3417_v21 = vld [vmem:[%s8659_s8 + $0x10] sm:$0xff]  ;;  %v3418_v9 = vld [vmem:[%s8659_s8 + $0x18] sm:$0xff] }
 0x292   : > { %5759 = vmatprep.mubr.msk.f32.mxu1 %vm2425_vm6, %v2419_v29  ;;  %v6461_v23 = vpack.c.bf16 %v3416_v22, %v3415_v44  ;;  %v6465_v58 = vpack.c.bf16 %v3418_v9, %v3417_v21  ;;  %v3420_v29 = vld [vmem:[%s8659_s8 + $0x28] sm:$0xff] }
 0x293   : > { %vm2404_vm14 = vcmp.ge.f32.partialorder %v2396_v26, 0.0  ;;  %v2412_v46 = vmul.f32 0.2, %v2396_v26 }
 0x295   : > { %v2420_v48 = vsel %vm2404_vm14, %v2396_v26, %v2412_v46  ;;  %v3419_v26 = vld [vmem:[%s8659_s8 + $0x20] sm:$0xff]  ;;  %vm3513_vm14 = vcmask 130048  }
 0x296   : > { %5760 = vmatmul.mubr.msk.f32.gmra.mrb[102].mxu1 %vm2425_vm6, %v2420_v48  ;;  %v6469_v46 = vpack.c.bf16 %v3420_v29, %v3419_v26  ;;  %v3421_v48 = vld [vmem:[%s8659_s8 + $0x30] sm:$0xff] }
 0x297   : > { %5797 = vmatprep.mubr.msk.f32.mxu1 %vm2583_vm15, %v4957_v35  ;;  %v6473_v35 = vpack.c.bf16 %v3422_v52, %v3421_v48 }
 0x351   : > { %v5752_v14 = vpop.f32.mrb[96].mxu1 }
 0x352   : > { %vm2556_vm1 = vcmp.ge.f32.partialorder %v5752_v14, 0.0  ;;  %v2564_v17 = vmul.f32 0.2, %v5752_v14  ;;  %v2516_v34 = vpop.f32.mrb[97].mxu1 }
 0x353   : > { %vm2555_vm2 = vcmp.ge.f32.partialorder %v2516_v34, 0.0  ;;  %v2563_v43 = vmul.f32 0.2, %v2516_v34 }
 0x354   : > { %v2572_v49 = vsel %vm2556_vm1, %v5752_v14, %v2564_v17  ;;  %v2579_v14 = vld [vmem:[%s8658_s7] sm:$0xff] }
 0x355   : > { %v2571_v32 = vsel %vm2555_vm2, %v2516_v34, %v2563_v43  ;;  %v2668_v17 = vrot.slane %v2579_v14, %v7578_v24  ;;  %v2760_v34 = vrot.slane %v2579_v14, %v7581_v25 }
 0x356   : > { %v7895_v30 = vpack.c.bf16 %v2572_v49, %v2571_v32 }
 0x358   : > { %6318 = vmatprep.subr.bf16.mxu0 %v7895_v30  ;;  %6334 = vmatprep.subr.bf16.mxu1 %v7895_v30 }
 0x359   : > { %v5755_v33 = vpop.f32.mrb[98].mxu1  ;;  %6320 = vmatpush3.bf16.msra.mxu0 %v7895_v30  ;;  %6336 = vmatpush3.bf16.msra.mxu1 %v7895_v30 }
 0x35a   : > { %vm2558_vm3 = vcmp.ge.f32.partialorder %v5755_v33, 0.0  ;;  %v2566_v55 = vmul.f32 0.2, %v5755_v33  ;;  %v2526_v15 = vpop.f32.mrb[99].mxu1 }
 0x35b   : > { %vm2557_vm4 = vcmp.ge.f32.partialorder %v2526_v15, 0.0  ;;  %v2565_v28 = vmul.f32 0.2, %v2526_v15 }
 0x35c   : > { %v2574_v51 = vsel %vm2558_vm3, %v5755_v33, %v2566_v55 }
 0x35d   : > { %v2573_v31 = vsel %vm2557_vm4, %v2526_v15, %v2565_v28 }
 0x35e   : > { %v7901_v40 = vpack.c.bf16 %v2574_v51, %v2573_v31 }
 0x360   : > { %6322 = vmatprep.subr.bf16.mxu0 %v7901_v40  ;;  %6338 = vmatprep.subr.bf16.mxu1 %v7901_v40 }
 0x361   : > { %v5758_v42 = vpop.f32.mrb[100].mxu1  ;;  %6324 = vmatpush3.bf16.msra.mxu0 %v7901_v40  ;;  %6340 = vmatpush3.bf16.msra.mxu1 %v7901_v40 }
 0x362   : > { %vm2560_vm5 = vcmp.ge.f32.partialorder %v5758_v42, 0.0  ;;  %v2568_v56 = vmul.f32 0.2, %v5758_v42  ;;  %v2536_v38 = vpop.f32.mrb[101].mxu1 }
 0x363   : > { %vm2559_vm6 = vcmp.ge.f32.partialorder %v2536_v38, 0.0  ;;  %v2567_v36 = vmul.f32 0.2, %v2536_v38 }
 0x364   : > { %v2576_v6 = vsel %vm2560_vm5, %v5758_v42, %v2568_v56  ;;  %v2944_v42 = vrot.slane %v2579_v14, %v7662_v16 }
 0x365   : > { %v2575_v47 = vsel %vm2559_vm6, %v2536_v38, %v2567_v36 }
 0x366   : > { %v7907_v59 = vpack.c.bf16 %v2576_v6, %v2575_v47 }
 0x368   : > { %6326 = vmatprep.subr.bf16.mxu0 %v7907_v59  ;;  %6342 = vmatprep.subr.bf16.mxu1 %v7907_v59 }
 0x369   : > { %v5761_v60 = vpop.f32.mrb[102].mxu1  ;;  %6328 = vmatpush3.bf16.msra.mxu0 %v7907_v59  ;;  %6344 = vmatpush3.bf16.msra.mxu1 %v7907_v59 }
 0x36a   : > { %vm2562_vm7 = vcmp.ge.f32.partialorder %v5761_v60, 0.0  ;;  %v2570_v45 = vmul.f32 0.2, %v5761_v60  ;;  %v2546_v11 = vpop.f32.mrb[103].mxu1 }
 0x36b   : > { %vm2561_vm8 = vcmp.ge.f32.partialorder %v2546_v11, 0.0  ;;  %v2569_v61 = vmul.f32 0.2, %v2546_v11 }
 0x36c   : > { %v2578_v10 = vsel %vm2562_vm7, %v5761_v60, %v2570_v45 }
 0x36d   : > { %v2577_v37 = vsel %vm2561_vm8, %v2546_v11, %v2569_v61 }
 0x36e   : > { %v7913_v5 = vpack.c.bf16 %v2578_v10, %v2577_v37 }
 0x370   : > { %6330 = vmatprep.subr.bf16.mxu0 %v7913_v5  ;;  %6346 = vmatprep.subr.bf16.mxu1 %v7913_v5 }
 0x371   : > { %6332 = vmatpush3.bf16.msra.mxu0 %v7913_v5  ;;  %6348 = vmatpush3.bf16.msra.mxu1 %v7913_v5 }
 0x372   : > { %6350 = vmatprep.subr.bf16.mxu0 %v7895_v30  ;;  %6366 = vmatprep.subr.bf16.mxu1 %v7895_v30 }
 0x374   : > { %5779 = vmatmul.mubr.msk.f32.vlgmr.msra.gmra.mrb[80].mxu0 %vm2583_vm15, %v2582_v19  ;;  %5798 = vmatmul.mubr.msk.f32.vlgmr.msra.gmra.mrb[104].mxu1 %vm2583_vm15, %v4958_v8  ;;  %v3128_v19 = vrot.slane %v2579_v14, %v7742_v63 }
 0x375   : > { %6352 = vmatpush3.bf16.msra.mxu0 %v7895_v30  ;;  %6368 = vmatpush3.bf16.msra.mxu1 %v7895_v30 }
 0x376   : > { %6354 = vmatprep.subr.bf16.mxu0 %v7901_v40  ;;  %6370 = vmatprep.subr.bf16.mxu1 %v7901_v40 }
 0x377   : > { %5816 = vmatprep.mubr.msk.f32.mxu0 %vm2583_vm15, %v4961_v54  ;;  %5835 = vmatprep.mubr.msk.f32.mxu1 %vm2583_vm15, %v4965_v2 }
 0x379   : > { %6356 = vmatpush3.bf16.msra.mxu0 %v7901_v40  ;;  %6372 = vmatpush3.bf16.msra.mxu1 %v7901_v40 }
 0x37a   : > { %6358 = vmatprep.subr.bf16.mxu0 %v7907_v59  ;;  %6374 = vmatprep.subr.bf16.mxu1 %v7907_v59 }
 0x37d   : > { %6360 = vmatpush3.bf16.msra.mxu0 %v7907_v59  ;;  %6376 = vmatpush3.bf16.msra.mxu1 %v7907_v59 }
 0x37e   : > { %6362 = vmatprep.subr.bf16.mxu0 %v7913_v5  ;;  %6378 = vmatprep.subr.bf16.mxu1 %v7913_v5 }
 0x381   : > { %6364 = vmatpush3.bf16.msra.mxu0 %v7913_v5  ;;  %6380 = vmatpush3.bf16.msra.mxu1 %v7913_v5 }
 0x382   : > { %6382 = vmatprep.subr.bf16.mxu0 %v7895_v30  ;;  %6398 = vmatprep.subr.bf16.mxu1 %v7895_v30 }
 0x384   : > { %5817 = vmatmul.mubr.msk.f32.vlgmr.msra.gmra.mrb[82].mxu0 %vm2583_vm15, %v4962_v3  ;;  %5836 = vmatmul.mubr.msk.f32.vlgmr.msra.gmra.mrb[106].mxu1 %vm2583_vm15, %v4966_v57 }
 0x385   : > { %6384 = vmatpush3.bf16.msra.mxu0 %v7895_v30  ;;  %6400 = vmatpush3.bf16.msra.mxu1 %v7895_v30 }
 0x386   : > { %6386 = vmatprep.subr.bf16.mxu0 %v7901_v40  ;;  %6402 = vmatprep.subr.bf16.mxu1 %v7901_v40 }
 0x387   : > { %5854 = vmatprep.mubr.msk.f32.mxu0 %vm2583_vm15, %v4969_v20  ;;  %5873 = vmatprep.mubr.msk.f32.mxu1 %vm2583_vm15, %v4973_v53 }
 0x389   : > { %6388 = vmatpush3.bf16.msra.mxu0 %v7901_v40  ;;  %6404 = vmatpush3.bf16.msra.mxu1 %v7901_v40 }
 0x38a   : > { %6390 = vmatprep.subr.bf16.mxu0 %v7907_v59  ;;  %6406 = vmatprep.subr.bf16.mxu1 %v7907_v59 }
 0x38d   : > { %6392 = vmatpush3.bf16.msra.mxu0 %v7907_v59  ;;  %6408 = vmatpush3.bf16.msra.mxu1 %v7907_v59 }
 0x38e   : > { %6394 = vmatprep.subr.bf16.mxu0 %v7913_v5  ;;  %6410 = vmatprep.subr.bf16.mxu1 %v7913_v5 }
 0x391   : > { %6396 = vmatpush3.bf16.msra.mxu0 %v7913_v5  ;;  %6412 = vmatpush3.bf16.msra.mxu1 %v7913_v5 }
 0x392   : > { %6414 = vmatprep.subr.bf16.mxu0 %v7895_v30  ;;  %6430 = vmatprep.subr.bf16.mxu1 %v7895_v30 }
 0x394   : > { %5855 = vmatmul.mubr.msk.f32.vlgmr.msra.gmra.mrb[84].mxu0 %vm2583_vm15, %v4970_v7  ;;  %5874 = vmatmul.mubr.msk.f32.vlgmr.msra.gmra.mrb[108].mxu1 %vm2583_vm15, %v4974_v27 }
 0x395   : > { %6416 = vmatpush3.bf16.msra.mxu0 %v7895_v30  ;;  %6432 = vmatpush3.bf16.msra.mxu1 %v7895_v30 }
 0x396   : > { %6418 = vmatprep.subr.bf16.mxu0 %v7901_v40  ;;  %6434 = vmatprep.subr.bf16.mxu1 %v7901_v40 }
 0x397   : > { %5892 = vmatprep.mubr.msk.f32.mxu0 %vm2583_vm15, %v4977_v50  ;;  %5911 = vmatprep.mubr.msk.f32.mxu1 %vm2583_vm15, %v4981_v18 }
 0x399   : > { %6420 = vmatpush3.bf16.msra.mxu0 %v7901_v40  ;;  %6436 = vmatpush3.bf16.msra.mxu1 %v7901_v40 }
 0x39a   : > { %6422 = vmatprep.subr.bf16.mxu0 %v7907_v59  ;;  %6438 = vmatprep.subr.bf16.mxu1 %v7907_v59 }
 0x39d   : > { %6424 = vmatpush3.bf16.msra.mxu0 %v7907_v59  ;;  %6440 = vmatpush3.bf16.msra.mxu1 %v7907_v59 }
 0x39e   : > { %6426 = vmatprep.subr.bf16.mxu0 %v7913_v5  ;;  %6442 = vmatprep.subr.bf16.mxu1 %v7913_v5 }
 0x3a1   : > { %6428 = vmatpush3.bf16.msra.mxu0 %v7913_v5  ;;  %6444 = vmatpush3.bf16.msra.mxu1 %v7913_v5 }
 0x3a2   : > { %6446 = vmatprep.subr.bf16.mxu0 %v7895_v30  ;;  %6462 = vmatprep.subr.bf16.mxu1 %v6461_v23 }
 0x3a4   : > { %5893 = vmatmul.mubr.msk.f32.vlgmr.msra.gmra.mrb[86].mxu0 %vm2583_vm15, %v4978_v1  ;;  %5912 = vmatmul.mubr.msk.f32.vlgmr.msra.gmra.mrb[110].mxu1 %vm2583_vm15, %v4982_v41  ;;  %v3220_v41 = vrot.slane %v2579_v14, %v7750_v62 }
 0x3a5   : > { %6448 = vmatpush3.bf16.msra.mxu0 %v7895_v30  ;;  %5930 = vmatprep.mubr.msk.f32.mxu0 %vm2583_vm15, %v4985_v39  ;;  %v3312_v39 = vrot.slane %v2579_v14, %v7825_v12 }
 0x3a6   : > { %6450 = vmatprep.subr.bf16.mxu0 %v7901_v40  ;;  %6464 = vmatpush3.bf16.msra.mxu1 %v6461_v23 }
 0x3a7   : > { %6466 = vmatprep.subr.bf16.mxu1 %v6465_v58 }
 0x3a9   : > { %6452 = vmatpush3.bf16.msra.mxu0 %v7901_v40  ;;  %v2852_v40 = vrot.slane %v2579_v14, %v7584_v0 }
 0x3aa   : > { %6454 = vmatprep.subr.bf16.mxu0 %v7907_v59  ;;  %6468 = vmatpush3.bf16.msra.mxu1 %v6465_v58 }
 0x3ab   : > { %6470 = vmatprep.subr.bf16.mxu1 %v6469_v46 }
 0x3ad   : > { %6456 = vmatpush3.bf16.msra.mxu0 %v7907_v59 }
 0x3ae   : > { %6458 = vmatprep.subr.bf16.mxu0 %v7913_v5  ;;  %6472 = vmatpush3.bf16.msra.mxu1 %v6469_v46 }
 0x3af   : > { %6474 = vmatprep.subr.bf16.mxu1 %v6473_v35 }
 0x3b1   : > { %6460 = vmatpush3.bf16.msra.mxu0 %v7913_v5  ;;  %v3036_v5 = vrot.slane %v2579_v14, %v7665_v13 }
 0x3b2   : > { %6476 = vmatpush3.bf16.msra.mxu1 %v6473_v35  ;;  %v4989_v35 = vld [vmem:[%s8658_s7 + $0x8] ss:$0 sm:$0xff] }
 0x3b4   : > { %5931 = vmatmul.mubr.msk.f32.vlgmr.msra.gmra.mrb[88].mxu0 %vm2583_vm15, %v4986_v4 }
 0x447   : > { %v5780_v43 = vpop.f32.mrb[80].mxu0  ;;  %v5799_v49 = vpop.f32.mrb[104].mxu1 }
 0x448   : > { %v2670_v32 = vmul.f32 %v5780_v43, %v2668_v17  ;;  %v2762_v30 = vmul.f32 %v5799_v49, %v2760_v34  ;;  %v2656_v33 = vpop.f32.mrb[81].mxu0  ;;  %v2748_v55 = vpop.f32.mrb[105].mxu1 }
 0x449   : > { %v2669_v15 = vmul.f32 %v2668_v17, %v2656_v33  ;;  %v2761_v28 = vmul.f32 %v2760_v34, %v2748_v55 }
 0x44a   : > { %v2764_v51 = vadd.f32 %v2762_v30, %v2670_v32 }
 0x44b   : > { %v2763_v31 = vadd.f32 %v2761_v28, %v2669_v15  ;;  %v6687_v28 = vmov 0.0|0.0  }
 0x44c   : > { %6477 = vmatprep.subr.bf16.mxu0 %v6687_v28  ;;  %6489 = vmatprep.subr.bf16.mxu1 %v6687_v28 }
 0x457   : > { %v5818_v56 = vpop.f32.mrb[82].mxu0  ;;  %v5837_v38 = vpop.f32.mrb[106].mxu1 }
 0x458   : > { %v2854_v36 = vmul.f32 %v5818_v56, %v2852_v40  ;;  %v2840_v6 = vpop.f32.mrb[83].mxu0  ;;  %v2946_v47 = vmul.f32 %v5837_v38, %v2944_v42  ;;  %v2932_v59 = vpop.f32.mrb[107].mxu1 }
 0x459   : > { %v2853_v60 = vmul.f32 %v2852_v40, %v2840_v6  ;;  %v2945_v45 = vmul.f32 %v2944_v42, %v2932_v59  ;;  %v4999_v59 = vld [vmem:[%s8660_s9 + $0x10] sm:$0xf] }
 0x45a   : > { %v2856_v11 = vadd.f32 %v2854_v36, %v2764_v51  ;;  %v6689_v51 = vmov 0.0  }
 0x45b   : > { %v2855_v61 = vadd.f32 %v2853_v60, %v2763_v31  ;;  %5956 = vmatprep.mubr.msk.f32.mxu0 %vm6688_vm11, %v6689_v51  ;;  %v4993_v60 = vld [vmem:[%s8660_s9 + $0x4] sm:$0xf] }
 0x45c   : > { %v2948_v10 = vadd.f32 %v2946_v47, %v2856_v11  ;;  %v3512_v47 = vld [vmem:[%s8660_s9] sm:$0xf]  ;;  %v4995_v11 = vld [vmem:[%s8660_s9 + $0x8] sm:$0xf] }
 0x45d   : > { %v2947_v37 = vadd.f32 %v2945_v45, %v2855_v61  ;;  %v5003_v45 = vld [vmem:[%s8660_s9 + $0x18] sm:$0xf]  ;;  %v5007_v61 = vld [vmem:[%s8660_s9 + $0x20] sm:$0xf] }
 0x467   : > { %v5856_v8 = vpop.f32.mrb[84].mxu0  ;;  %v5875_v54 = vpop.f32.mrb[108].mxu1 }
 0x468   : > { %v3038_v2 = vmul.f32 %v5856_v8, %v3036_v5  ;;  %v3024_v3 = vpop.f32.mrb[85].mxu0  ;;  %v3130_v57 = vmul.f32 %v5875_v54, %v3128_v19  ;;  %v3116_v20 = vpop.f32.mrb[109].mxu1  ;;  %v4244_v54 = vld [vmem:[%s8662_s11] sm:$0xff] }
 0x469   : > { %v3037_v53 = vmul.f32 %v3036_v5, %v3024_v3  ;;  %v3129_v7 = vmul.f32 %v3128_v19, %v3116_v20  ;;  %v4247_v5 = vld [vmem:[%s8662_s11 + $0x18] sm:$0xff]  ;;  %v5001_v19 = vld [vmem:[%s8660_s9 + $0x14] sm:$0xf]  ;;  %v4249_v20 = vld [vmem:[%s8662_s11 + $0x28] sm:$0xff] }
 0x46a   : > { %v3040_v27 = vadd.f32 %v3038_v2, %v2948_v10  ;;  %v4997_v10 = vld [vmem:[%s8660_s9 + $0xc] sm:$0xf]  ;;  %v4246_v2 = vld [vmem:[%s8662_s11 + $0x10] sm:$0xff]  ;;  %v5005_v3 = vld [vmem:[%s8660_s9 + $0x1c] sm:$0xf] }
 0x46b   : > { %v3039_v50 = vadd.f32 %v3037_v53, %v2947_v37  ;;  %v4245_v37 = vld [vmem:[%s8662_s11 + $0x8] sm:$0xff]  ;;  %v4251_v53 = vld [vmem:[%s8662_s11 + $0x38] sm:$0xff] }
 0x46c   : > { %v3132_v18 = vadd.f32 %v3130_v57, %v3040_v27  ;;  %v6504_v8 = vpack.c.bf16 %v4247_v5, %v4245_v37  ;;  %v6506_v57 = vpack.c.bf16 %v4246_v2, %v4244_v54  ;;  %v4248_v27 = vld [vmem:[%s8662_s11 + $0x20] sm:$0xff]  ;;  %v4418_v37 = vld [vmem:[%s8665_s14 + $0x38] sm:$0xff]  ;;  %v4417_v54 = vld [vmem:[%s8665_s14 + $0x30] sm:$0xff] }
 0x46d   : > { %v3131_v1 = vadd.f32 %v3129_v7, %v3039_v50  ;;  %v6508_v7 = vpack.c.bf16 %v4251_v53, %v4249_v20  ;;  %v4250_v50 = vld [vmem:[%s8662_s11 + $0x30] sm:$0xff]  ;;  %v4420_v2 = vld [vmem:[%s8665_s14 + $0x48] sm:$0xff]  ;;  %v4419_v53 = vld [vmem:[%s8665_s14 + $0x40] sm:$0xff] }
 0x477   : > { %v5894_v4 = vpop.f32.mrb[86].mxu0  ;;  %v5913_v44 = vpop.f32.mrb[110].mxu1 }
 0x478   : > { %v3222_v22 = vmul.f32 %v5894_v4, %v3220_v41  ;;  %v3208_v21 = vpop.f32.mrb[87].mxu0  ;;  %v3314_v23 = vmul.f32 %v5913_v44, %v3312_v39  ;;  %v3300_v9 = vpop.f32.mrb[111].mxu1  ;;  %v4252_v4 = vld [vmem:[%s8662_s11 + $0x40] sm:$0xff]  ;;  %v4254_v44 = vld [vmem:[%s8662_s11 + $0x50] sm:$0xff] }
 0x479   : > { %v3221_v58 = vmul.f32 %v3220_v41, %v3208_v21  ;;  %v3313_v26 = vmul.f32 %v3312_v39, %v3300_v9  ;;  %v4255_v41 = vld [vmem:[%s8662_s11 + $0x58] sm:$0xff]  ;;  %v4257_v21 = vld [vmem:[%s8662_s11 + $0x68] sm:$0xff] }
 0x47a   : > { %v3224_v29 = vadd.f32 %v3222_v22, %v3132_v18  ;;  %v6510_v18 = vpack.c.bf16 %v4250_v50, %v4248_v27  ;;  %v6514_v22 = vpack.c.bf16 %v4254_v44, %v4252_v4  ;;  %v4424_v27 = vld [vmem:[%s8665_s14 + $0x68] sm:$0xff]  ;;  %v4426_v50 = vld [vmem:[%s8665_s14 + $0x78] sm:$0xff] }
 0x47b   : > { %v3223_v46 = vadd.f32 %v3221_v58, %v3131_v1  ;;  %v4253_v1 = vld [vmem:[%s8662_s11 + $0x48] sm:$0xff]  ;;  %v4256_v58 = vld [vmem:[%s8662_s11 + $0x60] sm:$0xff]  ;;  %v4430_v44 = vld [vmem:[%s8665_s14 + $0x98] sm:$0xff] }
 0x47c   : > { %v3316_v48 = vadd.f32 %v3314_v23, %v3224_v29  ;;  %v6512_v39 = vpack.c.bf16 %v4255_v41, %v4253_v1  ;;  %v4259_v23 = vld [vmem:[%s8662_s11 + $0x78] sm:$0xff]  ;;  %v6548_v1 = vpack.c.bf16 %v4426_v50, %v4424_v27  ;;  %v4423_v41 = vld [vmem:[%s8665_s14 + $0x60] sm:$0xff]  ;;  %v4428_v4 = vld [vmem:[%s8665_s14 + $0x88] sm:$0xff] }
 0x47d   : > { %v3315_v52 = vadd.f32 %v3313_v26, %v3223_v46  ;;  %v6516_v9 = vpack.c.bf16 %v4259_v23, %v4257_v21  ;;  %v4258_v26 = vld [vmem:[%s8662_s11 + $0x70] sm:$0xff]  ;;  %v4261_v46 = vld [vmem:[%s8662_s11 + $0x88] sm:$0xff]  ;;  %v6552_v21 = vpack.c.bf16 %v4430_v44, %v4428_v4  ;;  %v4427_v23 = vld [vmem:[%s8665_s14 + $0x80] sm:$0xff] }
 0x47e   : > { %v6518_v29 = vpack.c.bf16 %v4258_v26, %v4256_v58  ;;  %v4432_v58 = vld [vmem:[%s8665_s14 + $0xa8] sm:$0xff]  ;;  %v4434_v26 = vld [vmem:[%s8665_s14 + $0xb8] sm:$0xff] }
 0x487   : > { %v5932_v17 = vpop.f32.mrb[88].mxu0 }
 0x488   : > { %v3406_v34 = vmul.f32 %v5932_v17, %v4989_v35  ;;  %v3392_v43 = vpop.f32.mrb[89].mxu0  ;;  %v4262_v17 = vld [vmem:[%s8662_s11 + $0x90] sm:$0xff] }
 0x489   : > { %v3405_v14 = vmul.f32 %v4989_v35, %v3392_v43  ;;  %v4260_v35 = vld [vmem:[%s8662_s11 + $0x80] sm:$0xff]  ;;  %v4265_v43 = vld [vmem:[%s8662_s11 + $0xa8] sm:$0xff] }
 0x48a   : > { %v3408_v49 = vadd.f32 %v3406_v34, %v3316_v48  ;;  %v4263_v48 = vld [vmem:[%s8662_s11 + $0x98] sm:$0xff]  ;;  %v6522_v34 = vpack.c.bf16 %v4262_v17, %v4260_v35  ;;  %v4436_v35 = vld [vmem:[%s8665_s14 + $0xc8] sm:$0xff] }
 0x48b   : > { %v3407_v32 = vadd.f32 %v3405_v14, %v3315_v52  ;;  %v6520_v52 = vpack.c.bf16 %v4263_v48, %v4261_v46  ;;  %v4267_v14 = vld [vmem:[%s8662_s11 + $0xb8] sm:$0xff]  ;;  %v6556_v46 = vpack.c.bf16 %v4434_v26, %v4432_v58  ;;  %v4431_v48 = vld [vmem:[%s8665_s14 + $0xa0] sm:$0xff] }
 0x48c   : > { %v3412_v30 = vmul.f32 0.2, %v3408_v49  ;;  %vm3410_vm9 = vcmp.ge.f32.partialorder %v3408_v49, 0.0  ;;  %v4438_v17 = vld [vmem:[%s8665_s14 + $0xd8] sm:$0xff] }
 0x48d   : > { %v3411_v33 = vmul.f32 0.2, %v3407_v32  ;;  %vm3409_vm10 = vcmp.ge.f32.partialorder %v3407_v32, 0.0 }
 0x48e   : > { %v3414_v15 = vsel %vm3410_vm9, %v3408_v49, %v3412_v30  ;;  %v6524_v49 = vpack.c.bf16 %v4267_v14, %v4265_v43  ;;  %v4266_v30 = vld [vmem:[%s8662_s11 + $0xb0] sm:$0xff]  ;;  %v6560_v43 = vpack.c.bf16 %v4438_v17, %v4436_v35  ;;  %v4435_v14 = vld [vmem:[%s8665_s14 + $0xc0] sm:$0xff] }
 0x48f   : > { %v3413_v55 = vsel %vm3409_vm10, %v3407_v32, %v3411_v33  ;;  %v4264_v32 = vld [vmem:[%s8662_s11 + $0xa0] sm:$0xff] }
 0x490   : > { %5949 = vmatprep.mubr.msk.f32.mxu1 %vm2583_vm15, %v3413_v55  ;;  %v6526_v33 = vpack.c.bf16 %v4266_v30, %v4264_v32  ;;  %v4269_v55 = vld [vmem:[%s8662_s11 + $0xc8] sm:$0xff]  ;;  %v4442_v30 = vld [vmem:[%s8665_s14 + $0xf8] sm:$0xff] }
 0x491   : > { %5950 = vmatmul.mubr.msk.f32.vlgmr.msra.gmra.mrb[112].mxu1 %vm2583_vm15, %v3414_v15  ;;  %v4271_v15 = vld [vmem:[%s8662_s11 + $0xd8] sm:$0xff]  ;;  %v4440_v32 = vld [vmem:[%s8665_s14 + $0xe8] sm:$0xff] }
 0x492   : > { %5984 = vmatprep.mubr.msk.f32.mxu1 %vm6688_vm11, %v6689_v51 }
 0x564   : > { %v5951_v31 = vpop.f32.mrb[112].mxu1 }
 0x565   : > { %vm3505_vm12 = vcmp.ge.f32.partialorder %v5951_v31, 0.0  ;;  %v3507_v40 = vmul.f32 0.2, %v5951_v31  ;;  %v3495_v42 = vpop.f32.mrb[113].mxu1 }
 0x566   : > { %vm3504_vm13 = vcmp.ge.f32.partialorder %v3495_v42, 0.0  ;;  %v3506_v56 = vmul.f32 0.2, %v3495_v42 }
 0x567   : > { %v3509_v38 = vsel %vm3505_vm12, %v5951_v31, %v3507_v40  ;;  %v4270_v31 = vld [vmem:[%s8662_s11 + $0xd0] sm:$0xff] }
 0x568   : > { %v3508_v36 = vsel %vm3504_vm13, %v3495_v42, %v3506_v56  ;;  %v4273_v42 = vld [vmem:[%s8662_s11 + $0xe8] sm:$0xff]  ;;  %v4275_v56 = vld [vmem:[%s8662_s11 + $0xf8] sm:$0xff] }
 0x569   : > { %v6478_v6 = vpack.c.bf16 %v3509_v38, %v3508_v36  ;;  %v6532_v38 = vpack.c.bf16 %v4275_v56, %v4273_v42  ;;  %v4272_v36 = vld [vmem:[%s8662_s11 + $0xe0] sm:$0xff] }
 0x56a   : > { %v4443_v56 = vld [vmem:[%s8665_s14 + $0x100] sm:$0xff] }
 0x56b   : > { %6479 = vmatpush3.bf16.msra.mxu0 %v6478_v6  ;;  %6491 = vmatpush3.bf16.msra.mxu1 %v6478_v6 }
 0x56c   : > { %6480 = vmatprep.subr.bf16.mxu0 %v6687_v28  ;;  %6495 = vmatprep.subr.bf16.mxu1 %v6687_v28 }
 0x56e   : > { %5957 = vmatmul.mubr.msk.f32.vlgmr.msra.gmra.mrb[90].mxu0 %vm3513_vm14, %v3512_v47  ;;  %5985 = vmatmul.mubr.msk.f32.vlgmr.msra.gmra.mrb[114].mxu1 %vm3513_vm14, %v4999_v59  ;;  %v4412_v59 = vld [vmem:[%s8665_s14 + $0x8] sm:$0xff] }
 0x56f   : > { %6482 = vmatpush3.bf16.msra.mxu0 %v6478_v6  ;;  %6497 = vmatpush3.bf16.msra.mxu1 %v6478_v6 }
 0x570   : > { %5963 = vmatprep.mubr.msk.f32.mxu0 %vm6688_vm11, %v6689_v51  ;;  %6483 = vmatprep.subr.bf16.mxu0 %v6687_v28 }
 0x571   : > { %5998 = vmatprep.mubr.msk.f32.mxu1 %vm6688_vm11, %v6689_v51  ;;  %6501 = vmatprep.subr.bf16.mxu1 %v6687_v28 }
 0x572   : > { %5964 = vmatmul.mubr.msk.f32.vlgmr.msra.gmra.mrb[92].mxu0 %vm3513_vm14, %v4993_v60  ;;  %5999 = vmatmul.mubr.msk.f32.vlgmr.msra.gmra.mrb[116].mxu1 %vm3513_vm14, %v5003_v45  ;;  %v4414_v60 = vld [vmem:[%s8665_s14 + $0x18] sm:$0xff]  ;;  %v4411_v45 = vld [vmem:[%s8665_s14] sm:$0xff] }
 0x573   : > { %6485 = vmatpush3.bf16.msra.mxu0 %v6478_v6  ;;  %6503 = vmatpush3.bf16.msra.mxu1 %v6478_v6 }
 0x574   : > { %5970 = vmatprep.mubr.msk.f32.mxu0 %vm6688_vm11, %v6689_v51  ;;  %6486 = vmatprep.subr.bf16.mxu0 %v6687_v28 }
 0x575   : > { %6012 = vmatprep.mubr.msk.f32.mxu1 %vm6688_vm11, %v6689_v51 }
 0x576   : > { %5971 = vmatmul.mubr.msk.f32.vlgmr.msra.gmra.mrb[94].mxu0 %vm3513_vm14, %v4995_v11  ;;  %6013 = vmatmul.mubr.msk.f32.vlgmr.msra.gmra.mrb[118].mxu1 %vm3513_vm14, %v5007_v61  ;;  %v6536_v11 = vpack.c.bf16 %v4414_v60, %v4412_v59  ;;  %v4413_v61 = vld [vmem:[%s8665_s14 + $0x10] sm:$0xff]  ;;  %v4447_v60 = vld [vmem:[%s8665_s14 + $0x120] sm:$0xff] }
 0x577   : > { %6488 = vmatpush3.bf16.msra.mxu0 %v6478_v6  ;;  %5977 = vmatprep.mubr.msk.f32.mxu0 %vm6688_vm11, %v6689_v51  ;;  %v6538_v5 = vpack.c.bf16 %v4413_v61, %v4411_v45  ;;  %v4449_v45 = vld [vmem:[%s8665_s14 + $0x130] sm:$0xff]  ;;  %v4454_v61 = vld [vmem:[%s8665_s14 + $0x158] sm:$0xff] }
 0x578   : > { %6492 = vmatprep.subr.bf16.mxu0 %v6687_v28  ;;  %6537 = vmatprep.subr.bf16.mxu1 %v6536_v11  ;;  %v4452_v11 = vld [vmem:[%s8665_s14 + $0x148] sm:$0xff] }
 0x579   : > { %6539 = vmatpush1.bf16.msra.mxu1 %v6538_v5  ;;  %v4451_v5 = vld [vmem:[%s8665_s14 + $0x140] sm:$0xff] }
 0x57a   : > { %5978 = vmatmul.mubr.msk.f32.vlgmr.msra.gmra.mrb[96].mxu0 %vm3513_vm14, %v4997_v10  ;;  %v4416_v10 = vld [vmem:[%s8665_s14 + $0x28] sm:$0xff] }
 0x57b   : > { %6494 = vmatpush3.bf16.msra.mxu0 %v6478_v6  ;;  %5991 = vmatprep.mubr.msk.f32.mxu0 %vm6688_vm11, %v6689_v51 }
 0x57c   : > { %6498 = vmatprep.subr.bf16.mxu0 %v6687_v28  ;;  %v6528_v28 = vpack.c.bf16 %v4271_v15, %v4269_v55  ;;  %v6564_v55 = vpack.c.bf16 %v4442_v30, %v4440_v32  ;;  %v4439_v15 = vld [vmem:[%s8665_s14 + $0xe0] sm:$0xff] }
 0x57e   : > { %5992 = vmatmul.mubr.msk.f32.vlgmr.msra.gmra.mrb[98].mxu0 %vm3513_vm14, %v5001_v19  ;;  %v6540_v19 = vpack.c.bf16 %v4418_v37, %v4416_v10  ;;  %v6574_v10 = vpack.c.bf16 %v4449_v45, %v4447_v60  ;;  %v6576_v37 = vpack.c.bf16 %v4454_v61, %v4452_v11  ;;  %v4459_v45 = vld [vmem:[%s8665_s14 + $0x180] sm:$0xff]  ;;  %v4461_v11 = vld [vmem:[%s8665_s14 + $0x190] sm:$0xff] }
 0x57f   : > { %6500 = vmatpush3.bf16.msra.mxu0 %v6478_v6  ;;  %6005 = vmatprep.mubr.msk.f32.mxu0 %vm6688_vm11, %v6689_v51  ;;  %v4274_v6 = vld [vmem:[%s8662_s11 + $0xf0] sm:$0xff]  ;;  %v6586_v61 = vpack.c.bf16 %v4461_v11, %v4459_v45  ;;  %vm4728_vm11 = vcmask 0  }
 0x580   : > { %6505 = vmatprep.subr.bf16.mxu0 %v6504_v8  ;;  %v6534_v47 = vpack.c.bf16 %v4274_v6, %v4272_v36  ;;  %v4415_v8 = vld [vmem:[%s8665_s14 + $0x20] sm:$0xff]  ;;  %6541 = vmatprep.subr.bf16.mxu1 %v6540_v19  ;;  %v4448_v36 = vld [vmem:[%s8665_s14 + $0x128] sm:$0xff]  ;;  %v4450_v6 = vld [vmem:[%s8665_s14 + $0x138] sm:$0xff] }
 0x581   : > { %v6572_v59 = vpack.c.bf16 %v4450_v6, %v4448_v36  ;;  %v4453_v19 = vld [vmem:[%s8665_s14 + $0x150] sm:$0xff] }
 0x582   : > { %6006 = vmatmul.mubr.msk.f32.vlgmr.msra.gmra.mrb[100].mxu0 %vm3513_vm14, %v5005_v3  ;;  %v4422_v3 = vld [vmem:[%s8665_s14 + $0x58] sm:$0xff]  ;;  %v4457_v36 = vld [vmem:[%s8665_s14 + $0x170] sm:$0xff] }
 0x583   : > { %6507 = vmatpush1.bf16.msra.mxu0 %v6506_v57  ;;  %4340 = vmatprep.mubr.f32.mxu0 %v6689_v51  ;;  %v4268_v51 = vld [vmem:[%s8662_s11 + $0xc0] sm:$0xff]  ;;  %v6542_v57 = vpack.c.bf16 %v4417_v54, %v4415_v8  ;;  %v6544_v20 = vpack.c.bf16 %v4422_v3, %v4420_v2  ;;  %v4456_v8 = vld [vmem:[%s8665_s14 + $0x168] sm:$0xff]  ;;  %v4458_v54 = vld [vmem:[%s8665_s14 + $0x178] sm:$0xff]  ;;  %v6578_v2 = vpack.c.bf16 %v4453_v19, %v4451_v5 }
 0x584   : > { %6509 = vmatprep.subr.bf16.mxu0 %v6508_v7  ;;  %v6530_v40 = vpack.c.bf16 %v4270_v31, %v4268_v51  ;;  %v4421_v7 = vld [vmem:[%s8665_s14 + $0x50] sm:$0xff]  ;;  %v4444_v51 = vld [vmem:[%s8665_s14 + $0x108] sm:$0xff]  ;;  %v4446_v31 = vld [vmem:[%s8665_s14 + $0x118] sm:$0xff]  ;;  %v6580_v3 = vpack.c.bf16 %v4458_v54, %v4456_v8 }
 0x585   : > { %6543 = vmatpush1.bf16.msra.mxu1 %v6542_v57  ;;  %v6568_v42 = vpack.c.bf16 %v4446_v31, %v4444_v51  ;;  %v3510_v57 = vld [vmem:[%s8661_s10] sm:$0xff]  ;;  %v4465_v8 = vld [vmem:[%s8665_s14 + $0x1b0] sm:$0xff] }
 0x586   : > { %6545 = vmatprep.subr.bf16.mxu1 %v6544_v20  ;;  %v3671_v50 = vrot.slane %v3510_v57, %v7581_v25  ;;  %v4463_v19 = vld [vmem:[%s8665_s14 + $0x1a0] sm:$0xff] }
 0x587   : > { %6511 = vmatpush1.bf16.msra.mxu0 %v6510_v18  ;;  %v6546_v18 = vpack.c.bf16 %v4421_v7, %v4419_v53  ;;  %v3590_v7 = vrot.slane %v3510_v57, %v7578_v24  ;;  %v3914_v24 = vrot.slane %v3510_v57, %v7665_v13  ;;  %v5009_v13 = vld [vmem:[%s8661_s10 + $0x8] ss:$0 sm:$0xff]  ;;  %v6590_v54 = vpack.c.bf16 %v4465_v8, %v4463_v19 }
 0x588   : > { %6513 = vmatprep.subr.bf16.mxu0 %v6512_v39  ;;  %v4425_v39 = vld [vmem:[%s8665_s14 + $0x70] sm:$0xff] }
 0x589   : > { %6547 = vmatpush1.bf16.msra.mxu1 %v6546_v18 }
 0x58a   : > { %6549 = vmatprep.subr.bf16.mxu1 %v6548_v1 }
 0x58b   : > { %6515 = vmatpush1.bf16.msra.mxu0 %v6514_v22  ;;  %v6550_v22 = vpack.c.bf16 %v4425_v39, %v4423_v41 }
 0x58c   : > { %6517 = vmatprep.subr.bf16.mxu0 %v6516_v9  ;;  %v4429_v9 = vld [vmem:[%s8665_s14 + $0x90] sm:$0xff] }
 0x58d   : > { %6551 = vmatpush1.bf16.msra.mxu1 %v6550_v22  ;;  %v3752_v22 = vrot.slane %v3510_v57, %v7584_v0  ;;  %v4076_v0 = vrot.slane %v3510_v57, %v7750_v62 }
 0x58e   : > { %6553 = vmatprep.subr.bf16.mxu1 %v6552_v21 }
 0x58f   : > { %6519 = vmatpush1.bf16.msra.mxu0 %v6518_v29  ;;  %v6554_v29 = vpack.c.bf16 %v4429_v9, %v4427_v23 }
 0x590   : > { %6521 = vmatprep.subr.bf16.mxu0 %v6520_v52  ;;  %v4433_v52 = vld [vmem:[%s8665_s14 + $0xb0] sm:$0xff] }
 0x591   : > { %6555 = vmatpush1.bf16.msra.mxu1 %v6554_v29 }
 0x592   : > { %6557 = vmatprep.subr.bf16.mxu1 %v6556_v46  ;;  %v3833_v46 = vrot.slane %v3510_v57, %v7662_v16  ;;  %v4157_v16 = vrot.slane %v3510_v57, %v7825_v12  ;;  %v4455_v12 = vld [vmem:[%s8665_s14 + $0x160] sm:$0xff] }
 0x593   : > { %6523 = vmatpush1.bf16.msra.mxu0 %v6522_v34  ;;  %v6558_v34 = vpack.c.bf16 %v4433_v52, %v4431_v48  ;;  %v6582_v6 = vpack.c.bf16 %v4457_v36, %v4455_v12 }
 0x594   : > { %6525 = vmatprep.subr.bf16.mxu0 %v6524_v49  ;;  %v4437_v49 = vld [vmem:[%s8665_s14 + $0xd0] sm:$0xff] }
 0x595   : > { %6559 = vmatpush1.bf16.msra.mxu1 %v6558_v34 }
 0x596   : > { %6561 = vmatprep.subr.bf16.mxu1 %v6560_v43  ;;  %v3995_v43 = vrot.slane %v3510_v57, %v7742_v63 }
 0x597   : > { %6527 = vmatpush1.bf16.msra.mxu0 %v6526_v33  ;;  %v6562_v33 = vpack.c.bf16 %v4437_v49, %v4435_v14 }
 0x598   : > { %6529 = vmatprep.subr.bf16.mxu0 %v6528_v28  ;;  %v4441_v28 = vld [vmem:[%s8665_s14 + $0xf0] sm:$0xff] }
 0x599   : > { %6563 = vmatpush1.bf16.msra.mxu1 %v6562_v33 }
 0x59a   : > { %6565 = vmatprep.subr.bf16.mxu1 %v6564_v55 }
 0x59b   : > { %6531 = vmatpush1.bf16.msra.mxu0 %v6530_v40  ;;  %v6566_v40 = vpack.c.bf16 %v4441_v28, %v4439_v15 }
 0x59c   : > { %6533 = vmatprep.subr.bf16.mxu0 %v6532_v38  ;;  %v4445_v38 = vld [vmem:[%s8665_s14 + $0x110] sm:$0xff] }
 0x59d   : > { %6567 = vmatpush1.bf16.msra.mxu1 %v6566_v40 }
 0x59e   : > { %6569 = vmatprep.subr.bf16.mxu1 %v6568_v42 }
 0x59f   : > { %6535 = vmatpush1.bf16.msra.mxu0 %v6534_v47  ;;  %v6570_v47 = vpack.c.bf16 %v4445_v38, %v4443_v56 }
 0x5a1   : > { %6571 = vmatpush1.bf16.msra.mxu1 %v6570_v47  ;;  %v4460_v47 = vld [vmem:[%s8665_s14 + $0x188] sm:$0xff] }
 0x5a2   : > { %6573 = vmatprep.subr.bf16.mxu1 %v6572_v59  ;;  %v4462_v59 = vld [vmem:[%s8665_s14 + $0x198] sm:$0xff] }
 0x5a3   : > { %v6584_v60 = vpack.c.bf16 %v4462_v59, %v4460_v47  ;;  %v4596_v47 = vld [vmem:[%s8668_s17 + $0xd0] sm:$0xff]  ;;  %v4599_v59 = vld [vmem:[%s8668_s17 + $0xe8] sm:$0xff] }
 0x5a5   : > { %6575 = vmatpush1.bf16.msra.mxu1 %v6574_v10  ;;  %v4464_v10 = vld [vmem:[%s8665_s14 + $0x1a8] sm:$0xff] }
 0x5a6   : > { %6577 = vmatprep.subr.bf16.mxu1 %v6576_v37  ;;  %v4466_v37 = vld [vmem:[%s8665_s14 + $0x1b8] sm:$0xff] }
 0x5a7   : > { %v6588_v5 = vpack.c.bf16 %v4466_v37, %v4464_v10  ;;  %v4600_v10 = vld [vmem:[%s8668_s17 + $0xf0] sm:$0xff]  ;;  %v4603_v37 = vld [vmem:[%s8668_s17 + $0x108] sm:$0xff] }
 0x5a9   : > { %6579 = vmatpush1.bf16.msra.mxu1 %v6578_v2  ;;  %v4468_v2 = vld [vmem:[%s8665_s14 + $0x1c8] sm:$0xff] }
 0x5aa   : > { %6581 = vmatprep.subr.bf16.mxu1 %v6580_v3  ;;  %v4470_v3 = vld [vmem:[%s8665_s14 + $0x1d8] sm:$0xff] }
 0x5ab   : > { %v6592_v57 = vpack.c.bf16 %v4470_v3, %v4468_v2  ;;  %v4604_v2 = vld [vmem:[%s8668_s17 + $0x110] sm:$0xff]  ;;  %v4607_v3 = vld [vmem:[%s8668_s17 + $0x128] sm:$0xff] }
 0x5ad   : > { %6583 = vmatpush1.bf16.msra.mxu1 %v6582_v6  ;;  %v4594_v6 = vld [vmem:[%s8668_s17 + $0xc0] sm:$0xff] }
 0x5ae   : > { %6585 = vmatprep.subr.bf16.mxu1 %v6584_v60  ;;  %v4601_v60 = vld [vmem:[%s8668_s17 + $0xf8] sm:$0xff]  ;;  %v6626_v45 = vpack.c.bf16 %v4596_v47, %v4594_v6 }
 0x5af   : > { %v6628_v11 = vpack.c.bf16 %v4601_v60, %v4599_v59 }
 0x5b1   : > { %6587 = vmatpush1.bf16.msra.mxu1 %v6586_v61  ;;  %v4598_v61 = vld [vmem:[%s8668_s17 + $0xe0] sm:$0xff] }
 0x5b2   : > { %6589 = vmatprep.subr.bf16.mxu1 %v6588_v5  ;;  %v4605_v5 = vld [vmem:[%s8668_s17 + $0x118] sm:$0xff]  ;;  %v6630_v19 = vpack.c.bf16 %v4600_v10, %v4598_v61 }
 0x5b3   : > { %v6632_v8 = vpack.c.bf16 %v4605_v5, %v4603_v37 }
 0x5b5   : > { %6591 = vmatpush1.bf16.msra.mxu1 %v6590_v54  ;;  %v4602_v54 = vld [vmem:[%s8668_s17 + $0x100] sm:$0xff] }
 0x5b6   : > { %6593 = vmatprep.subr.bf16.mxu1 %v6592_v57  ;;  %v4609_v57 = vld [vmem:[%s8668_s17 + $0x138] sm:$0xff] }
 0x641   : > { %v3583_v20 = vpop.f32.mrb[90].mxu0  ;;  %v3907_v53 = vpop.f32.mrb[114].mxu1 }
 0x642   : > { %v5958_v27 = vpop.f32.mrb[91].mxu0  ;;  %v5986_v18 = vpop.f32.mrb[115].mxu1  ;;  %v3591_v39 = vmul.f32 %v3590_v7, %v3583_v20  ;;  %v3915_v17 = vmul.f32 %v3914_v24, %v3907_v53  ;;  %v4467_v20 = vld [vmem:[%s8665_s14 + $0x1c0] sm:$0xff]  ;;  %v4469_v53 = vld [vmem:[%s8665_s14 + $0x1d0] sm:$0xff] }
 0x643   : > { %v6594_v7 = vpack.c.bf16 %v4469_v53, %v4467_v20  ;;  %v4472_v27 = vld [vmem:[%s8665_s14 + $0x1e8] sm:$0xff]  ;;  %v4576_v24 = vld [vmem:[%s8668_s17 + $0x30] sm:$0xff]  ;;  %v6634_v20 = vpack.c.bf16 %v4604_v2, %v4602_v54  ;;  %v6636_v53 = vpack.c.bf16 %v4609_v57, %v4607_v3 }
 0x645   : > { %v3664_v1 = vpop.f32.mrb[92].mxu0  ;;  %v4069_v41 = vpop.f32.mrb[116].mxu1  ;;  %6595 = vmatpush1.bf16.msra.mxu1 %v6594_v7  ;;  %v4606_v7 = vld [vmem:[%s8668_s17 + $0x120] sm:$0xff] }
 0x646   : > { %v3672_v4 = vmul.f32 %v3671_v50, %v3664_v1  ;;  %v5965_v44 = vpop.f32.mrb[93].mxu0  ;;  %v6000_v21 = vpop.f32.mrb[117].mxu1  ;;  %v4077_v33 = vmul.f32 %v4076_v0, %v4069_v41  ;;  %v4474_v50 = vld [vmem:[%s8665_s14 + $0x1f8] sm:$0xff]  ;;  %v4471_v1 = vld [vmem:[%s8665_s14 + $0x1e0] sm:$0xff]  ;;  %v4473_v41 = vld [vmem:[%s8665_s14 + $0x1f0] sm:$0xff] }
 0x647   : > { %v6596_v18 = vpack.c.bf16 %v4474_v50, %v4472_v27  ;;  %v4573_v44 = vld [vmem:[%s8668_s17 + $0x18] sm:$0xff]  ;;  %v4608_v27 = vld [vmem:[%s8668_s17 + $0x130] sm:$0xff]  ;;  %v4611_v50 = vld [vmem:[%s8668_s17 + $0x148] sm:$0xff] }
 0x648   : > { %v3673_v23 = vadd.f32 %v3672_v4, %v3591_v39  ;;  %v6598_v39 = vpack.c.bf16 %v4473_v41, %v4471_v1  ;;  %v4571_v4 = vld [vmem:[%s8668_s17 + $0x8] sm:$0xff]  ;;  %v4585_v0 = vld [vmem:[%s8668_s17 + $0x78] sm:$0xff]  ;;  %v6638_v1 = vpack.c.bf16 %v4608_v27, %v4606_v7 }
 0x649   : > { %v3745_v9 = vpop.f32.mrb[94].mxu0  ;;  %v4231_v58 = vpop.f32.mrb[118].mxu1  ;;  %6597 = vmatprep.subr.bf16.mxu1 %v6596_v18  ;;  %v6600_v21 = vpack.c.bf16 %v4573_v44, %v4571_v4  ;;  %v4613_v18 = vld [vmem:[%s8668_s17 + $0x158] sm:$0xff]  ;;  %v4612_v4 = vld [vmem:[%s8668_s17 + $0x150] sm:$0xff]  ;;  %v4615_v44 = vld [vmem:[%s8668_s17 + $0x168] sm:$0xff] }
 0x64a   : > { %v3753_v26 = vmul.f32 %v3752_v22, %v3745_v9  ;;  %v5972_v29 = vpop.f32.mrb[95].mxu0  ;;  %v6014_v48 = vpop.f32.mrb[119].mxu1  ;;  %v4239_v40 = vmul.f32 %v5009_v13, %v4231_v58  ;;  %6599 = vmatpush1.bf16.msra.mxu1 %v6598_v39  ;;  %v4570_v22 = vld [vmem:[%s8668_s17] sm:$0xff]  ;;  %v4575_v9 = vld [vmem:[%s8668_s17 + $0x28] sm:$0xff]  ;;  %v4577_v58 = vld [vmem:[%s8668_s17 + $0x38] sm:$0xff]  ;;  %v6640_v41 = vpack.c.bf16 %v4613_v18, %v4611_v50 }
 0x64b   : > { %v6604_v29 = vpack.c.bf16 %v4577_v58, %v4575_v9  ;;  %v4579_v48 = vld [vmem:[%s8668_s17 + $0x48] sm:$0xff]  ;;  %6601 = vmatprep.subr.bf16.mxu0 %v6600_v21  ;;  %v4610_v39 = vld [vmem:[%s8668_s17 + $0x140] sm:$0xff]  ;;  %v4616_v58 = vld [vmem:[%s8668_s17 + $0x170] sm:$0xff] }
 0x64c   : > { %v3754_v25 = vadd.f32 %v3753_v26, %v3673_v23  ;;  %v4572_v23 = vld [vmem:[%s8668_s17 + $0x10] sm:$0xff]  ;;  %v6642_v21 = vpack.c.bf16 %v4612_v4, %v4610_v39  ;;  %v4614_v9 = vld [vmem:[%s8668_s17 + $0x160] sm:$0xff]  ;;  %v4627_v27 = vld [vmem:[%s8668_s17 + $0x1c8] sm:$0xff] }
 0x64d   : > { %v3826_v52 = vpop.f32.mrb[96].mxu0  ;;  %v6602_v26 = vpack.c.bf16 %v4572_v23, %v4570_v22  ;;  %v4617_v22 = vld [vmem:[%s8668_s17 + $0x178] sm:$0xff]  ;;  %v4631_v4 = vld [vmem:[%s8668_s17 + $0x1e8] sm:$0xff] }
 0x64e   : > { %v3834_v35 = vmul.f32 %v3833_v46, %v3826_v52  ;;  %v5979_v34 = vpop.f32.mrb[97].mxu0  ;;  %v4574_v46 = vld [vmem:[%s8668_s17 + $0x20] sm:$0xff]  ;;  %v6644_v23 = vpack.c.bf16 %v4617_v22, %v4615_v44  ;;  %v4629_v50 = vld [vmem:[%s8668_s17 + $0x1d8] sm:$0xff] }
 0x64f   : > { %v6606_v52 = vpack.c.bf16 %v4576_v24, %v4574_v46  ;;  %v4580_v34 = vld [vmem:[%s8668_s17 + $0x50] sm:$0xff]  ;;  %v6646_v46 = vpack.c.bf16 %v4616_v58, %v4614_v9  ;;  %v6656_v18 = vpack.c.bf16 %v4629_v50, %v4627_v27  ;;  %v4633_v44 = vld [vmem:[%s8668_s17 + $0x1f8] sm:$0xff]  ;;  %v4552_v58 = vld [vmem:[%s8667_s16] sm:$0xff] }
 0x650   : > { %v3835_v14 = vadd.f32 %v3834_v35, %v3754_v25  ;;  %v4581_v25 = vld [vmem:[%s8668_s17 + $0x58] sm:$0xff]  ;;  %v6660_v22 = vpack.c.bf16 %v4633_v44, %v4631_v4 }
 0x651   : > { %v3988_v49 = vpop.f32.mrb[98].mxu0  ;;  %v6608_v35 = vpack.c.bf16 %v4581_v25, %v4579_v48  ;;  %v4618_v48 = vld [vmem:[%s8668_s17 + $0x180] sm:$0xff]  ;;  %v4620_v25 = vld [vmem:[%s8668_s17 + $0x190] sm:$0xff] }
 0x652   : > { %v3916_v32 = vadd.f32 %v3915_v17, %v3835_v14  ;;  %v3996_v30 = vmul.f32 %v3995_v43, %v3988_v49  ;;  %v5993_v55 = vpop.f32.mrb[99].mxu0  ;;  %v4578_v17 = vld [vmem:[%s8668_s17 + $0x40] sm:$0xff]  ;;  %v4583_v43 = vld [vmem:[%s8668_s17 + $0x68] sm:$0xff] }
 0x653   : > { %v6610_v14 = vpack.c.bf16 %v4580_v34, %v4578_v17  ;;  %v6612_v49 = vpack.c.bf16 %v4585_v0, %v4583_v43  ;;  %v4589_v55 = vld [vmem:[%s8668_s17 + $0x98] sm:$0xff]  ;;  %v6650_v17 = vpack.c.bf16 %v4620_v25, %v4618_v48  ;;  %v4353_v43 = vld [vmem:[%s8664_s13] sm:$0xff]  ;;  %v4354_v0 = vld [vmem:[%s8664_s13 + $0x8] sm:$0xff] }
 0x654   : > { %v3997_v15 = vadd.f32 %v3996_v30, %v3916_v32  ;;  %v4582_v32 = vld [vmem:[%s8668_s17 + $0x60] sm:$0xff]  ;;  %v4584_v30 = vld [vmem:[%s8668_s17 + $0x70] sm:$0xff] }
 0x655   : > { %v4150_v28 = vpop.f32.mrb[100].mxu0 }
 0x656   : > { %v4078_v51 = vadd.f32 %v4077_v33, %v3997_v15  ;;  %v4158_v31 = vmul.f32 %v4157_v16, %v4150_v28  ;;  %v6007_v63 = vpop.f32.mrb[101].mxu0  ;;  %v4587_v33 = vld [vmem:[%s8668_s17 + $0x88] sm:$0xff]  ;;  %v6614_v16 = vpack.c.bf16 %v4584_v30, %v4582_v32  ;;  %v4586_v15 = vld [vmem:[%s8668_s17 + $0x80] sm:$0xff]  ;;  %v4588_v28 = vld [vmem:[%s8668_s17 + $0x90] sm:$0xff]  ;;  %v4359_v32 = vrot.slane %v4353_v43, 4 }
 0x657   : > { %v6616_v13 = vpack.c.bf16 %v4589_v55, %v4587_v33  ;;  %v4375_v30 = vrot.slane %v4353_v43, 5  ;;  %v4356_v33 = vld [vmem:[%s8664_s13 + $0x18] sm:$0x1] }
 0x658   : > { %v4159_v42 = vadd.f32 %v4158_v31, %v4078_v51  ;;  %v4591_v51 = vld [vmem:[%s8668_s17 + $0xa8] sm:$0xff]  ;;  %v4593_v31 = vld [vmem:[%s8668_s17 + $0xb8] sm:$0xff] }
 0x659   : > { %v6620_v63 = vpack.c.bf16 %v4593_v31, %v4591_v51 }
 0x65a   : > { %v4240_v62 = vadd.f32 %v4239_v40, %v4159_v42  ;;  %v6618_v40 = vpack.c.bf16 %v4588_v28, %v4586_v15  ;;  %v4590_v42 = vld [vmem:[%s8668_s17 + $0xa0] sm:$0xff]  ;;  %v4376_v15 = vrot.slane %v4354_v0, 5 }
 0x65c   : > { %v4242_v56 = vmul.f32 0.2, %v4240_v62  ;;  %vm4241_vm15 = vcmp.ge.f32.partialorder %v4240_v62, 0.0 }
 0x65e   : > { %v4243_v38 = vsel %vm4241_vm15, %v4240_v62, %v4242_v56  ;;  %v4592_v62 = vld [vmem:[%s8668_s17 + $0xb0] sm:$0xff]  ;;  %v4595_v56 = vld [vmem:[%s8668_s17 + $0xc8] sm:$0xff] }
 0x65f   : > { %4341 = vmatmul.mubr.f32.vlgmr.msra.gmra.mrb[102].mxu0 %v4243_v38  ;;  %v4597_v38 = vld [vmem:[%s8668_s17 + $0xd8] sm:$0xff]  ;;  %v6622_v12 = vpack.c.bf16 %v4592_v62, %v4590_v42 }
 0x660   : > { %6603 = vmatpush1.bf16.msra.mxu0 %v6602_v26  ;;  %v6624_v36 = vpack.c.bf16 %v4597_v38, %v4595_v56  ;;  %v4619_v26 = vld [vmem:[%s8668_s17 + $0x188] sm:$0xff] }
 0x661   : > { %6605 = vmatprep.subr.bf16.mxu0 %v6604_v29  ;;  %v4621_v29 = vld [vmem:[%s8668_s17 + $0x198] sm:$0xff] }
 0x662   : > { %v6648_v24 = vpack.c.bf16 %v4621_v29, %v4619_v26  ;;  %v4553_v26 = vld [vmem:[%s8667_s16 + $0x8] sm:$0xff] }
 0x663   : > { %v4557_v25 = vrot.slane %v4553_v26, 4 }
 0x664   : > { %6607 = vmatpush1.bf16.msra.mxu0 %v6606_v52  ;;  %v4623_v52 = vld [vmem:[%s8668_s17 + $0x1a8] sm:$0xff] }
 0x665   : > { %6609 = vmatprep.subr.bf16.mxu0 %v6608_v35  ;;  %v4625_v35 = vld [vmem:[%s8668_s17 + $0x1b8] sm:$0xff] }
 0x666   : > { %v6652_v34 = vpack.c.bf16 %v4625_v35, %v4623_v52 }
 0x668   : > { %6611 = vmatpush1.bf16.msra.mxu0 %v6610_v14  ;;  %v4355_v14 = vld [vmem:[%s8664_s13 + $0x10] sm:$0x1] }
 0x669   : > { %6613 = vmatprep.subr.bf16.mxu0 %v6612_v49  ;;  %v4391_v28 = vrot.slane %v4355_v14, 5 }
 0x66c   : > { %6615 = vmatpush1.bf16.msra.mxu0 %v6614_v16 }
 0x66d   : > { %6617 = vmatprep.subr.bf16.mxu0 %v6616_v13  ;;  %v4360_v13 = vrot.slane %v4354_v0, 4 }
 0x670   : > { %6619 = vmatpush1.bf16.msra.mxu0 %v6618_v40  ;;  %v4392_v40 = vrot.slane %v4356_v33, 5  ;;  %v4712_v33 = vld [vmem:[%s8670_s19 + $0x8] sm:$0xff] }
 0x671   : > { %6621 = vmatprep.subr.bf16.mxu0 %v6620_v63 }
 0x674   : > { %6623 = vmatpush1.bf16.msra.mxu0 %v6622_v12 }
 0x675   : > { %6625 = vmatprep.subr.bf16.mxu0 %v6624_v36 }
 0x678   : > { %6627 = vmatpush1.bf16.msra.mxu0 %v6626_v45 }
 0x679   : > { %6629 = vmatprep.subr.bf16.mxu0 %v6628_v11 }
 0x67c   : > { %6631 = vmatpush1.bf16.msra.mxu0 %v6630_v19 }
 0x67d   : > { %6633 = vmatprep.subr.bf16.mxu0 %v6632_v8 }
 0x680   : > { %6635 = vmatpush1.bf16.msra.mxu0 %v6634_v20  ;;  %v4622_v20 = vld [vmem:[%s8668_s17 + $0x1a0] sm:$0xff] }
 0x681   : > { %6637 = vmatprep.subr.bf16.mxu0 %v6636_v53  ;;  %v4624_v53 = vld [vmem:[%s8668_s17 + $0x1b0] sm:$0xff] }
 0x682   : > { %v6654_v7 = vpack.c.bf16 %v4624_v53, %v4622_v20 }
 0x684   : > { %6639 = vmatpush1.bf16.msra.mxu0 %v6638_v1  ;;  %v4626_v1 = vld [vmem:[%s8668_s17 + $0x1c0] sm:$0xff] }
 0x685   : > { %6641 = vmatprep.subr.bf16.mxu0 %v6640_v41  ;;  %v4628_v41 = vld [vmem:[%s8668_s17 + $0x1d0] sm:$0xff] }
 0x686   : > { %v6658_v39 = vpack.c.bf16 %v4628_v41, %v4626_v1 }
 0x688   : > { %6643 = vmatpush1.bf16.msra.mxu0 %v6642_v21  ;;  %v4630_v21 = vld [vmem:[%s8668_s17 + $0x1e0] sm:$0xff] }
 0x689   : > { %6645 = vmatprep.subr.bf16.mxu0 %v6644_v23  ;;  %v4632_v23 = vld [vmem:[%s8668_s17 + $0x1f0] sm:$0xff] }
 0x68a   : > { %v6662_v9 = vpack.c.bf16 %v4632_v23, %v4630_v21 }
 0x68c   : > { %6647 = vmatpush1.bf16.msra.mxu0 %v6646_v46  ;;  %v4556_v46 = vrot.slane %v4552_v58, 4 }
 0x68d   : > { %6649 = vmatprep.subr.bf16.mxu0 %v6648_v24 }
 0x690   : > { %6651 = vmatpush1.bf16.msra.mxu0 %v6650_v17 }
 0x691   : > { %6653 = vmatprep.subr.bf16.mxu0 %v6652_v34 }
 0x694   : > { %6655 = vmatpush1.bf16.msra.mxu0 %v6654_v7 }
 0x695   : > { %6657 = vmatprep.subr.bf16.mxu0 %v6656_v18 }
 0x698   : > { %6659 = vmatpush1.bf16.msra.mxu0 %v6658_v39 }
 0x699   : > { %6661 = vmatprep.subr.bf16.mxu0 %v6660_v22 }
 0x69c   : > { %6663 = vmatpush1.bf16.msra.mxu0 %v6662_v9 }
 0x732   : > { %v4342_v49 = vpop.f32.mrb[102].mxu0 }
 0x733   : > { %vm4347_vm1 = vcmp.ge.f32.partialorder %v4342_v49, 0.0  ;;  %v4349_v55 = vmul.f32 0.2, %v4342_v49  ;;  %v4344_v16 = vpop.f32.mrb[103].mxu0 }
 0x734   : > { %vm4348_vm2 = vcmp.ge.f32.partialorder %v4344_v16, 0.0  ;;  %v4350_v51 = vmul.f32 0.2, %v4344_v16 }
 0x735   : > { %v4351_v31 = vsel %vm4347_vm1, %v4342_v49, %v4349_v55 }
 0x736   : > { %v4363_v63 = vmul.f32 %v4359_v32, %v4351_v31  ;;  %v4379_v42 = vmul.f32 %v4375_v30, %v4351_v31  ;;  %v4352_v62 = vsel %vm4348_vm2, %v4344_v16, %v4350_v51  ;;  %v4395_v36 = vmul.f32 %v4391_v28, %v4351_v31  ;;  %v4711_v30 = vld [vmem:[%s8670_s19] sm:$0xff] }
 0x737   : > { %v4364_v56 = vmul.f32 %v4360_v13, %v4352_v62  ;;  %v4380_v38 = vmul.f32 %v4376_v15, %v4352_v62  ;;  %v4396_v47 = vmul.f32 %v4392_v40, %v4352_v62  ;;  %v4715_v16 = vrot.slane %v4711_v30, 4 }
 0x738   : > { %v4369_v12 = vrot.slane %v4363_v63, 1  ;;  %v4383_v60 = vrot.slane %v4379_v42, 2  ;;  %v4399_v10 = vrot.slane %v4395_v36, 3  ;;  %v4716_v28 = vrot.slane %v4712_v33, 4 }
 0x739   : > { %v4370_v6 = vrot.slane %v4364_v56, 1  ;;  %v4384_v11 = vrot.slane %v4380_v38, 2  ;;  %v4400_v37 = vrot.slane %v4396_v47, 3 }
 0x73a   : > { %v4373_v59 = vadd.f32 %v4369_v12, %v4363_v63  ;;  %v4726_v12 = vld [vmem:[#allocation2] sm:$0x1] }
 0x73b   : > { %v4374_v45 = vadd.f32 %v4370_v6, %v4364_v56 }
 0x73c   : > { %v4387_v61 = vadd.f32 %v4383_v60, %v4373_v59 }
 0x73d   : > { %v4388_v5 = vadd.f32 %v4384_v11, %v4374_v45 }
 0x73e   : > { %v4403_v19 = vadd.f32 %v4399_v10, %v4387_v61 }
 0x73f   : > { %v4404_v8 = vadd.f32 %v4400_v37, %v4388_v5 }
 0x740   : > { %v4407_v54 = vmul.f32 0.2, %v4403_v19  ;;  %vm4405_vm4 = vcmp.ge.f32.partialorder %v4403_v19, 0.0 }
 0x741   : > { %vm4406_vm3 = vcmp.ge.f32.partialorder %v4404_v8, 0.0  ;;  %v4408_v2 = vmul.f32 0.2, %v4404_v8 }
 0x742   : > { %v4409_v57 = vsel %vm4405_vm4, %v4403_v19, %v4407_v54 }
 0x743   : > { %v4410_v3 = vsel %vm4406_vm3, %v4404_v8, %v4408_v2 }
 0x744   : > { %4539 = vmatprep.mubr.f32.mxu1 %v4410_v3 }
 0x745   : > { %4540 = vmatmul.mubr.f32.vlgmr.msra.gmra.mrb[120].mxu1 %v4409_v57 }
 0x818   : > { %v4541_v29 = vpop.f32.mrb[120].mxu1 }
 0x819   : > { %vm4546_vm5 = vcmp.ge.f32.partialorder %v4541_v29, 0.0  ;;  %v4548_v24 = vmul.f32 0.2, %v4541_v29  ;;  %v4543_v48 = vpop.f32.mrb[121].mxu1 }
 0x81a   : > { %vm4547_vm6 = vcmp.ge.f32.partialorder %v4543_v48, 0.0  ;;  %v4549_v52 = vmul.f32 0.2, %v4543_v48 }
 0x81b   : > { %v4550_v35 = vsel %vm4546_vm5, %v4541_v29, %v4548_v24 }
 0x81c   : > { %v4560_v17 = vmul.f32 %v4556_v46, %v4550_v35  ;;  %v4551_v34 = vsel %vm4547_vm6, %v4543_v48, %v4549_v52 }
 0x81d   : > { %v4561_v43 = vmul.f32 %v4557_v25, %v4551_v34 }
 0x81e   : > { %v4566_v0 = vmul.f32 0.2, %v4560_v17  ;;  %vm4564_vm8 = vcmp.ge.f32.partialorder %v4560_v17, 0.0 }
 0x81f   : > { %vm4565_vm7 = vcmp.ge.f32.partialorder %v4561_v43, 0.0  ;;  %v4567_v14 = vmul.f32 0.2, %v4561_v43 }
 0x820   : > { %v4568_v32 = vsel %vm4564_vm8, %v4560_v17, %v4566_v0 }
 0x821   : > { %v4569_v49 = vsel %vm4565_vm7, %v4561_v43, %v4567_v14 }
 0x822   : > { %4698 = vmatprep.mubr.f32.mxu0 %v4569_v49 }
 0x823   : > { %4699 = vmatmul.mubr.f32.vlgmr.msra.gmra.mrb[104].mxu0 %v4568_v32 }
 0x8f6   : > { %v4700_v55 = vpop.f32.mrb[104].mxu0 }
 0x8f7   : > { %vm4705_vm9 = vcmp.ge.f32.partialorder %v4700_v55, 0.0  ;;  %v4707_v13 = vmul.f32 0.2, %v4700_v55  ;;  %v4702_v15 = vpop.f32.mrb[105].mxu0 }
 0x8f8   : > { %vm4706_vm10 = vcmp.ge.f32.partialorder %v4702_v15, 0.0  ;;  %v4708_v51 = vmul.f32 0.2, %v4702_v15 }
 0x8f9   : > { %v4709_v31 = vsel %vm4705_vm9, %v4700_v55, %v4707_v13 }
 0x8fa   : > { %v4710_v40 = vsel %vm4706_vm10, %v4702_v15, %v4708_v51  ;;  %v4719_v63 = vmul.f32 %v4715_v16, %v4709_v31 }
 0x8fb   : > { %v4720_v42 = vmul.f32 %v4716_v28, %v4710_v40 }
 0x8fc   : > { %v4721_v62 = vsel %vm793_vm0, %v4719_v63, 0.0 }
 0x8fd   : > { %v4722_v56 = vsel %vm793_vm0, %v4720_v42, 0.0 }
 0x8fe   : > { %v4723_v38 = vadd.f32 %v4722_v56, %v4721_v62 }
 0x900   : > { %4724 = vadd.xlane.f32.xlu0 %v4723_v38 }
 0x98d   : > { %v4725_v36 = vpop.xlane.xlu0 %4724 }
 0x98e   : > { %v4727_v6 = vadd.f32 %v4726_v12, %v4725_v36 }
 0x990   : > { %4729 = vst.msk [vmem:[%s654_s15] sm:$0x1] %vm4728_vm11, %v4727_v6 }
 0x991 PF: > { %s33_s2 = sadd.s32 1, %s6684_s2  }
 0x992   : > { %p30_p4 = scmp.ge.s32.totalorder %s33_s2, 4  }
 0x994   :  { %32 = sbr.rel (!%p30_p4) target bundleno = 7 (0x7), region = 158 }

</bundles_post_ra>
